<compile_context>
chip_gen: v7x
topology: tpu7x:2x2x1
jax: 0.10.0
libtpu: 0.0.40
codegen_flags: <defaults>
</compile_context>

<pallas_src>
import functools

import jax
import jax.numpy as jnp
from jax.experimental import pallas as pl
from jax.experimental.pallas import tpu as pltpu


def _round_up(x, m):
    return (x + m - 1) // m * m


def _pick_tm(m):
    """M-tile: large tiles for the big early layers, right-sized for the tiny late ones."""
    if m >= 16384:
        return 2048
    if m >= 4096:
        return 1024
    if m >= 1024:
        return 512
    if m >= 512:
        return 256
    if m >= 128:
        return 128
    return _round_up(max(m, 16), 16)   # bf16 sublane packing => keep a multiple of 16


# ----------------------------- Pallas kernel -----------------------------

def _conv_gemm_kernel(a_ref, w_ref, b_ref, o_ref, *, neg_slope, leaky, sigmoid):
    # MXU GEMM on bf16 operands with f32 accumulation.
    acc = jnp.dot(a_ref[...], w_ref[...], preferred_element_type=jnp.float32)
    # Conv bias / folded-BN shift (zeros for the bias-free layers).
    acc = acc + b_ref[...]
    # Epilogue stays in f32 on the accumulator (v5e has no bf16 VPU/EUP path).
    if leaky:
        acc = jnp.where(acc >= 0, acc, neg_slope * acc)
    if sigmoid:
        acc = 1.0 / (1.0 + jnp.exp(-acc))        # == nn.Sigmoid in f32
    o_ref[...] = acc.astype(o_ref.dtype)


def conv_gemm(patches, w, bias, *, leaky, sigmoid, out_dtype, neg_slope=0.01):
    """patches: (M, K) bf16, w: (K, Cout) bf16, bias: (1, Cout) f32 -> (M, Cout)."""
    m, k = patches.shape
    kw_, n = w.shape
    assert k == kw_, (k, kw_)
    tm = _pick_tm(m)
    m_pad = _round_up(m, tm)
    if m_pad != m:                        # only the tiny deep layers (M = 2..8) hit this
        patches = jnp.pad(patches, ((0, m_pad - m), (0, 0)))

    cost = pl.CostEstimate(
        flops=2 * m_pad * k * n,
        transcendentals=(m_pad * n) if sigmoid else 0,
        bytes_accessed=(m_pad * k * patches.dtype.itemsize
                        + k * n * w.dtype.itemsize
                        + n * 4
                        + m_pad * n * jnp.dtype(out_dtype).itemsize),
    )

    kernel = functools.partial(_conv_gemm_kernel, neg_slope=neg_slope,
                               leaky=leaky, sigmoid=sigmoid)
    out = pl.pallas_call(
        kernel,
        out_shape=jax.ShapeDtypeStruct((m_pad, n), out_dtype),
        grid_spec=pltpu.PrefetchScalarGridSpec(
            num_scalar_prefetch=0,
            grid=(m_pad // tm,),
            in_specs=[
                pl.BlockSpec((tm, k), lambda i: (i, 0)),   # A tile, streamed over M
                pl.BlockSpec((k, n), lambda i: (0, 0)),    # weight, resident across grid
                pl.BlockSpec((1, n), lambda i: (0, 0)),    # bias, resident across grid
            ],
            out_specs=pl.BlockSpec((tm, n), lambda i: (i, 0)),
        ),
        compiler_params=pltpu.CompilerParams(
            dimension_semantics=("parallel",),
            vmem_limit_bytes=32 * 1024 * 1024,     # explicit budget (fits v7x's 64 MiB)
        ),
        cost_estimate=cost,
    )(patches, w, bias)
    return out[:m] if m_pad != m else out


# ----------------------------- JAX glue -----------------------------

def _extract_patches(x_nhwc, kernel, stride, pad):
    """im2col: (N,H,W,C) -> (N*Hout*Wout, kernel*kernel*C); feature order (kh, kw, Cin)."""
    # TODO(synk): patches are still materialized host-side (in bf16); a fully fused conv
    # would accumulate the 16 shifted matmuls inside the kernel instead.
    n, h, w, c = x_nhwc.shape
    hout = (h + 2 * pad - kernel) // stride + 1
    wout = (w + 2 * pad - kernel) // stride + 1
    xp = jnp.pad(x_nhwc, ((0, 0), (pad, pad), (pad, pad), (0, 0)))
    cols = []
    for i in range(kernel):
        for j in range(kernel):
            cols.append(xp[:, i:i + stride * (hout - 1) + 1:stride,
                           j:j + stride * (wout - 1) + 1:stride, :])
    patches = jnp.concatenate(cols, axis=-1)              # (N, Hout, Wout, k*k*C)
    return patches.reshape(n * hout * wout, kernel * kernel * c), (n, hout, wout)


def init_params(key, nc=3, nf=8, eps=1e-5):
    chans = [(nc, nf), (nf, 2 * nf), (2 * nf, 4 * nf), (4 * nf, 8 * nf),
             (8 * nf, 8 * nf), (8 * nf, 8 * nf), (8 * nf, 101)]
    has_bn = [False, True, True, True, True, True, False]
    params = []
    for (cin, cout), bn in zip(chans, has_bn):
        key, kw, kg, kb, km, kv = jax.random.split(key, 6)
        w = jax.random.normal(kw, (cout, cin, 4, 4), jnp.float32) * 0.05
        if bn:
            gamma = 1.0 + 0.1 * jax.random.normal(kg, (cout,), jnp.float32)
            beta = 0.1 * jax.random.normal(kb, (cout,), jnp.float32)
            mean = 0.1 * jax.random.normal(km, (cout,), jnp.float32)
            var = jnp.abs(jax.random.normal(kv, (cout,), jnp.float32)) + 0.5
            scale = gamma / jnp.sqrt(var + eps)       # inference BN -> per-channel affine
            bias = beta - mean * scale
        else:
            scale = jnp.ones((cout,), jnp.float32)
            bias = jnp.zeros((cout,), jnp.float32)
        params.append(dict(w=w, scale=scale, bias=bias))
    return params


def prepare_params(params, compute_dtype=jnp.bfloat16):
    """One-time prep: fold BN scale into the conv weight, transpose to GEMM layout, cast."""
    prepped = []
    for p in params:
        w = p['w'] * p['scale'][:, None, None, None]          # conv has no bias -> exact fold
        cout = w.shape[0]
        wk = jnp.transpose(w, (2, 3, 1, 0)).reshape(-1, cout)  # (kh*kw*Cin, Cout)
        prepped.append(dict(wk=wk.astype(compute_dtype),
                            bias=p['bias'].reshape(1, cout).astype(jnp.float32)))
    return prepped


def cnn_forward(x_nchw, prepped):
    # external NCHW (PyTorch) -> internal NHWC; inter-layer activations kept in bf16.
    x = jnp.transpose(x_nchw, (0, 2, 3, 1)).astype(jnp.bfloat16)
    n_layers = len(prepped)
    for idx, p in enumerate(prepped):
        last = idx == n_layers - 1
        cout = p['wk'].shape[1]
        # TODO(synk): Dropout(0.5) before the final conv is identity in inference mode.
        patches, (n, hout, wout) = _extract_patches(x, kernel=4, stride=2, pad=1)
        out = conv_gemm(patches, p['wk'], p['bias'],
                        leaky=not last, sigmoid=last,
                        out_dtype=jnp.float32 if last else jnp.bfloat16)
        x = out.reshape(n, hout, wout, cout)
    return jnp.transpose(x, (0, 3, 1, 2)).astype(jnp.float32)   # back to NCHW


if __name__ == "__main__":
    key = jax.random.PRNGKey(0)
    kp, kx = jax.random.split(key)
    nc, nf = 3, 8
    params = init_params(kp, nc=nc, nf=nf)
    prepped = prepare_params(params)
    # 7 stride-2 convs => spatial must be 128 to reach a valid 1x1 output.
    x = jax.random.normal(kx, (2, nc, 128, 128), jnp.float32)

    fwd = jax.jit(cnn_forward)
    out = jax.block_until_ready(fwd(x, prepped))
    assert out.shape == (2, 101, 1, 1), out.shape
    assert bool(jnp.all(jnp.isfinite(out)))
    assert bool(jnp.all((out >= 0.0) & (out <= 1.0)))  # sigmoid output range
    print("KERNEL_OK")
</pallas_src>

<mosaic_0001>
module attributes {stable_mosaic.version = 11 : i64} {
  func.func @_conv_gemm_kernel(%arg0: i32, %arg1: memref<1024x48xbf16, #tpu.memory_space<vmem>>, %arg2: memref<48x8xbf16, #tpu.memory_space<vmem>>, %arg3: memref<1x8xf32, #tpu.memory_space<vmem>>, %arg4: memref<1024x8xbf16, #tpu.memory_space<vmem>>) attributes {dimension_semantics = [#tpu.dimension_semantics<parallel>], iteration_bounds = array<i64: 8>, scalar_prefetch = 0 : i64, scratch_operands = 0 : i64, tpu.core_type = #tpu.core_type<tc>, window_params = [{transform_indices = @transform_0, window_bounds = array<i64: 1024, 48>}, {pipeline_mode = #tpu.pipeline_mode<synchronous>, transform_indices = @transform_1, window_bounds = array<i64: 48, 8>}, {pipeline_mode = #tpu.pipeline_mode<synchronous>, transform_indices = @transform_2, window_bounds = array<i64: 1, 8>}, {transform_indices = @transform_3, window_bounds = array<i64: 1024, 8>}]} {
    %c0 = arith.constant 0 : index
    %c0_0 = arith.constant 0 : index
    %0 = vector.load %arg1[%c0, %c0_0] : memref<1024x48xbf16, #tpu.memory_space<vmem>>, vector<1024x48xbf16>
    %c0_1 = arith.constant 0 : index
    %c0_2 = arith.constant 0 : index
    %1 = vector.load %arg2[%c0_1, %c0_2] : memref<48x8xbf16, #tpu.memory_space<vmem>>, vector<48x8xbf16>
    %cst = arith.constant dense<0.000000e+00> : vector<1024x8xf32>
    %2 = tpu.matmul %0, %1, %cst {dimension_numbers = #tpu.dot_dimension_numbers<[1], [0], [0], [1], [0, 0, 1, 1], [], []>} : vector<1024x48xbf16>, vector<48x8xbf16>, vector<1024x8xf32> -> vector<1024x8xf32>
    %c0_3 = arith.constant 0 : index
    %c0_4 = arith.constant 0 : index
    %3 = vector.load %arg3[%c0_3, %c0_4] : memref<1x8xf32, #tpu.memory_space<vmem>>, vector<1x8xf32>
    %4 = vector.broadcast %3 : vector<1x8xf32> to vector<1024x8xf32>
    %5 = arith.addf %2, %4 : vector<1024x8xf32>
    %cst_5 = arith.constant 0.000000e+00 : f32
    %6 = vector.broadcast %cst_5 : f32 to vector<1024x8xf32>
    %7 = arith.cmpf oge, %5, %6 : vector<1024x8xf32>
    %cst_6 = arith.constant 0.00999999977 : f32
    %8 = vector.broadcast %cst_6 : f32 to vector<1024x8xf32>
    %9 = arith.mulf %8, %5 : vector<1024x8xf32>
    %10 = arith.select %7, %5, %9 : vector<1024x8xi1>, vector<1024x8xf32>
    %11 = arith.truncf %10 : vector<1024x8xf32> to vector<1024x8xbf16>
    %c0_7 = arith.constant 0 : index
    %c0_8 = arith.constant 0 : index
    %12 = vector.load %arg4[%c0_7, %c0_8] : memref<1024x8xbf16, #tpu.memory_space<vmem>>, vector<1024x8xbf16>
    tpu.vector_store %arg4[%c0_7, %c0_8], %11 {strides = array<i32>} : memref<1024x8xbf16, #tpu.memory_space<vmem>>, vector<1024x8xbf16>,
    return
  }
  func.func @transform_0(%arg0: i32) -> (i32, i32) {
    %c0_i32 = arith.constant 0 : i32
    %c0_i32_0 = arith.constant 0 : i32
    return %arg0, %c0_i32 : i32, i32
  }
  func.func @transform_1(%arg0: i32) -> (i32, i32) {
    %c0_i32 = arith.constant 0 : i32
    %c0_i32_0 = arith.constant 0 : i32
    %c0_i32_1 = arith.constant 0 : i32
    return %c0_i32, %c0_i32_0 : i32, i32
  }
  func.func @transform_2(%arg0: i32) -> (i32, i32) {
    %c0_i32 = arith.constant 0 : i32
    %c0_i32_0 = arith.constant 0 : i32
    %c0_i32_1 = arith.constant 0 : i32
    return %c0_i32, %c0_i32_0 : i32, i32
  }
  func.func @transform_3(%arg0: i32) -> (i32, i32) {
    %c0_i32 = arith.constant 0 : i32
    %c0_i32_0 = arith.constant 0 : i32
    return %arg0, %c0_i32 : i32, i32
  }
}

module attributes {stable_mosaic.version = 11 : i64} {
  func.func @_conv_gemm_kernel(%arg0: i32, %arg1: memref<512x128xbf16, #tpu.memory_space<vmem>>, %arg2: memref<128x16xbf16, #tpu.memory_space<vmem>>, %arg3: memref<1x16xf32, #tpu.memory_space<vmem>>, %arg4: memref<512x16xbf16, #tpu.memory_space<vmem>>) attributes {dimension_semantics = [#tpu.dimension_semantics<parallel>], iteration_bounds = array<i64: 4>, scalar_prefetch = 0 : i64, scratch_operands = 0 : i64, tpu.core_type = #tpu.core_type<tc>, window_params = [{transform_indices = @transform_0, window_bounds = array<i64: 512, 128>}, {pipeline_mode = #tpu.pipeline_mode<synchronous>, transform_indices = @transform_1, window_bounds = array<i64: 128, 16>}, {pipeline_mode = #tpu.pipeline_mode<synchronous>, transform_indices = @transform_2, window_bounds = array<i64: 1, 16>}, {transform_indices = @transform_3, window_bounds = array<i64: 512, 16>}]} {
    %c0 = arith.constant 0 : index
    %c0_0 = arith.constant 0 : index
    %0 = vector.load %arg1[%c0, %c0_0] : memref<512x128xbf16, #tpu.memory_space<vmem>>, vector<512x128xbf16>
    %c0_1 = arith.constant 0 : index
    %c0_2 = arith.constant 0 : index
    %1 = vector.load %arg2[%c0_1, %c0_2] : memref<128x16xbf16, #tpu.memory_space<vmem>>, vector<128x16xbf16>
    %cst = arith.constant dense<0.000000e+00> : vector<512x16xf32>
    %2 = tpu.matmul %0, %1, %cst {dimension_numbers = #tpu.dot_dimension_numbers<[1], [0], [0], [1], [0, 0, 1, 1], [], []>} : vector<512x128xbf16>, vector<128x16xbf16>, vector<512x16xf32> -> vector<512x16xf32>
    %c0_3 = arith.constant 0 : index
    %c0_4 = arith.constant 0 : index
    %3 = vector.load %arg3[%c0_3, %c0_4] : memref<1x16xf32, #tpu.memory_space<vmem>>, vector<1x16xf32>
    %4 = vector.broadcast %3 : vector<1x16xf32> to vector<512x16xf32>
    %5 = arith.addf %2, %4 : vector<512x16xf32>
    %cst_5 = arith.constant 0.000000e+00 : f32
    %6 = vector.broadcast %cst_5 : f32 to vector<512x16xf32>
    %7 = arith.cmpf oge, %5, %6 : vector<512x16xf32>
    %cst_6 = arith.constant 0.00999999977 : f32
    %8 = vector.broadcast %cst_6 : f32 to vector<512x16xf32>
    %9 = arith.mulf %8, %5 : vector<512x16xf32>
    %10 = arith.select %7, %5, %9 : vector<512x16xi1>, vector<512x16xf32>
    %11 = arith.truncf %10 : vector<512x16xf32> to vector<512x16xbf16>
    %c0_7 = arith.constant 0 : index
    %c0_8 = arith.constant 0 : index
    %12 = vector.load %arg4[%c0_7, %c0_8] : memref<512x16xbf16, #tpu.memory_space<vmem>>, vector<512x16xbf16>
    tpu.vector_store %arg4[%c0_7, %c0_8], %11 {strides = array<i32>} : memref<512x16xbf16, #tpu.memory_space<vmem>>, vector<512x16xbf16>,
    return
  }
  func.func @transform_0(%arg0: i32) -> (i32, i32) {
    %c0_i32 = arith.constant 0 : i32
    %c0_i32_0 = arith.constant 0 : i32
    return %arg0, %c0_i32 : i32, i32
  }
  func.func @transform_1(%arg0: i32) -> (i32, i32) {
    %c0_i32 = arith.constant 0 : i32
    %c0_i32_0 = arith.constant 0 : i32
    %c0_i32_1 = arith.constant 0 : i32
    return %c0_i32, %c0_i32_0 : i32, i32
  }
  func.func @transform_2(%arg0: i32) -> (i32, i32) {
    %c0_i32 = arith.constant 0 : i32
    %c0_i32_0 = arith.constant 0 : i32
    %c0_i32_1 = arith.constant 0 : i32
    return %c0_i32, %c0_i32_0 : i32, i32
  }
  func.func @transform_3(%arg0: i32) -> (i32, i32) {
    %c0_i32 = arith.constant 0 : i32
    %c0_i32_0 = arith.constant 0 : i32
    return %arg0, %c0_i32 : i32, i32
  }
}

module attributes {stable_mosaic.version = 11 : i64} {
  func.func @_conv_gemm_kernel(%arg0: i32, %arg1: memref<256x256xbf16, #tpu.memory_space<vmem>>, %arg2: memref<256x32xbf16, #tpu.memory_space<vmem>>, %arg3: memref<1x32xf32, #tpu.memory_space<vmem>>, %arg4: memref<256x32xbf16, #tpu.memory_space<vmem>>) attributes {dimension_semantics = [#tpu.dimension_semantics<parallel>], iteration_bounds = array<i64: 2>, scalar_prefetch = 0 : i64, scratch_operands = 0 : i64, tpu.core_type = #tpu.core_type<tc>, window_params = [{transform_indices = @transform_0, window_bounds = array<i64: 256, 256>}, {pipeline_mode = #tpu.pipeline_mode<synchronous>, transform_indices = @transform_1, window_bounds = array<i64: 256, 32>}, {pipeline_mode = #tpu.pipeline_mode<synchronous>, transform_indices = @transform_2, window_bounds = array<i64: 1, 32>}, {transform_indices = @transform_3, window_bounds = array<i64: 256, 32>}]} {
    %c0 = arith.constant 0 : index
    %c0_0 = arith.constant 0 : index
    %0 = vector.load %arg1[%c0, %c0_0] : memref<256x256xbf16, #tpu.memory_space<vmem>>, vector<256x256xbf16>
    %c0_1 = arith.constant 0 : index
    %c0_2 = arith.constant 0 : index
    %1 = vector.load %arg2[%c0_1, %c0_2] : memref<256x32xbf16, #tpu.memory_space<vmem>>, vector<256x32xbf16>
    %cst = arith.constant dense<0.000000e+00> : vector<256x32xf32>
    %2 = tpu.matmul %0, %1, %cst {dimension_numbers = #tpu.dot_dimension_numbers<[1], [0], [0], [1], [0, 0, 1, 1], [], []>} : vector<256x256xbf16>, vector<256x32xbf16>, vector<256x32xf32> -> vector<256x32xf32>
    %c0_3 = arith.constant 0 : index
    %c0_4 = arith.constant 0 : index
    %3 = vector.load %arg3[%c0_3, %c0_4] : memref<1x32xf32, #tpu.memory_space<vmem>>, vector<1x32xf32>
    %4 = vector.broadcast %3 : vector<1x32xf32> to vector<256x32xf32>
    %5 = arith.addf %2, %4 : vector<256x32xf32>
    %cst_5 = arith.constant 0.000000e+00 : f32
    %6 = vector.broadcast %cst_5 : f32 to vector<256x32xf32>
    %7 = arith.cmpf oge, %5, %6 : vector<256x32xf32>
    %cst_6 = arith.constant 0.00999999977 : f32
    %8 = vector.broadcast %cst_6 : f32 to vector<256x32xf32>
    %9 = arith.mulf %8, %5 : vector<256x32xf32>
    %10 = arith.select %7, %5, %9 : vector<256x32xi1>, vector<256x32xf32>
    %11 = arith.truncf %10 : vector<256x32xf32> to vector<256x32xbf16>
    %c0_7 = arith.constant 0 : index
    %c0_8 = arith.constant 0 : index
    %12 = vector.load %arg4[%c0_7, %c0_8] : memref<256x32xbf16, #tpu.memory_space<vmem>>, vector<256x32xbf16>
    tpu.vector_store %arg4[%c0_7, %c0_8], %11 {strides = array<i32>} : memref<256x32xbf16, #tpu.memory_space<vmem>>, vector<256x32xbf16>,
    return
  }
  func.func @transform_0(%arg0: i32) -> (i32, i32) {
    %c0_i32 = arith.constant 0 : i32
    %c0_i32_0 = arith.constant 0 : i32
    return %arg0, %c0_i32 : i32, i32
  }
  func.func @transform_1(%arg0: i32) -> (i32, i32) {
    %c0_i32 = arith.constant 0 : i32
    %c0_i32_0 = arith.constant 0 : i32
    %c0_i32_1 = arith.constant 0 : i32
    return %c0_i32, %c0_i32_0 : i32, i32
  }
  func.func @transform_2(%arg0: i32) -> (i32, i32) {
    %c0_i32 = arith.constant 0 : i32
    %c0_i32_0 = arith.constant 0 : i32
    %c0_i32_1 = arith.constant 0 : i32
    return %c0_i32, %c0_i32_0 : i32, i32
  }
  func.func @transform_3(%arg0: i32) -> (i32, i32) {
    %c0_i32 = arith.constant 0 : i32
    %c0_i32_0 = arith.constant 0 : i32
    return %arg0, %c0_i32 : i32, i32
  }
}

module attributes {stable_mosaic.version = 11 : i64} {
  func.func @_conv_gemm_kernel(%arg0: i32, %arg1: memref<128x512xbf16, #tpu.memory_space<vmem>>, %arg2: memref<512x64xbf16, #tpu.memory_space<vmem>>, %arg3: memref<1x64xf32, #tpu.memory_space<vmem>>, %arg4: memref<128x64xbf16, #tpu.memory_space<vmem>>) attributes {dimension_semantics = [#tpu.dimension_semantics<parallel>], iteration_bounds = array<i64: 1>, scalar_prefetch = 0 : i64, scratch_operands = 0 : i64, tpu.core_type = #tpu.core_type<tc>, window_params = [{transform_indices = @transform_0, window_bounds = array<i64: 128, 512>}, {pipeline_mode = #tpu.pipeline_mode<synchronous>, transform_indices = @transform_1, window_bounds = array<i64: 512, 64>}, {pipeline_mode = #tpu.pipeline_mode<synchronous>, transform_indices = @transform_2, window_bounds = array<i64: 1, 64>}, {transform_indices = @transform_3, window_bounds = array<i64: 128, 64>}]} {
    %c0 = arith.constant 0 : index
    %c0_0 = arith.constant 0 : index
    %0 = vector.load %arg1[%c0, %c0_0] : memref<128x512xbf16, #tpu.memory_space<vmem>>, vector<128x512xbf16>
    %c0_1 = arith.constant 0 : index
    %c0_2 = arith.constant 0 : index
    %1 = vector.load %arg2[%c0_1, %c0_2] : memref<512x64xbf16, #tpu.memory_space<vmem>>, vector<512x64xbf16>
    %cst = arith.constant dense<0.000000e+00> : vector<128x64xf32>
    %2 = tpu.matmul %0, %1, %cst {dimension_numbers = #tpu.dot_dimension_numbers<[1], [0], [0], [1], [0, 0, 1, 1], [], []>} : vector<128x512xbf16>, vector<512x64xbf16>, vector<128x64xf32> -> vector<128x64xf32>
    %c0_3 = arith.constant 0 : index
    %c0_4 = arith.constant 0 : index
    %3 = vector.load %arg3[%c0_3, %c0_4] : memref<1x64xf32, #tpu.memory_space<vmem>>, vector<1x64xf32>
    %4 = vector.broadcast %3 : vector<1x64xf32> to vector<128x64xf32>
    %5 = arith.addf %2, %4 : vector<128x64xf32>
    %cst_5 = arith.constant 0.000000e+00 : f32
    %6 = vector.broadcast %cst_5 : f32 to vector<128x64xf32>
    %7 = arith.cmpf oge, %5, %6 : vector<128x64xf32>
    %cst_6 = arith.constant 0.00999999977 : f32
    %8 = vector.broadcast %cst_6 : f32 to vector<128x64xf32>
    %9 = arith.mulf %8, %5 : vector<128x64xf32>
    %10 = arith.select %7, %5, %9 : vector<128x64xi1>, vector<128x64xf32>
    %11 = arith.truncf %10 : vector<128x64xf32> to vector<128x64xbf16>
    %c0_7 = arith.constant 0 : index
    %c0_8 = arith.constant 0 : index
    %12 = vector.load %arg4[%c0_7, %c0_8] : memref<128x64xbf16, #tpu.memory_space<vmem>>, vector<128x64xbf16>
    tpu.vector_store %arg4[%c0_7, %c0_8], %11 {strides = array<i32>} : memref<128x64xbf16, #tpu.memory_space<vmem>>, vector<128x64xbf16>,
    return
  }
  func.func @transform_0(%arg0: i32) -> (i32, i32) {
    %c0_i32 = arith.constant 0 : i32
    %c0_i32_0 = arith.constant 0 : i32
    return %arg0, %c0_i32 : i32, i32
  }
  func.func @transform_1(%arg0: i32) -> (i32, i32) {
    %c0_i32 = arith.constant 0 : i32
    %c0_i32_0 = arith.constant 0 : i32
    %c0_i32_1 = arith.constant 0 : i32
    return %c0_i32, %c0_i32_0 : i32, i32
  }
  func.func @transform_2(%arg0: i32) -> (i32, i32) {
    %c0_i32 = arith.constant 0 : i32
    %c0_i32_0 = arith.constant 0 : i32
    %c0_i32_1 = arith.constant 0 : i32
    return %c0_i32, %c0_i32_0 : i32, i32
  }
  func.func @transform_3(%arg0: i32) -> (i32, i32) {
    %c0_i32 = arith.constant 0 : i32
    %c0_i32_0 = arith.constant 0 : i32
    return %arg0, %c0_i32 : i32, i32
  }
}

module attributes {stable_mosaic.version = 11 : i64} {
  func.func @_conv_gemm_kernel(%arg0: i32, %arg1: memref<32x1024xbf16, #tpu.memory_space<vmem>>, %arg2: memref<1024x64xbf16, #tpu.memory_space<vmem>>, %arg3: memref<1x64xf32, #tpu.memory_space<vmem>>, %arg4: memref<32x64xbf16, #tpu.memory_space<vmem>>) attributes {dimension_semantics = [#tpu.dimension_semantics<parallel>], iteration_bounds = array<i64: 1>, scalar_prefetch = 0 : i64, scratch_operands = 0 : i64, tpu.core_type = #tpu.core_type<tc>, window_params = [{transform_indices = @transform_0, window_bounds = array<i64: 32, 1024>}, {pipeline_mode = #tpu.pipeline_mode<synchronous>, transform_indices = @transform_1, window_bounds = array<i64: 1024, 64>}, {pipeline_mode = #tpu.pipeline_mode<synchronous>, transform_indices = @transform_2, window_bounds = array<i64: 1, 64>}, {transform_indices = @transform_3, window_bounds = array<i64: 32, 64>}]} {
    %c0 = arith.constant 0 : index
    %c0_0 = arith.constant 0 : index
    %0 = vector.load %arg1[%c0, %c0_0] : memref<32x1024xbf16, #tpu.memory_space<vmem>>, vector<32x1024xbf16>
    %c0_1 = arith.constant 0 : index
    %c0_2 = arith.constant 0 : index
    %1 = vector.load %arg2[%c0_1, %c0_2] : memref<1024x64xbf16, #tpu.memory_space<vmem>>, vector<1024x64xbf16>
    %cst = arith.constant dense<0.000000e+00> : vector<32x64xf32>
    %2 = tpu.matmul %0, %1, %cst {dimension_numbers = #tpu.dot_dimension_numbers<[1], [0], [0], [1], [0, 0, 1, 1], [], []>} : vector<32x1024xbf16>, vector<1024x64xbf16>, vector<32x64xf32> -> vector<32x64xf32>
    %c0_3 = arith.constant 0 : index
    %c0_4 = arith.constant 0 : index
    %3 = vector.load %arg3[%c0_3, %c0_4] : memref<1x64xf32, #tpu.memory_space<vmem>>, vector<1x64xf32>
    %4 = vector.broadcast %3 : vector<1x64xf32> to vector<32x64xf32>
    %5 = arith.addf %2, %4 : vector<32x64xf32>
    %cst_5 = arith.constant 0.000000e+00 : f32
    %6 = vector.broadcast %cst_5 : f32 to vector<32x64xf32>
    %7 = arith.cmpf oge, %5, %6 : vector<32x64xf32>
    %cst_6 = arith.constant 0.00999999977 : f32
    %8 = vector.broadcast %cst_6 : f32 to vector<32x64xf32>
    %9 = arith.mulf %8, %5 : vector<32x64xf32>
    %10 = arith.select %7, %5, %9 : vector<32x64xi1>, vector<32x64xf32>
    %11 = arith.truncf %10 : vector<32x64xf32> to vector<32x64xbf16>
    %c0_7 = arith.constant 0 : index
    %c0_8 = arith.constant 0 : index
    %12 = vector.load %arg4[%c0_7, %c0_8] : memref<32x64xbf16, #tpu.memory_space<vmem>>, vector<32x64xbf16>
    tpu.vector_store %arg4[%c0_7, %c0_8], %11 {strides = array<i32>} : memref<32x64xbf16, #tpu.memory_space<vmem>>, vector<32x64xbf16>,
    return
  }
  func.func @transform_0(%arg0: i32) -> (i32, i32) {
    %c0_i32 = arith.constant 0 : i32
    %c0_i32_0 = arith.constant 0 : i32
    return %arg0, %c0_i32 : i32, i32
  }
  func.func @transform_1(%arg0: i32) -> (i32, i32) {
    %c0_i32 = arith.constant 0 : i32
    %c0_i32_0 = arith.constant 0 : i32
    %c0_i32_1 = arith.constant 0 : i32
    return %c0_i32, %c0_i32_0 : i32, i32
  }
  func.func @transform_2(%arg0: i32) -> (i32, i32) {
    %c0_i32 = arith.constant 0 : i32
    %c0_i32_0 = arith.constant 0 : i32
    %c0_i32_1 = arith.constant 0 : i32
    return %c0_i32, %c0_i32_0 : i32, i32
  }
  func.func @transform_3(%arg0: i32) -> (i32, i32) {
    %c0_i32 = arith.constant 0 : i32
    %c0_i32_0 = arith.constant 0 : i32
    return %arg0, %c0_i32 : i32, i32
  }
}

module attributes {stable_mosaic.version = 11 : i64} {
  func.func @_conv_gemm_kernel(%arg0: i32, %arg1: memref<16x1024xbf16, #tpu.memory_space<vmem>>, %arg2: memref<1024x64xbf16, #tpu.memory_space<vmem>>, %arg3: memref<1x64xf32, #tpu.memory_space<vmem>>, %arg4: memref<16x64xbf16, #tpu.memory_space<vmem>>) attributes {dimension_semantics = [#tpu.dimension_semantics<parallel>], iteration_bounds = array<i64: 1>, scalar_prefetch = 0 : i64, scratch_operands = 0 : i64, tpu.core_type = #tpu.core_type<tc>, window_params = [{transform_indices = @transform_0, window_bounds = array<i64: 16, 1024>}, {pipeline_mode = #tpu.pipeline_mode<synchronous>, transform_indices = @transform_1, window_bounds = array<i64: 1024, 64>}, {pipeline_mode = #tpu.pipeline_mode<synchronous>, transform_indices = @transform_2, window_bounds = array<i64: 1, 64>}, {transform_indices = @transform_3, window_bounds = array<i64: 16, 64>}]} {
    %c0 = arith.constant 0 : index
    %c0_0 = arith.constant 0 : index
    %0 = vector.load %arg1[%c0, %c0_0] : memref<16x1024xbf16, #tpu.memory_space<vmem>>, vector<16x1024xbf16>
    %c0_1 = arith.constant 0 : index
    %c0_2 = arith.constant 0 : index
    %1 = vector.load %arg2[%c0_1, %c0_2] : memref<1024x64xbf16, #tpu.memory_space<vmem>>, vector<1024x64xbf16>
    %cst = arith.constant dense<0.000000e+00> : vector<16x64xf32>
    %2 = tpu.matmul %0, %1, %cst {dimension_numbers = #tpu.dot_dimension_numbers<[1], [0], [0], [1], [0, 0, 1, 1], [], []>} : vector<16x1024xbf16>, vector<1024x64xbf16>, vector<16x64xf32> -> vector<16x64xf32>
    %c0_3 = arith.constant 0 : index
    %c0_4 = arith.constant 0 : index
    %3 = vector.load %arg3[%c0_3, %c0_4] : memref<1x64xf32, #tpu.memory_space<vmem>>, vector<1x64xf32>
    %4 = vector.broadcast %3 : vector<1x64xf32> to vector<16x64xf32>
    %5 = arith.addf %2, %4 : vector<16x64xf32>
    %cst_5 = arith.constant 0.000000e+00 : f32
    %6 = vector.broadcast %cst_5 : f32 to vector<16x64xf32>
    %7 = arith.cmpf oge, %5, %6 : vector<16x64xf32>
    %cst_6 = arith.constant 0.00999999977 : f32
    %8 = vector.broadcast %cst_6 : f32 to vector<16x64xf32>
    %9 = arith.mulf %8, %5 : vector<16x64xf32>
    %10 = arith.select %7, %5, %9 : vector<16x64xi1>, vector<16x64xf32>
    %11 = arith.truncf %10 : vector<16x64xf32> to vector<16x64xbf16>
    %c0_7 = arith.constant 0 : index
    %c0_8 = arith.constant 0 : index
    %12 = vector.load %arg4[%c0_7, %c0_8] : memref<16x64xbf16, #tpu.memory_space<vmem>>, vector<16x64xbf16>
    tpu.vector_store %arg4[%c0_7, %c0_8], %11 {strides = array<i32>} : memref<16x64xbf16, #tpu.memory_space<vmem>>, vector<16x64xbf16>,
    return
  }
  func.func @transform_0(%arg0: i32) -> (i32, i32) {
    %c0_i32 = arith.constant 0 : i32
    %c0_i32_0 = arith.constant 0 : i32
    return %arg0, %c0_i32 : i32, i32
  }
  func.func @transform_1(%arg0: i32) -> (i32, i32) {
    %c0_i32 = arith.constant 0 : i32
    %c0_i32_0 = arith.constant 0 : i32
    %c0_i32_1 = arith.constant 0 : i32
    return %c0_i32, %c0_i32_0 : i32, i32
  }
  func.func @transform_2(%arg0: i32) -> (i32, i32) {
    %c0_i32 = arith.constant 0 : i32
    %c0_i32_0 = arith.constant 0 : i32
    %c0_i32_1 = arith.constant 0 : i32
    return %c0_i32, %c0_i32_0 : i32, i32
  }
  func.func @transform_3(%arg0: i32) -> (i32, i32) {
    %c0_i32 = arith.constant 0 : i32
    %c0_i32_0 = arith.constant 0 : i32
    return %arg0, %c0_i32 : i32, i32
  }
}

module attributes {stable_mosaic.version = 11 : i64} {
  func.func @_conv_gemm_kernel(%arg0: i32, %arg1: memref<16x1024xbf16, #tpu.memory_space<vmem>>, %arg2: memref<1024x101xbf16, #tpu.memory_space<vmem>>, %arg3: memref<1x101xf32, #tpu.memory_space<vmem>>, %arg4: memref<16x101xf32, #tpu.memory_space<vmem>>) attributes {dimension_semantics = [#tpu.dimension_semantics<parallel>], iteration_bounds = array<i64: 1>, scalar_prefetch = 0 : i64, scratch_operands = 0 : i64, tpu.core_type = #tpu.core_type<tc>, window_params = [{transform_indices = @transform_0, window_bounds = array<i64: 16, 1024>}, {pipeline_mode = #tpu.pipeline_mode<synchronous>, transform_indices = @transform_1, window_bounds = array<i64: 1024, 101>}, {pipeline_mode = #tpu.pipeline_mode<synchronous>, transform_indices = @transform_2, window_bounds = array<i64: 1, 101>}, {transform_indices = @transform_3, window_bounds = array<i64: 16, 101>}]} {
    %c0 = arith.constant 0 : index
    %c0_0 = arith.constant 0 : index
    %0 = vector.load %arg1[%c0, %c0_0] : memref<16x1024xbf16, #tpu.memory_space<vmem>>, vector<16x1024xbf16>
    %c0_1 = arith.constant 0 : index
    %c0_2 = arith.constant 0 : index
    %1 = vector.load %arg2[%c0_1, %c0_2] : memref<1024x101xbf16, #tpu.memory_space<vmem>>, vector<1024x101xbf16>
    %cst = arith.constant dense<0.000000e+00> : vector<16x101xf32>
    %2 = tpu.matmul %0, %1, %cst {dimension_numbers = #tpu.dot_dimension_numbers<[1], [0], [0], [1], [0, 0, 1, 1], [], []>} : vector<16x1024xbf16>, vector<1024x101xbf16>, vector<16x101xf32> -> vector<16x101xf32>
    %c0_3 = arith.constant 0 : index
    %c0_4 = arith.constant 0 : index
    %3 = vector.load %arg3[%c0_3, %c0_4] : memref<1x101xf32, #tpu.memory_space<vmem>>, vector<1x101xf32>
    %4 = vector.broadcast %3 : vector<1x101xf32> to vector<16x101xf32>
    %5 = arith.addf %2, %4 : vector<16x101xf32>
    %cst_5 = arith.constant 0.000000e+00 : f32
    %6 = vector.broadcast %cst_5 : f32 to vector<16x101xf32>
    %7 = arith.subf %6, %5 : vector<16x101xf32>
    %8 = math.exp %7 : vector<16x101xf32>
    %cst_6 = arith.constant 1.000000e+00 : f32
    %9 = vector.broadcast %cst_6 : f32 to vector<16x101xf32>
    %10 = arith.addf %9, %8 : vector<16x101xf32>
    %cst_7 = arith.constant 1.000000e+00 : f32
    %11 = vector.broadcast %cst_7 : f32 to vector<16x101xf32>
    %12 = arith.divf %11, %10 : vector<16x101xf32>
    %c0_8 = arith.constant 0 : index
    %c0_9 = arith.constant 0 : index
    %13 = vector.load %arg4[%c0_8, %c0_9] : memref<16x101xf32, #tpu.memory_space<vmem>>, vector<16x101xf32>
    tpu.vector_store %arg4[%c0_8, %c0_9], %12 {strides = array<i32>} : memref<16x101xf32, #tpu.memory_space<vmem>>, vector<16x101xf32>,
    return
  }
  func.func @transform_0(%arg0: i32) -> (i32, i32) {
    %c0_i32 = arith.constant 0 : i32
    %c0_i32_0 = arith.constant 0 : i32
    return %arg0, %c0_i32 : i32, i32
  }
  func.func @transform_1(%arg0: i32) -> (i32, i32) {
    %c0_i32 = arith.constant 0 : i32
    %c0_i32_0 = arith.constant 0 : i32
    %c0_i32_1 = arith.constant 0 : i32
    return %c0_i32, %c0_i32_0 : i32, i32
  }
  func.func @transform_2(%arg0: i32) -> (i32, i32) {
    %c0_i32 = arith.constant 0 : i32
    %c0_i32_0 = arith.constant 0 : i32
    %c0_i32_1 = arith.constant 0 : i32
    return %c0_i32, %c0_i32_0 : i32, i32
  }
  func.func @transform_3(%arg0: i32) -> (i32, i32) {
    %c0_i32 = arith.constant 0 : i32
    %c0_i32_0 = arith.constant 0 : i32
    return %arg0, %c0_i32 : i32, i32
  }
}

</mosaic_0001>

<bundles_post_ra>
// kernel: cnn_forward.7
= control target key start
LH: loop header
LB: loop body
LE: loop exit
PB: predicated region body
PF: predicated region fallthrough
CT: control target
= control target key end

     0   :  { %s3183_s12 = smov 0   ;;  %s4017_s0 = inlined_call_operand.vmem [shape: bf16[8192,48], index: 0, kind: input, shape index: {}]   ;;  %s4018_s1 = inlined_call_operand.vmem [shape: bf16[48,8], index: 1, kind: input, shape index: {}]   ;;  %s4019_s2 = inlined_call_operand.vmem [shape: f32[1,8], index: 2, kind: input, shape index: {}]   ;;  %s4020_s3 = inlined_call_operand.vmem [shape: bf16[8192,8], index: 3, kind: output, shape index: {}]  }
   0x1 LB: > { %s2473_s13 = sadd.s32 4294967295, %s3161_s12   ;;  %p2477_p0 = scmp.ge.s32.totalorder %s3161_s12, 1  ;;  %s3161_s12 = sphi %s3183_s12, %s13_s12  }
   0x2   : > { %p138_p1 = scmp.lt.s32.totalorder %s3161_s12, 9 }
   0x4   : > { %p139_p2 = pnand %p2477_p0, %p138_p1 }
   0x5   : > { %v3087_v0 = vld [vmem:[%s4018_s1] sm:$0xff] (!%p139_p2)   ;;  %s2478_s16 = sshll.u32 (!%p139_p2), %s2473_s13, 7  ;;  %v3088_v1 = vld [vmem:[%s4018_s1 + $0x8] sm:$0xff] (!%p139_p2)   ;;  %v3089_v2 = vld [vmem:[%s4018_s1 + $0x10] sm:$0xff] (!%p139_p2)   ;;  %vm654_vm0 = vcmask (!%p139_p2), 392192   ;;  %vm2288_vm1 = vcmask (!%p139_p2), 60416  }
   0x6   : > { %142 = sbr.rel (%p139_p2) target bundleno = 398 (0x18e), region = 32  ;;  %p163_p3 = scmp.lt.s32.totalorder (!%p139_p2), %s2478_s16, 1023  ;;  %2939 = vmatprep.subr.bf16.mxu0 (!%p139_p2), %v3087_v0  ;;  %3073 = vmatprep.subr.bf16.mxu1 (!%p139_p2), %v3087_v0 }
   0x7   : > { %2940 = vmatpush3.bf16.msra.mxu0 (!%p139_p2), %v3087_v0  ;;  %3076 = vmatpush3.bf16.msra.mxu1 (!%p139_p2), %v3087_v0 }
   0x8   : > { %2941 = vmatprep.subr.bf16.mxu0 (!%p139_p2), %v3088_v1  ;;  %3074 = vmatprep.subr.bf16.mxu1 (!%p139_p2), %v3088_v1 }
   0xb   : > { %2942 = vmatpush3.bf16.msra.mxu0 (!%p139_p2), %v3088_v1  ;;  %3077 = vmatpush3.bf16.msra.mxu1 (!%p139_p2), %v3088_v1 }
   0xc   : > { %2943 = vmatprep.subr.bf16.mxu0 (!%p139_p2), %v3089_v2  ;;  %3075 = vmatprep.subr.bf16.mxu1 (!%p139_p2), %v3089_v2 }
   0xd   : > { %s4022_s16 = smov (!%p163_p3, %s2478_s16), 1023 }
   0xe   : > { %s2479_s21 = sshll.u32 %s4022_s16, 2 }
   0xf   : > { %s3208_s24 = scalar_lea.vmem %s4017_s0, %s2479_s21  ;;  %2944 = vmatpush3.bf16.msra.mxu0 %v3089_v2  ;;  %3078 = vmatpush3.bf16.msra.mxu1 %v3089_v2  ;;  %s3352_s29 = scalar_lea.vmem %s4020_s3, %s2479_s21 }
  0x10   : > { %v3090_v3 = vld [vmem:[%s3208_s24] sm:$0xff]   ;;  %v3092_v5 = vld [vmem:[%s3208_s24 + $0x8] sm:$0xff]   ;;  %v3094_v7 = vld [vmem:[%s3208_s24 + $0x10] sm:$0xff]  }
  0x11   : > { %v3091_v4 = vld [vmem:[%s3208_s24 + $0x100] sm:$0xff]   ;;  %2945 = vmatprep.mubr.msk.bf16.mxu0 %vm654_vm0, %v3090_v3  ;;  %v3093_v6 = vld [vmem:[%s3208_s24 + $0x108] sm:$0xff]   ;;  %v3095_v8 = vld [vmem:[%s3208_s24 + $0x110] sm:$0xff]  }
  0x12   : > { %3009 = vmatprep.mubr.msk.bf16.mxu1 %vm654_vm0, %v3091_v4  ;;  %2946 = vmatmul.mubr.msk.bf16.vlgmr.msra.gmra.mrb[0].mxu0 %vm654_vm0, %v3092_v5  ;;  %v3096_v9 = vld [vmem:[%s3208_s24 + $0x18] sm:$0xff]   ;;  %v3098_v11 = vld [vmem:[%s3208_s24 + $0x20] sm:$0xff]   ;;  %v3100_v13 = vld [vmem:[%s3208_s24 + $0x28] sm:$0xff]  }
  0x13   : > { %3010 = vmatmul.mubr.msk.bf16.vlgmr.msra.gmra.mrb[0].mxu1 %vm654_vm0, %v3093_v6  ;;  %2949 = vmatprep.mubr.msk.bf16.mxu0 %vm654_vm0, %v3094_v7  ;;  %v3097_v10 = vld [vmem:[%s3208_s24 + $0x118] sm:$0xff]   ;;  %v3099_v12 = vld [vmem:[%s3208_s24 + $0x120] sm:$0xff]   ;;  %v3101_v14 = vld [vmem:[%s3208_s24 + $0x128] sm:$0xff]  }
  0x14   : > { %3013 = vmatprep.mubr.msk.bf16.mxu1 %vm654_vm0, %v3095_v8  ;;  %v3102_v15 = vld [vmem:[%s3208_s24 + $0x30] sm:$0xff]   ;;  %v3104_v17 = vld [vmem:[%s3208_s24 + $0x38] sm:$0xff]   ;;  %v3106_v19 = vld [vmem:[%s3208_s24 + $0x40] sm:$0xff]  }
  0x15   : > { %v3103_v16 = vld [vmem:[%s3208_s24 + $0x130] sm:$0xff]   ;;  %v3105_v18 = vld [vmem:[%s3208_s24 + $0x138] sm:$0xff]   ;;  %v3107_v20 = vld [vmem:[%s3208_s24 + $0x140] sm:$0xff]  }
  0x16   : > { %v3108_v21 = vld [vmem:[%s3208_s24 + $0x48] sm:$0xff]   ;;  %v3110_v23 = vld [vmem:[%s3208_s24 + $0x50] sm:$0xff]   ;;  %v3112_v25 = vld [vmem:[%s3208_s24 + $0x58] sm:$0xff]  }
  0x17   : > { %v3109_v22 = vld [vmem:[%s3208_s24 + $0x148] sm:$0xff]   ;;  %v3111_v24 = vld [vmem:[%s3208_s24 + $0x150] sm:$0xff]   ;;  %v3113_v26 = vld [vmem:[%s3208_s24 + $0x158] sm:$0xff]  }
  0x18   : > { %v3114_v27 = vld [vmem:[%s3208_s24 + $0x60] sm:$0xff]   ;;  %v3116_v29 = vld [vmem:[%s3208_s24 + $0x68] sm:$0xff]   ;;  %v3118_v31 = vld [vmem:[%s3208_s24 + $0x70] sm:$0xff]  }
  0x19   : > { %v3115_v28 = vld [vmem:[%s3208_s24 + $0x160] sm:$0xff]   ;;  %v3117_v30 = vld [vmem:[%s3208_s24 + $0x168] sm:$0xff]   ;;  %v3119_v32 = vld [vmem:[%s3208_s24 + $0x170] sm:$0xff]  }
  0x1a   : > { %2950 = vmatmul.mubr.msk.bf16.gmra.mrb[4].mxu0 %vm654_vm0, %v3096_v9  ;;  %v3120_v33 = vld [vmem:[%s3208_s24 + $0x78] sm:$0xff]   ;;  %v3122_v35 = vld [vmem:[%s3208_s24 + $0x80] sm:$0xff]   ;;  %v3124_v37 = vld [vmem:[%s3208_s24 + $0x88] sm:$0xff]  }
  0x1b   : > { %3014 = vmatmul.mubr.msk.bf16.gmra.mrb[4].mxu1 %vm654_vm0, %v3097_v10  ;;  %2953 = vmatprep.mubr.msk.bf16.mxu0 %vm654_vm0, %v3098_v11  ;;  %v3121_v34 = vld [vmem:[%s3208_s24 + $0x178] sm:$0xff]   ;;  %v3123_v36 = vld [vmem:[%s3208_s24 + $0x180] sm:$0xff]   ;;  %v3125_v38 = vld [vmem:[%s3208_s24 + $0x188] sm:$0xff]  }
  0x1c   : > { %3017 = vmatprep.mubr.msk.bf16.mxu1 %vm654_vm0, %v3099_v12  ;;  %v3126_v39 = vld [vmem:[%s3208_s24 + $0x90] sm:$0xff]   ;;  %v3128_v41 = vld [vmem:[%s3208_s24 + $0x98] sm:$0xff]   ;;  %v3130_v43 = vld [vmem:[%s3208_s24 + $0xa0] sm:$0xff]  }
  0x1d   : > { %v3127_v40 = vld [vmem:[%s3208_s24 + $0x190] sm:$0xff]   ;;  %v3129_v42 = vld [vmem:[%s3208_s24 + $0x198] sm:$0xff]   ;;  %v3131_v44 = vld [vmem:[%s3208_s24 + $0x1a0] sm:$0xff]  }
  0x1e   : > { %v3132_v45 = vld [vmem:[%s3208_s24 + $0xa8] sm:$0xff]   ;;  %v3134_v47 = vld [vmem:[%s3208_s24 + $0xb0] sm:$0xff]   ;;  %v3136_v49 = vld [vmem:[%s3208_s24 + $0xb8] sm:$0xff]  }
  0x1f   : > { %v3133_v46 = vld [vmem:[%s3208_s24 + $0x1a8] sm:$0xff]   ;;  %v3135_v48 = vld [vmem:[%s3208_s24 + $0x1b0] sm:$0xff]   ;;  %v3137_v50 = vld [vmem:[%s3208_s24 + $0x1b8] sm:$0xff]  }
  0x20   : > { %v3138_v51 = vld [vmem:[%s3208_s24 + $0xc0] sm:$0xff]   ;;  %v3140_v53 = vld [vmem:[%s3208_s24 + $0xc8] sm:$0xff]   ;;  %v3142_v55 = vld [vmem:[%s3208_s24 + $0xd0] sm:$0xff]  }
  0x21   : > { %v3139_v52 = vld [vmem:[%s3208_s24 + $0x1c0] sm:$0xff]   ;;  %v3141_v54 = vld [vmem:[%s3208_s24 + $0x1c8] sm:$0xff]   ;;  %v3143_v56 = vld [vmem:[%s3208_s24 + $0x1d0] sm:$0xff]  }
  0x22   : > { %2954 = vmatmul.mubr.msk.bf16.gmra.mrb[8].mxu0 %vm654_vm0, %v3100_v13  ;;  %v3144_v57 = vld [vmem:[%s3208_s24 + $0xd8] sm:$0xff]   ;;  %v3146_v59 = vld [vmem:[%s3208_s24 + $0xe0] sm:$0xff]   ;;  %v3148_v61 = vld [vmem:[%s3208_s24 + $0xe8] sm:$0xff]  }
  0x23   : > { %3018 = vmatmul.mubr.msk.bf16.gmra.mrb[8].mxu1 %vm654_vm0, %v3101_v14  ;;  %2957 = vmatprep.mubr.msk.bf16.mxu0 %vm654_vm0, %v3102_v15  ;;  %v3145_v58 = vld [vmem:[%s3208_s24 + $0x1d8] sm:$0xff]   ;;  %v3147_v60 = vld [vmem:[%s3208_s24 + $0x1e0] sm:$0xff]   ;;  %v3149_v62 = vld [vmem:[%s3208_s24 + $0x1e8] sm:$0xff]  }
  0x24   : > { %3021 = vmatprep.mubr.msk.bf16.mxu1 %vm654_vm0, %v3103_v16  ;;  %v3150_v63 = vld [vmem:[%s3208_s24 + $0xf0] sm:$0xff]   ;;  %v3152_v1 = vld [vmem:[%s3208_s24 + $0xf8] sm:$0xff]   ;;  %v3341_v3 = vld [vmem:[%s4019_s2] ss:$0 sm:$0xff] }
  0x25   : > { %v3151_v0 = vld [vmem:[%s3208_s24 + $0x1f0] sm:$0xff]   ;;  %v3153_v2 = vld [vmem:[%s3208_s24 + $0x1f8] sm:$0xff]  }
  0x2a   : > { %2958 = vmatmul.mubr.msk.bf16.gmra.mrb[12].mxu0 %vm654_vm0, %v3104_v17 }
  0x2b   : > { %3022 = vmatmul.mubr.msk.bf16.gmra.mrb[12].mxu1 %vm654_vm0, %v3105_v18  ;;  %2961 = vmatprep.mubr.msk.bf16.mxu0 %vm654_vm0, %v3106_v19 }
  0x2c   : > { %3025 = vmatprep.mubr.msk.bf16.mxu1 %vm654_vm0, %v3107_v20 }
  0x32   : > { %2962 = vmatmul.mubr.msk.bf16.gmra.mrb[16].mxu0 %vm654_vm0, %v3108_v21 }
  0x33   : > { %3026 = vmatmul.mubr.msk.bf16.gmra.mrb[16].mxu1 %vm654_vm0, %v3109_v22  ;;  %2965 = vmatprep.mubr.msk.bf16.mxu0 %vm654_vm0, %v3110_v23 }
  0x34   : > { %3029 = vmatprep.mubr.msk.bf16.mxu1 %vm654_vm0, %v3111_v24 }
  0x3a   : > { %2966 = vmatmul.mubr.msk.bf16.gmra.mrb[20].mxu0 %vm654_vm0, %v3112_v25 }
  0x3b   : > { %3030 = vmatmul.mubr.msk.bf16.gmra.mrb[20].mxu1 %vm654_vm0, %v3113_v26  ;;  %2969 = vmatprep.mubr.msk.bf16.mxu0 %vm654_vm0, %v3114_v27 }
  0x3c   : > { %3033 = vmatprep.mubr.msk.bf16.mxu1 %vm654_vm0, %v3115_v28 }
  0x42   : > { %2970 = vmatmul.mubr.msk.bf16.gmra.mrb[24].mxu0 %vm654_vm0, %v3116_v29 }
  0x43   : > { %3034 = vmatmul.mubr.msk.bf16.gmra.mrb[24].mxu1 %vm654_vm0, %v3117_v30  ;;  %2973 = vmatprep.mubr.msk.bf16.mxu0 %vm654_vm0, %v3118_v31 }
  0x44   : > { %3037 = vmatprep.mubr.msk.bf16.mxu1 %vm654_vm0, %v3119_v32 }
  0x4a   : > { %2974 = vmatmul.mubr.msk.bf16.gmra.mrb[28].mxu0 %vm654_vm0, %v3120_v33 }
  0x4b   : > { %3038 = vmatmul.mubr.msk.bf16.gmra.mrb[28].mxu1 %vm654_vm0, %v3121_v34  ;;  %2977 = vmatprep.mubr.msk.bf16.mxu0 %vm654_vm0, %v3122_v35 }
  0x4c   : > { %3041 = vmatprep.mubr.msk.bf16.mxu1 %vm654_vm0, %v3123_v36 }
  0x52   : > { %2978 = vmatmul.mubr.msk.bf16.gmra.mrb[32].mxu0 %vm654_vm0, %v3124_v37 }
  0x53   : > { %3042 = vmatmul.mubr.msk.bf16.gmra.mrb[32].mxu1 %vm654_vm0, %v3125_v38  ;;  %2981 = vmatprep.mubr.msk.bf16.mxu0 %vm654_vm0, %v3126_v39 }
  0x54   : > { %3045 = vmatprep.mubr.msk.bf16.mxu1 %vm654_vm0, %v3127_v40 }
  0x5a   : > { %2982 = vmatmul.mubr.msk.bf16.gmra.mrb[36].mxu0 %vm654_vm0, %v3128_v41 }
  0x5b   : > { %3046 = vmatmul.mubr.msk.bf16.gmra.mrb[36].mxu1 %vm654_vm0, %v3129_v42  ;;  %2985 = vmatprep.mubr.msk.bf16.mxu0 %vm654_vm0, %v3130_v43 }
  0x5c   : > { %3049 = vmatprep.mubr.msk.bf16.mxu1 %vm654_vm0, %v3131_v44 }
  0x62   : > { %2986 = vmatmul.mubr.msk.bf16.gmra.mrb[40].mxu0 %vm654_vm0, %v3132_v45 }
  0x63   : > { %3050 = vmatmul.mubr.msk.bf16.gmra.mrb[40].mxu1 %vm654_vm0, %v3133_v46  ;;  %2989 = vmatprep.mubr.msk.bf16.mxu0 %vm654_vm0, %v3134_v47 }
  0x64   : > { %3053 = vmatprep.mubr.msk.bf16.mxu1 %vm654_vm0, %v3135_v48 }
  0x6a   : > { %2990 = vmatmul.mubr.msk.bf16.gmra.mrb[44].mxu0 %vm654_vm0, %v3136_v49 }
  0x6b   : > { %3054 = vmatmul.mubr.msk.bf16.gmra.mrb[44].mxu1 %vm654_vm0, %v3137_v50  ;;  %2993 = vmatprep.mubr.msk.bf16.mxu0 %vm654_vm0, %v3138_v51 }
  0x6c   : > { %3057 = vmatprep.mubr.msk.bf16.mxu1 %vm654_vm0, %v3139_v52 }
  0x72   : > { %2994 = vmatmul.mubr.msk.bf16.gmra.mrb[48].mxu0 %vm654_vm0, %v3140_v53 }
  0x73   : > { %3058 = vmatmul.mubr.msk.bf16.gmra.mrb[48].mxu1 %vm654_vm0, %v3141_v54  ;;  %2997 = vmatprep.mubr.msk.bf16.mxu0 %vm654_vm0, %v3142_v55 }
  0x74   : > { %3061 = vmatprep.mubr.msk.bf16.mxu1 %vm654_vm0, %v3143_v56 }
  0x7a   : > { %2998 = vmatmul.mubr.msk.bf16.gmra.mrb[52].mxu0 %vm654_vm0, %v3144_v57 }
  0x7b   : > { %3062 = vmatmul.mubr.msk.bf16.gmra.mrb[52].mxu1 %vm654_vm0, %v3145_v58  ;;  %3001 = vmatprep.mubr.msk.bf16.mxu0 %vm654_vm0, %v3146_v59 }
  0x7c   : > { %3065 = vmatprep.mubr.msk.bf16.mxu1 %vm654_vm0, %v3147_v60 }
  0x82   : > { %3002 = vmatmul.mubr.msk.bf16.gmra.mrb[56].mxu0 %vm654_vm0, %v3148_v61 }
  0x83   : > { %3066 = vmatmul.mubr.msk.bf16.gmra.mrb[56].mxu1 %vm654_vm0, %v3149_v62  ;;  %3005 = vmatprep.mubr.msk.bf16.mxu0 %vm654_vm0, %v3150_v63 }
  0x84   : > { %3069 = vmatprep.mubr.msk.bf16.mxu1 %vm654_vm0, %v3151_v0 }
  0x8a   : > { %3006 = vmatmul.mubr.msk.bf16.gmra.mrb[60].mxu0 %vm654_vm0, %v3152_v1 }
  0x8b   : > { %3070 = vmatmul.mubr.msk.bf16.gmra.mrb[60].mxu1 %vm654_vm0, %v3153_v2 }
  0xe5   : > { %v2947_v4 = vpop.f32.mrb[0].mxu0 }
  0xe6   : > { %v3011_v5 = vpop.f32.mrb[0].mxu1  ;;  %v890_v6 = vadd.f32 %v2947_v4, %v3341_v3  ;;  %v881_v8 = vpop.f32.mrb[1].mxu0 }
  0xe7   : > { %v1146_v7 = vadd.f32 %v3011_v5, %v3341_v3  ;;  %v1137_v9 = vpop.f32.mrb[1].mxu1  ;;  %v882_v10 = vadd.f32 %v3341_v3, %v881_v8  ;;  %v2948_v12 = vpop.f32.mrb[2].mxu0 }
  0xe8   : > { %v1138_v11 = vadd.f32 %v3341_v3, %v1137_v9  ;;  %v3012_v13 = vpop.f32.mrb[2].mxu1  ;;  %vm1394_vm2 = vcmp.ge.f32.partialorder %v890_v6, 0.0  ;;  %v1522_v14 = vmul.f32 0.01, %v890_v6  ;;  %v893_v20 = vadd.f32 %v2948_v12, %v3341_v3  ;;  %v884_v22 = vpop.f32.mrb[3].mxu0 }
  0xe9   : > { %vm1458_vm3 = vcmp.ge.f32.partialorder %v1146_v7, 0.0  ;;  %v1586_v15 = vmul.f32 0.01, %v1146_v7  ;;  %vm1392_vm4 = vcmp.ge.f32.partialorder %v882_v10, 0.0  ;;  %v1520_v16 = vmul.f32 0.01, %v882_v10 }
  0xea   : > { %vm1456_vm5 = vcmp.ge.f32.partialorder %v1138_v11, 0.0  ;;  %v1584_v17 = vmul.f32 0.01, %v1138_v11  ;;  %v1650_v18 = vsel %vm1394_vm2, %v890_v6, %v1522_v14  ;;  %v1149_v21 = vadd.f32 %v3012_v13, %v3341_v3  ;;  %v1140_v23 = vpop.f32.mrb[3].mxu1 }
  0xeb   : > { %v1714_v19 = vsel %vm1458_vm3, %v1146_v7, %v1586_v15  ;;  %v2746_v24 = vpack.c.bf16 %v1650_v18, %v1650_v18  ;;  %v1648_v26 = vsel %vm1392_vm4, %v882_v10, %v1520_v16  ;;  %vm1395_vm6 = vcmp.ge.f32.partialorder %v893_v20, 0.0 }
  0xec   : > { %v2810_v25 = vpack.c.bf16 %v1714_v19, %v1714_v19  ;;  %v1712_v27 = vsel %vm1456_vm5, %v1138_v11, %v1584_v17  ;;  %v2744_v28 = vpack.c.bf16 %v1648_v26, %v1648_v26  ;;  %v1523_v30 = vmul.f32 0.01, %v893_v20 }
  0xed   : > { %v2808_v29 = vpack.c.bf16 %v1712_v27, %v1712_v27  ;;  %2291 = vst.msk [vmem:[%s3352_s29 + $0x8] sm:$0xf] %vm2288_vm1, %v2746_v24  ;;  %vm1459_vm7 = vcmp.ge.f32.partialorder %v1149_v21, 0.0  ;;  %v1587_v31 = vmul.f32 0.01, %v1149_v21  ;;  %v885_v32 = vadd.f32 %v3341_v3, %v884_v22  ;;  %v2951_v34 = vpop.f32.mrb[4].mxu0 }
  0xee   : > { %2355 = vst.msk [vmem:[%s3352_s29 + $0x108] sm:$0xf] %vm2288_vm1, %v2810_v25  ;;  %v1141_v33 = vadd.f32 %v3341_v3, %v1140_v23  ;;  %v3015_v35 = vpop.f32.mrb[4].mxu1  ;;  %2289 = vst.msk [vmem:[%s3352_s29] sm:$0xf] %vm2288_vm1, %v2744_v28  ;;  %v1651_v36 = vsel %vm1395_vm6, %v893_v20, %v1523_v30  ;;  %v906_v37 = vadd.f32 %v2951_v34, %v3341_v3  ;;  %v897_v39 = vpop.f32.mrb[5].mxu0 }
  0xef   : > { %2353 = vst.msk [vmem:[%s3352_s29 + $0x100] sm:$0xf] %vm2288_vm1, %v2808_v29  ;;  %v1162_v38 = vadd.f32 %v3015_v35, %v3341_v3  ;;  %v1153_v40 = vpop.f32.mrb[5].mxu1  ;;  %v2747_v41 = vpack.c.bf16 %v1651_v36, %v1651_v36  ;;  %v1715_v42 = vsel %vm1459_vm7, %v1149_v21, %v1587_v31  ;;  %vm1393_vm8 = vcmp.ge.f32.partialorder %v885_v32, 0.0  ;;  %v2952_v44 = vpop.f32.mrb[6].mxu0 }
  0xf0   : > { %v1521_v43 = vmul.f32 0.01, %v885_v32  ;;  %v3016_v45 = vpop.f32.mrb[6].mxu1  ;;  %v2811_v46 = vpack.c.bf16 %v1715_v42, %v1715_v42  ;;  %vm1457_vm9 = vcmp.ge.f32.partialorder %v1141_v33, 0.0  ;;  %v1585_v47 = vmul.f32 0.01, %v1141_v33 }
  0xf1   : > { %vm1398_vm10 = vcmp.ge.f32.partialorder %v906_v37, 0.0  ;;  %v900_v48 = vpop.f32.mrb[7].mxu0  ;;  %v1156_v49 = vpop.f32.mrb[7].mxu1  ;;  %2292 = vst.msk [vmem:[%s3352_s29 + $0xc] sm:$0xf] %vm2288_vm1, %v2747_v41  ;;  %vm1462_vm11 = vcmp.ge.f32.partialorder %v1162_v38, 0.0  ;;  %v898_v55 = vadd.f32 %v3341_v3, %v897_v39  ;;  %v1154_v56 = vadd.f32 %v3341_v3, %v1153_v40 }
  0xf2   : > { %v1649_v50 = vsel %vm1393_vm8, %v885_v32, %v1521_v43  ;;  %v1526_v51 = vmul.f32 0.01, %v906_v37  ;;  %v1590_v52 = vmul.f32 0.01, %v1162_v38  ;;  %2356 = vst.msk [vmem:[%s3352_s29 + $0x10c] sm:$0xf] %vm2288_vm1, %v2811_v46  ;;  %v1713_v54 = vsel %vm1457_vm9, %v1141_v33, %v1585_v47 }
  0xf3   : > { %v2745_v53 = vpack.c.bf16 %v1649_v50, %v1649_v50  ;;  %v2809_v57 = vpack.c.bf16 %v1713_v54, %v1713_v54  ;;  %v909_v60 = vadd.f32 %v2952_v44, %v3341_v3  ;;  %vm1396_vm12 = vcmp.ge.f32.partialorder %v898_v55, 0.0 }
  0xf4   : > { %v1654_v58 = vsel %vm1398_vm10, %v906_v37, %v1526_v51  ;;  %v1718_v59 = vsel %vm1462_vm11, %v1162_v38, %v1590_v52  ;;  %v1524_v63 = vmul.f32 0.01, %v898_v55  ;;  %vm1460_vm13 = vcmp.ge.f32.partialorder %v1154_v56, 0.0 }
  0xf5   : > { %2290 = vst.msk [vmem:[%s3352_s29 + $0x4] sm:$0xf] %vm2288_vm1, %v2745_v53  ;;  %v2750_v61 = vpack.c.bf16 %v1654_v58, %v1654_v58  ;;  %v2814_v62 = vpack.c.bf16 %v1718_v59, %v1718_v59  ;;  %2354 = vst.msk [vmem:[%s3352_s29 + $0x104] sm:$0xf] %vm2288_vm1, %v2809_v57  ;;  %v1588_v0 = vmul.f32 0.01, %v1154_v56  ;;  %v1165_v4 = vadd.f32 %v3016_v45, %v3341_v3 }
  0xf6   : > { %vm1399_vm14 = vcmp.ge.f32.partialorder %v909_v60, 0.0  ;;  %v1527_v1 = vmul.f32 0.01, %v909_v60  ;;  %v1652_v2 = vsel %vm1396_vm12, %v898_v55, %v1524_v63  ;;  %v901_v5 = vadd.f32 %v3341_v3, %v900_v48  ;;  %v2955_v7 = vpop.f32.mrb[8].mxu0  ;;  %v3019_v8 = vpop.f32.mrb[8].mxu1 }
  0xf7   : > { %2295 = vst.msk [vmem:[%s3352_s29 + $0x18] sm:$0xf] %vm2288_vm1, %v2750_v61  ;;  %2359 = vst.msk [vmem:[%s3352_s29 + $0x118] sm:$0xf] %vm2288_vm1, %v2814_v62  ;;  %v1157_v6 = vadd.f32 %v3341_v3, %v1156_v49  ;;  %v2748_v9 = vpack.c.bf16 %v1652_v2, %v1652_v2  ;;  %v1716_v10 = vsel %vm1460_vm13, %v1154_v56, %v1588_v0  ;;  %v913_v13 = vpop.f32.mrb[9].mxu0  ;;  %v1169_v14 = vpop.f32.mrb[9].mxu1 }
  0xf8   : > { %v1655_v11 = vsel %vm1399_vm14, %v909_v60, %v1527_v1  ;;  %v922_v12 = vadd.f32 %v2955_v7, %v3341_v3  ;;  %v2812_v15 = vpack.c.bf16 %v1716_v10, %v1716_v10  ;;  %vm1463_vm15 = vcmp.ge.f32.partialorder %v1165_v4, 0.0  ;;  %v2956_v18 = vpop.f32.mrb[10].mxu0  ;;  %v3020_v19 = vpop.f32.mrb[10].mxu1 }
  0xf9   : > { %v2751_v16 = vpack.c.bf16 %v1655_v11, %v1655_v11  ;;  %v1591_v17 = vmul.f32 0.01, %v1165_v4  ;;  %2293 = vst.msk [vmem:[%s3352_s29 + $0x10] sm:$0xf] %vm2288_vm1, %v2748_v9  ;;  %vm1397_vm0 = vcmp.ge.f32.partialorder %v901_v5, 0.0  ;;  %vm1461_vm2 = vcmp.ge.f32.partialorder %v1157_v6, 0.0 }
  0xfa   : > { %v1525_v20 = vmul.f32 0.01, %v901_v5  ;;  %v1589_v21 = vmul.f32 0.01, %v1157_v6  ;;  %2357 = vst.msk [vmem:[%s3352_s29 + $0x110] sm:$0xf] %vm2288_vm1, %v2812_v15  ;;  %v1178_v24 = vadd.f32 %v3019_v8, %v3341_v3  ;;  %v914_v30 = vadd.f32 %v3341_v3, %v913_v13 }
  0xfb   : > { %2296 = vst.msk [vmem:[%s3352_s29 + $0x1c] sm:$0xf] %vm2288_vm1, %v2751_v16  ;;  %v1719_v22 = vsel %vm1463_vm15, %v1165_v4, %v1591_v17  ;;  %vm1402_vm3 = vcmp.ge.f32.partialorder %v922_v12, 0.0  ;;  %v1530_v23 = vmul.f32 0.01, %v922_v12  ;;  %v916_v25 = vpop.f32.mrb[11].mxu0  ;;  %v1170_v38 = vadd.f32 %v3341_v3, %v1169_v14 }
  0xfc   : > { %v1172_v26 = vpop.f32.mrb[11].mxu1  ;;  %v2815_v27 = vpack.c.bf16 %v1719_v22, %v1719_v22  ;;  %v1653_v28 = vsel %vm1397_vm0, %v901_v5, %v1525_v20  ;;  %v1717_v29 = vsel %vm1461_vm2, %v1157_v6, %v1589_v21  ;;  %vm1466_vm4 = vcmp.ge.f32.partialorder %v1178_v24, 0.0 }
  0xfd   : > { %v2749_v31 = vpack.c.bf16 %v1653_v28, %v1653_v28  ;;  %v2813_v32 = vpack.c.bf16 %v1717_v29, %v1717_v29  ;;  %v1658_v33 = vsel %vm1402_vm3, %v922_v12, %v1530_v23  ;;  %v1594_v35 = vmul.f32 0.01, %v1178_v24  ;;  %v2959_v37 = vpop.f32.mrb[12].mxu0 }
  0xfe   : > { %2360 = vst.msk [vmem:[%s3352_s29 + $0x11c] sm:$0xf] %vm2288_vm1, %v2815_v27  ;;  %v2754_v34 = vpack.c.bf16 %v1658_v33, %v1658_v33  ;;  %vm1400_vm5 = vcmp.ge.f32.partialorder %v914_v30, 0.0  ;;  %v1528_v36 = vmul.f32 0.01, %v914_v30  ;;  %v925_v39 = vadd.f32 %v2956_v18, %v3341_v3  ;;  %v3023_v42 = vpop.f32.mrb[12].mxu1 }
  0xff   : > { %2294 = vst.msk [vmem:[%s3352_s29 + $0x14] sm:$0xf] %vm2288_vm1, %v2749_v31  ;;  %2358 = vst.msk [vmem:[%s3352_s29 + $0x114] sm:$0xf] %vm2288_vm1, %v2813_v32  ;;  %v1181_v40 = vadd.f32 %v3020_v19, %v3341_v3  ;;  %v917_v41 = vadd.f32 %v3341_v3, %v916_v25  ;;  %v929_v43 = vpop.f32.mrb[13].mxu0  ;;  %v1722_v44 = vsel %vm1466_vm4, %v1178_v24, %v1594_v35  ;;  %v1185_v48 = vpop.f32.mrb[13].mxu1 }
 0x100   : > { %2299 = vst.msk [vmem:[%s3352_s29 + $0x28] sm:$0xf] %vm2288_vm1, %v2754_v34  ;;  %v1656_v45 = vsel %vm1400_vm5, %v914_v30, %v1528_v36  ;;  %v1173_v46 = vadd.f32 %v3341_v3, %v1172_v26  ;;  %v938_v47 = vadd.f32 %v2959_v37, %v3341_v3  ;;  %v2960_v49 = vpop.f32.mrb[14].mxu0  ;;  %v2818_v50 = vpack.c.bf16 %v1722_v44, %v1722_v44  ;;  %v3024_v53 = vpop.f32.mrb[14].mxu1 }
 0x101   : > { %v2752_v51 = vpack.c.bf16 %v1656_v45, %v1656_v45  ;;  %vm1464_vm6 = vcmp.ge.f32.partialorder %v1170_v38, 0.0  ;;  %v1592_v52 = vmul.f32 0.01, %v1170_v38  ;;  %v932_v54 = vpop.f32.mrb[15].mxu0  ;;  %vm1403_vm7 = vcmp.ge.f32.partialorder %v925_v39, 0.0  ;;  %v1188_v59 = vpop.f32.mrb[15].mxu1 }
 0x102   : > { %v1531_v55 = vmul.f32 0.01, %v925_v39  ;;  %vm1467_vm8 = vcmp.ge.f32.partialorder %v1181_v40, 0.0  ;;  %v1595_v56 = vmul.f32 0.01, %v1181_v40  ;;  %vm1401_vm9 = vcmp.ge.f32.partialorder %v917_v41, 0.0 }
 0x103   : > { %2363 = vst.msk [vmem:[%s3352_s29 + $0x128] sm:$0xf] %vm2288_vm1, %v2818_v50  ;;  %2297 = vst.msk [vmem:[%s3352_s29 + $0x20] sm:$0xf] %vm2288_vm1, %v2752_v51  ;;  %v1720_v57 = vsel %vm1464_vm6, %v1170_v38, %v1592_v52  ;;  %v1529_v58 = vmul.f32 0.01, %v917_v41  ;;  %v1194_v7 = vadd.f32 %v3023_v42, %v3341_v3  ;;  %v930_v11 = vadd.f32 %v3341_v3, %v929_v43 }
 0x104   : > { %vm1465_vm10 = vcmp.ge.f32.partialorder %v1173_v46, 0.0  ;;  %v2816_v60 = vpack.c.bf16 %v1720_v57, %v1720_v57  ;;  %v1659_v61 = vsel %vm1403_vm7, %v925_v39, %v1531_v55  ;;  %v1723_v62 = vsel %vm1467_vm8, %v1181_v40, %v1595_v56 }
 0x105   : > { %v1593_v63 = vmul.f32 0.01, %v1173_v46  ;;  %v2755_v0 = vpack.c.bf16 %v1659_v61, %v1659_v61  ;;  %v2819_v1 = vpack.c.bf16 %v1723_v62, %v1723_v62  ;;  %v1657_v2 = vsel %vm1401_vm9, %v917_v41, %v1529_v58  ;;  %v2963_v8 = vpop.f32.mrb[16].mxu0 }
 0x106   : > { %vm1406_vm11 = vcmp.ge.f32.partialorder %v938_v47, 0.0  ;;  %2361 = vst.msk [vmem:[%s3352_s29 + $0x120] sm:$0xf] %vm2288_vm1, %v2816_v60  ;;  %v2753_v4 = vpack.c.bf16 %v1657_v2, %v1657_v2  ;;  %v1534_v6 = vmul.f32 0.01, %v938_v47  ;;  %v3027_v9 = vpop.f32.mrb[16].mxu1  ;;  %v1186_v12 = vadd.f32 %v3341_v3, %v1185_v48 }
 0x107   : > { %v1721_v5 = vsel %vm1465_vm10, %v1173_v46, %v1593_v63  ;;  %2300 = vst.msk [vmem:[%s3352_s29 + $0x2c] sm:$0xf] %vm2288_vm1, %v2755_v0  ;;  %2364 = vst.msk [vmem:[%s3352_s29 + $0x12c] sm:$0xf] %vm2288_vm1, %v2819_v1  ;;  %v941_v13 = vadd.f32 %v2960_v49, %v3341_v3  ;;  %v945_v14 = vpop.f32.mrb[17].mxu0  ;;  %v1201_v15 = vpop.f32.mrb[17].mxu1  ;;  %v1197_v18 = vadd.f32 %v3024_v53, %v3341_v3 }
 0x108   : > { %v2817_v10 = vpack.c.bf16 %v1721_v5, %v1721_v5  ;;  %2298 = vst.msk [vmem:[%s3352_s29 + $0x24] sm:$0xf] %vm2288_vm1, %v2753_v4  ;;  %v1662_v16 = vsel %vm1406_vm11, %v938_v47, %v1534_v6  ;;  %vm1470_vm12 = vcmp.ge.f32.partialorder %v1194_v7, 0.0  ;;  %v1598_v17 = vmul.f32 0.01, %v1194_v7  ;;  %v3428_v19 = vpop.f32.mrb[18].mxu0 }
 0x109   : > { %v3430_v20 = vpop.f32.mrb[18].mxu1  ;;  %v2758_v21 = vpack.c.bf16 %v1662_v16, %v1662_v16  ;;  %vm1404_vm13 = vcmp.ge.f32.partialorder %v930_v11, 0.0  ;;  %v1532_v22 = vmul.f32 0.01, %v930_v11  ;;  %vm1468_vm14 = vcmp.ge.f32.partialorder %v1186_v12, 0.0  ;;  %v3434_v23 = vpop.f32.mrb[19].mxu0 }
 0x10a   : > { %2362 = vst.msk [vmem:[%s3352_s29 + $0x124] sm:$0xf] %vm2288_vm1, %v2817_v10  ;;  %v3436_v24 = vpop.f32.mrb[19].mxu1  ;;  %v1726_v25 = vsel %vm1470_vm12, %v1194_v7, %v1598_v17  ;;  %v1596_v26 = vmul.f32 0.01, %v1186_v12  ;;  %vm1407_vm15 = vcmp.ge.f32.partialorder %v941_v13, 0.0  ;;  %v933_v34 = vadd.f32 %v3341_v3, %v932_v54 }
 0x10b   : > { %v1535_v27 = vmul.f32 0.01, %v941_v13  ;;  %2303 = vst.msk [vmem:[%s3352_s29 + $0x38] sm:$0xf] %vm2288_vm1, %v2758_v21  ;;  %v2822_v28 = vpack.c.bf16 %v1726_v25, %v1726_v25  ;;  %v1660_v29 = vsel %vm1404_vm13, %v930_v11, %v1532_v22  ;;  %vm1471_vm0 = vcmp.ge.f32.partialorder %v1197_v18, 0.0 }
 0x10c   : > { %v1599_v30 = vmul.f32 0.01, %v1197_v18  ;;  %v2756_v31 = vpack.c.bf16 %v1660_v29, %v1660_v29  ;;  %v1724_v32 = vsel %vm1468_vm14, %v1186_v12, %v1596_v26  ;;  %v1189_v38 = vadd.f32 %v3341_v3, %v1188_v59 }
 0x10d   : > { %v1663_v33 = vsel %vm1407_vm15, %v941_v13, %v1535_v27  ;;  %2367 = vst.msk [vmem:[%s3352_s29 + $0x138] sm:$0xf] %vm2288_vm1, %v2822_v28  ;;  %v2820_v35 = vpack.c.bf16 %v1724_v32, %v1724_v32  ;;  %vm1405_vm2 = vcmp.ge.f32.partialorder %v933_v34, 0.0  ;;  %v1533_v40 = vmul.f32 0.01, %v933_v34  ;;  %v2967_v42 = vpop.f32.mrb[20].mxu0 }
 0x10e   : > { %v2759_v36 = vpack.c.bf16 %v1663_v33, %v1663_v33  ;;  %v1727_v37 = vsel %vm1471_vm0, %v1197_v18, %v1599_v30  ;;  %2301 = vst.msk [vmem:[%s3352_s29 + $0x30] sm:$0xf] %vm2288_vm1, %v2756_v31  ;;  %v954_v41 = vadd.f32 %v2963_v8, %v3341_v3  ;;  %v3031_v43 = vpop.f32.mrb[20].mxu1  ;;  %vm1469_vm3 = vcmp.ge.f32.partialorder %v1189_v38, 0.0  ;;  %v961_v47 = vpop.f32.mrb[21].mxu0 }
 0x10f   : > { %v2823_v39 = vpack.c.bf16 %v1727_v37, %v1727_v37  ;;  %2365 = vst.msk [vmem:[%s3352_s29 + $0x130] sm:$0xf] %vm2288_vm1, %v2820_v35  ;;  %v1597_v44 = vmul.f32 0.01, %v1189_v38  ;;  %v1210_v45 = vadd.f32 %v3027_v9, %v3341_v3  ;;  %v946_v46 = vadd.f32 %v3341_v3, %v945_v14  ;;  %v3453_v48 = vpop.f32.mrb[21].mxu1  ;;  %v3458_v52 = vpop.f32.mrb[22].mxu0 }
 0x110   : > { %2304 = vst.msk [vmem:[%s3352_s29 + $0x3c] sm:$0xf] %vm2288_vm1, %v2759_v36  ;;  %v1661_v49 = vsel %vm1405_vm2, %v933_v34, %v1533_v40  ;;  %vm1410_vm4 = vcmp.ge.f32.partialorder %v954_v41, 0.0  ;;  %v1538_v50 = vmul.f32 0.01, %v954_v41  ;;  %v1202_v51 = vadd.f32 %v3341_v3, %v1201_v15  ;;  %v3460_v53 = vpop.f32.mrb[22].mxu1 }
 0x111   : > { %2368 = vst.msk [vmem:[%s3352_s29 + $0x13c] sm:$0xf] %vm2288_vm1, %v2823_v39  ;;  %v2757_v54 = vpack.c.bf16 %v1661_v49, %v1661_v49  ;;  %v1725_v55 = vsel %vm1469_vm3, %v1189_v38, %v1597_v44  ;;  %vm1474_vm5 = vcmp.ge.f32.partialorder %v1210_v45, 0.0  ;;  %v1602_v56 = vmul.f32 0.01, %v1210_v45  ;;  %v3462_v57 = vpop.f32.mrb[23].mxu0 }
 0x112   : > { %v3464_v58 = vpop.f32.mrb[23].mxu1  ;;  %v2821_v59 = vpack.c.bf16 %v1725_v55, %v1725_v55  ;;  %v1666_v60 = vsel %vm1410_vm4, %v954_v41, %v1538_v50  ;;  %vm1408_vm6 = vcmp.ge.f32.partialorder %v946_v46, 0.0  ;;  %v1536_v61 = vmul.f32 0.01, %v946_v46 }
 0x113   : > { %2302 = vst.msk [vmem:[%s3352_s29 + $0x34] sm:$0xf] %vm2288_vm1, %v2757_v54  ;;  %v2762_v62 = vpack.c.bf16 %v1666_v60, %v1666_v60  ;;  %v1730_v63 = vsel %vm1474_vm5, %v1210_v45, %v1602_v56  ;;  %vm1472_vm7 = vcmp.ge.f32.partialorder %v1202_v51, 0.0  ;;  %v1600_v0 = vmul.f32 0.01, %v1202_v51 }
 0x114   : > { %2366 = vst.msk [vmem:[%s3352_s29 + $0x134] sm:$0xf] %vm2288_vm1, %v2821_v59  ;;  %v2826_v1 = vpack.c.bf16 %v1730_v63, %v1730_v63  ;;  %v1664_v2 = vsel %vm1408_vm6, %v946_v46, %v1536_v61  ;;  %v957_v4 = vadd.f32 %v3428_v19, %v3341_v3  ;;  %v1213_v5 = vadd.f32 %v3430_v20, %v3341_v3 }
 0x115   : > { %2307 = vst.msk [vmem:[%s3352_s29 + $0x48] sm:$0xf] %vm2288_vm1, %v2762_v62  ;;  %v2760_v6 = vpack.c.bf16 %v1664_v2, %v1664_v2  ;;  %v1728_v7 = vsel %vm1472_vm7, %v1202_v51, %v1600_v0  ;;  %v949_v8 = vadd.f32 %v3341_v3, %v3434_v23  ;;  %v1205_v9 = vadd.f32 %v3341_v3, %v3436_v24  ;;  %v3482_v12 = vpop.f32.mrb[24].mxu0 }
 0x116   : > { %2371 = vst.msk [vmem:[%s3352_s29 + $0x148] sm:$0xf] %vm2288_vm1, %v2826_v1  ;;  %v2824_v10 = vpack.c.bf16 %v1728_v7, %v1728_v7  ;;  %vm1411_vm8 = vcmp.ge.f32.partialorder %v957_v4, 0.0  ;;  %v1539_v11 = vmul.f32 0.01, %v957_v4  ;;  %vm1475_vm9 = vcmp.ge.f32.partialorder %v1213_v5, 0.0 }
 0x117   : > { %v3484_v13 = vpop.f32.mrb[24].mxu1  ;;  %2305 = vst.msk [vmem:[%s3352_s29 + $0x40] sm:$0xf] %vm2288_vm1, %v2760_v6  ;;  %v1603_v14 = vmul.f32 0.01, %v1213_v5  ;;  %vm1409_vm10 = vcmp.ge.f32.partialorder %v949_v8, 0.0  ;;  %v970_v18 = vadd.f32 %v2967_v42, %v3341_v3  ;;  %v1226_v19 = vadd.f32 %v3031_v43, %v3341_v3 }
 0x118   : > { %v1537_v15 = vmul.f32 0.01, %v949_v8  ;;  %vm1473_vm11 = vcmp.ge.f32.partialorder %v1205_v9, 0.0  ;;  %2369 = vst.msk [vmem:[%s3352_s29 + $0x140] sm:$0xf] %vm2288_vm1, %v2824_v10  ;;  %v1667_v16 = vsel %vm1411_vm8, %v957_v4, %v1539_v11  ;;  %v3492_v20 = vpop.f32.mrb[25].mxu0  ;;  %v962_v25 = vadd.f32 %v3341_v3, %v961_v47 }
 0x119   : > { %v1601_v17 = vmul.f32 0.01, %v1205_v9  ;;  %v3494_v21 = vpop.f32.mrb[25].mxu1  ;;  %v2763_v22 = vpack.c.bf16 %v1667_v16, %v1667_v16  ;;  %v1731_v23 = vsel %vm1475_vm9, %v1213_v5, %v1603_v14  ;;  %v3498_v26 = vpop.f32.mrb[26].mxu0  ;;  %vm1414_vm12 = vcmp.ge.f32.partialorder %v970_v18, 0.0 }
 0x11a   : > { %v1665_v24 = vsel %vm1409_vm10, %v949_v8, %v1537_v15  ;;  %v3500_v27 = vpop.f32.mrb[26].mxu1  ;;  %v2827_v28 = vpack.c.bf16 %v1731_v23, %v1731_v23  ;;  %v3503_v31 = vpop.f32.mrb[27].mxu0  ;;  %v1542_v34 = vmul.f32 0.01, %v970_v18  ;;  %vm1478_vm13 = vcmp.ge.f32.partialorder %v1226_v19, 0.0 }
 0x11b   : > { %v2761_v29 = vpack.c.bf16 %v1665_v24, %v1665_v24  ;;  %v1729_v30 = vsel %vm1473_vm11, %v1205_v9, %v1601_v17  ;;  %v3505_v32 = vpop.f32.mrb[27].mxu1  ;;  %2308 = vst.msk [vmem:[%s3352_s29 + $0x4c] sm:$0xf] %vm2288_vm1, %v2763_v22  ;;  %v1606_v35 = vmul.f32 0.01, %v1226_v19  ;;  %vm1412_vm14 = vcmp.ge.f32.partialorder %v962_v25, 0.0 }
 0x11c   : > { %v2825_v33 = vpack.c.bf16 %v1729_v30, %v1729_v30  ;;  %2372 = vst.msk [vmem:[%s3352_s29 + $0x14c] sm:$0xf] %vm2288_vm1, %v2827_v28  ;;  %v1540_v36 = vmul.f32 0.01, %v962_v25  ;;  %v1218_v37 = vadd.f32 %v3341_v3, %v3453_v48  ;;  %v973_v38 = vadd.f32 %v3458_v52, %v3341_v3 }
 0x11d   : > { %2306 = vst.msk [vmem:[%s3352_s29 + $0x44] sm:$0xf] %vm2288_vm1, %v2761_v29  ;;  %v1670_v39 = vsel %vm1414_vm12, %v970_v18, %v1542_v34  ;;  %v1734_v40 = vsel %vm1478_vm13, %v1226_v19, %v1606_v35  ;;  %v1229_v41 = vadd.f32 %v3460_v53, %v3341_v3  ;;  %v965_v42 = vadd.f32 %v3341_v3, %v3462_v57  ;;  %v3523_v46 = vpop.f32.mrb[28].mxu0 }
 0x11e   : > { %2370 = vst.msk [vmem:[%s3352_s29 + $0x144] sm:$0xf] %vm2288_vm1, %v2825_v33  ;;  %v2766_v43 = vpack.c.bf16 %v1670_v39, %v1670_v39  ;;  %v2830_v44 = vpack.c.bf16 %v1734_v40, %v1734_v40  ;;  %v1668_v45 = vsel %vm1412_vm14, %v962_v25, %v1540_v36  ;;  %vm1476_vm15 = vcmp.ge.f32.partialorder %v1218_v37, 0.0  ;;  %v3525_v47 = vpop.f32.mrb[28].mxu1  ;;  %v3527_v51 = vpop.f32.mrb[29].mxu0 }
 0x11f   : > { %v2764_v48 = vpack.c.bf16 %v1668_v45, %v1668_v45  ;;  %v1604_v49 = vmul.f32 0.01, %v1218_v37  ;;  %vm1415_vm0 = vcmp.ge.f32.partialorder %v973_v38, 0.0  ;;  %v1543_v50 = vmul.f32 0.01, %v973_v38  ;;  %v3539_v59 = vpop.f32.mrb[29].mxu1 }
 0x120   : > { %2311 = vst.msk [vmem:[%s3352_s29 + $0x58] sm:$0xf] %vm2288_vm1, %v2766_v43  ;;  %2375 = vst.msk [vmem:[%s3352_s29 + $0x158] sm:$0xf] %vm2288_vm1, %v2830_v44  ;;  %vm1479_vm2 = vcmp.ge.f32.partialorder %v1229_v41, 0.0  ;;  %vm1413_vm3 = vcmp.ge.f32.partialorder %v965_v42, 0.0  ;;  %v1221_v56 = vadd.f32 %v3341_v3, %v3464_v58  ;;  %v986_v57 = vadd.f32 %v3482_v12, %v3341_v3 }
 0x121   : > { %v1607_v52 = vmul.f32 0.01, %v1229_v41  ;;  %v1541_v53 = vmul.f32 0.01, %v965_v42  ;;  %2309 = vst.msk [vmem:[%s3352_s29 + $0x50] sm:$0xf] %vm2288_vm1, %v2764_v48  ;;  %v1732_v54 = vsel %vm1476_vm15, %v1218_v37, %v1604_v49  ;;  %v1671_v55 = vsel %vm1415_vm0, %v973_v38, %v1543_v50 }
 0x122   : > { %v3541_v60 = vpop.f32.mrb[30].mxu0  ;;  %v2828_v61 = vpack.c.bf16 %v1732_v54, %v1732_v54  ;;  %v2767_v62 = vpack.c.bf16 %v1671_v55, %v1671_v55  ;;  %v3543_v1 = vpop.f32.mrb[30].mxu1  ;;  %vm1477_vm4 = vcmp.ge.f32.partialorder %v1221_v56, 0.0  ;;  %v1605_v5 = vmul.f32 0.01, %v1221_v56 }
 0x123   : > { %v1735_v63 = vsel %vm1479_vm2, %v1229_v41, %v1607_v52  ;;  %v1669_v0 = vsel %vm1413_vm3, %v965_v42, %v1541_v53  ;;  %v3545_v2 = vpop.f32.mrb[31].mxu0  ;;  %v3547_v6 = vpop.f32.mrb[31].mxu1  ;;  %vm1418_vm5 = vcmp.ge.f32.partialorder %v986_v57, 0.0  ;;  %v1546_v7 = vmul.f32 0.01, %v986_v57 }
 0x124   : > { %v2831_v4 = vpack.c.bf16 %v1735_v63, %v1735_v63  ;;  %v2765_v58 = vpack.c.bf16 %v1669_v0, %v1669_v0  ;;  %2373 = vst.msk [vmem:[%s3352_s29 + $0x150] sm:$0xf] %vm2288_vm1, %v2828_v61  ;;  %2312 = vst.msk [vmem:[%s3352_s29 + $0x5c] sm:$0xf] %vm2288_vm1, %v2767_v62  ;;  %v1242_v8 = vadd.f32 %v3484_v13, %v3341_v3 }
 0x125   : > { %v978_v9 = vadd.f32 %v3341_v3, %v3492_v20  ;;  %v1733_v10 = vsel %vm1477_vm4, %v1221_v56, %v1605_v5  ;;  %v1234_v11 = vadd.f32 %v3341_v3, %v3494_v21  ;;  %v989_v12 = vadd.f32 %v3498_v26, %v3341_v3  ;;  %v3567_v17 = vpop.f32.mrb[32].mxu0 }
 0x126   : > { %2376 = vst.msk [vmem:[%s3352_s29 + $0x15c] sm:$0xf] %vm2288_vm1, %v2831_v4  ;;  %2310 = vst.msk [vmem:[%s3352_s29 + $0x54] sm:$0xf] %vm2288_vm1, %v2765_v58  ;;  %v1245_v14 = vadd.f32 %v3500_v27, %v3341_v3  ;;  %v2829_v15 = vpack.c.bf16 %v1733_v10, %v1733_v10  ;;  %v1674_v13 = vsel %vm1418_vm5, %v986_v57, %v1546_v7  ;;  %vm1482_vm6 = vcmp.ge.f32.partialorder %v1242_v8, 0.0  ;;  %v3569_v18 = vpop.f32.mrb[32].mxu1 }
 0x127   : > { %v1610_v16 = vmul.f32 0.01, %v1242_v8  ;;  %v2770_v19 = vpack.c.bf16 %v1674_v13, %v1674_v13  ;;  %vm1416_vm7 = vcmp.ge.f32.partialorder %v978_v9, 0.0  ;;  %v1544_v20 = vmul.f32 0.01, %v978_v9  ;;  %v3571_v21 = vpop.f32.mrb[33].mxu0 }
 0x128   : > { %vm1480_vm8 = vcmp.ge.f32.partialorder %v1234_v11, 0.0  ;;  %v3573_v22 = vpop.f32.mrb[33].mxu1  ;;  %2374 = vst.msk [vmem:[%s3352_s29 + $0x154] sm:$0xf] %vm2288_vm1, %v2829_v15  ;;  %v1608_v24 = vmul.f32 0.01, %v1234_v11  ;;  %v981_v37 = vadd.f32 %v3341_v3, %v3503_v31  ;;  %v1237_v42 = vadd.f32 %v3341_v3, %v3505_v32 }
 0x129   : > { %v1738_v23 = vsel %vm1482_vm6, %v1242_v8, %v1610_v16  ;;  %vm1419_vm9 = vcmp.ge.f32.partialorder %v989_v12, 0.0  ;;  %v1547_v25 = vmul.f32 0.01, %v989_v12  ;;  %v3577_v26 = vpop.f32.mrb[34].mxu0  ;;  %2315 = vst.msk [vmem:[%s3352_s29 + $0x68] sm:$0xf] %vm2288_vm1, %v2770_v19  ;;  %v1672_v28 = vsel %vm1416_vm7, %v978_v9, %v1544_v20 }
 0x12a   : > { %v2834_v27 = vpack.c.bf16 %v1738_v23, %v1738_v23  ;;  %vm1483_vm10 = vcmp.ge.f32.partialorder %v1245_v14, 0.0  ;;  %v1611_v29 = vmul.f32 0.01, %v1245_v14  ;;  %v3581_v30 = vpop.f32.mrb[34].mxu1  ;;  %v3583_v33 = vpop.f32.mrb[35].mxu0  ;;  %v2768_v34 = vpack.c.bf16 %v1672_v28, %v1672_v28 }
 0x12b   : > { %v1736_v35 = vsel %vm1480_vm8, %v1234_v11, %v1608_v24  ;;  %v1675_v36 = vsel %vm1419_vm9, %v989_v12, %v1547_v25  ;;  %v3588_v38 = vpop.f32.mrb[35].mxu1  ;;  %vm1417_vm11 = vcmp.ge.f32.partialorder %v981_v37, 0.0  ;;  %v1545_v44 = vmul.f32 0.01, %v981_v37 }
 0x12c   : > { %2379 = vst.msk [vmem:[%s3352_s29 + $0x168] sm:$0xf] %vm2288_vm1, %v2834_v27  ;;  %v2832_v39 = vpack.c.bf16 %v1736_v35, %v1736_v35  ;;  %v2771_v40 = vpack.c.bf16 %v1675_v36, %v1675_v36  ;;  %v1739_v41 = vsel %vm1483_vm10, %v1245_v14, %v1611_v29  ;;  %2313 = vst.msk [vmem:[%s3352_s29 + $0x60] sm:$0xf] %vm2288_vm1, %v2768_v34  ;;  %vm1481_vm12 = vcmp.ge.f32.partialorder %v1237_v42, 0.0 }
 0x12d   : > { %v2835_v43 = vpack.c.bf16 %v1739_v41, %v1739_v41  ;;  %v1002_v45 = vadd.f32 %v3523_v46, %v3341_v3  ;;  %v1609_v31 = vmul.f32 0.01, %v1237_v42  ;;  %v1258_v48 = vadd.f32 %v3525_v47, %v3341_v3  ;;  %v3610_v52 = vpop.f32.mrb[36].mxu0 }
 0x12e   : > { %2377 = vst.msk [vmem:[%s3352_s29 + $0x160] sm:$0xf] %vm2288_vm1, %v2832_v39  ;;  %2316 = vst.msk [vmem:[%s3352_s29 + $0x6c] sm:$0xf] %vm2288_vm1, %v2771_v40  ;;  %v994_v32 = vadd.f32 %v3341_v3, %v3527_v51  ;;  %v1673_v49 = vsel %vm1417_vm11, %v981_v37, %v1545_v44  ;;  %v1250_v46 = vadd.f32 %v3341_v3, %v3539_v59  ;;  %v3612_v53 = vpop.f32.mrb[36].mxu1  ;;  %v3614_v56 = vpop.f32.mrb[37].mxu0 }
 0x12f   : > { %2380 = vst.msk [vmem:[%s3352_s29 + $0x16c] sm:$0xf] %vm2288_vm1, %v2835_v43  ;;  %vm1422_vm13 = vcmp.ge.f32.partialorder %v1002_v45, 0.0  ;;  %v1550_v50 = vmul.f32 0.01, %v1002_v45  ;;  %v2769_v54 = vpack.c.bf16 %v1673_v49, %v1673_v49  ;;  %v1737_v55 = vsel %vm1481_vm12, %v1237_v42, %v1609_v31  ;;  %v3616_v51 = vpop.f32.mrb[37].mxu1 }
 0x130   : > { %vm1486_vm14 = vcmp.ge.f32.partialorder %v1258_v48, 0.0  ;;  %v1614_v47 = vmul.f32 0.01, %v1258_v48  ;;  %v2833_v57 = vpack.c.bf16 %v1737_v55, %v1737_v55  ;;  %vm1420_vm15 = vcmp.ge.f32.partialorder %v994_v32, 0.0  ;;  %v3618_v63 = vpop.f32.mrb[38].mxu0  ;;  %v3620_v59 = vpop.f32.mrb[38].mxu1 }
 0x131   : > { %v1678_v61 = vsel %vm1422_vm13, %v1002_v45, %v1550_v50  ;;  %v1548_v62 = vmul.f32 0.01, %v994_v32  ;;  %2314 = vst.msk [vmem:[%s3352_s29 + $0x64] sm:$0xf] %vm2288_vm1, %v2769_v54  ;;  %vm1484_vm0 = vcmp.ge.f32.partialorder %v1250_v46, 0.0  ;;  %v3624_v5 = vpop.f32.mrb[39].mxu0  ;;  %v1005_v10 = vadd.f32 %v3541_v60, %v3341_v3 }
 0x132   : > { %v2774_v0 = vpack.c.bf16 %v1678_v61, %v1678_v61  ;;  %v1742_v4 = vsel %vm1486_vm14, %v1258_v48, %v1614_v47  ;;  %v1612_v58 = vmul.f32 0.01, %v1250_v46  ;;  %v3626_v7 = vpop.f32.mrb[39].mxu1  ;;  %2378 = vst.msk [vmem:[%s3352_s29 + $0x164] sm:$0xf] %vm2288_vm1, %v2833_v57  ;;  %v1261_v11 = vadd.f32 %v3543_v1, %v3341_v3 }
 0x133   : > { %v2838_v8 = vpack.c.bf16 %v1742_v4, %v1742_v4  ;;  %v1676_v9 = vsel %vm1420_vm15, %v994_v32, %v1548_v62  ;;  %v997_v15 = vadd.f32 %v3341_v3, %v3545_v2  ;;  %v1253_v13 = vadd.f32 %v3341_v3, %v3547_v6 }
 0x134   : > { %2319 = vst.msk [vmem:[%s3352_s29 + $0x78] sm:$0xf] %vm2288_vm1, %v2774_v0  ;;  %v2772_v12 = vpack.c.bf16 %v1676_v9, %v1676_v9  ;;  %v1740_v14 = vsel %vm1484_vm0, %v1250_v46, %v1612_v58  ;;  %vm1423_vm2 = vcmp.ge.f32.partialorder %v1005_v10, 0.0  ;;  %v1551_v19 = vmul.f32 0.01, %v1005_v10 }
 0x135   : > { %2383 = vst.msk [vmem:[%s3352_s29 + $0x178] sm:$0xf] %vm2288_vm1, %v2838_v8  ;;  %v2836_v16 = vpack.c.bf16 %v1740_v14, %v1740_v14  ;;  %vm1487_vm3 = vcmp.ge.f32.partialorder %v1261_v11, 0.0  ;;  %v1615_v60 = vmul.f32 0.01, %v1261_v11  ;;  %vm1421_vm4 = vcmp.ge.f32.partialorder %v997_v15, 0.0 }
 0x136   : > { %2317 = vst.msk [vmem:[%s3352_s29 + $0x70] sm:$0xf] %vm2288_vm1, %v2772_v12  ;;  %v1549_v1 = vmul.f32 0.01, %v997_v15  ;;  %vm1485_vm5 = vcmp.ge.f32.partialorder %v1253_v13, 0.0  ;;  %v1679_v20 = vsel %vm1423_vm2, %v1005_v10, %v1551_v19  ;;  %v1018_v2 = vadd.f32 %v3567_v17, %v3341_v3  ;;  %v3650_v24 = vpop.f32.mrb[40].mxu0 }
 0x137   : > { %2381 = vst.msk [vmem:[%s3352_s29 + $0x170] sm:$0xf] %vm2288_vm1, %v2836_v16  ;;  %v1613_v23 = vmul.f32 0.01, %v1253_v13  ;;  %v1274_v6 = vadd.f32 %v3569_v18, %v3341_v3  ;;  %v3652_v25 = vpop.f32.mrb[40].mxu1  ;;  %v2775_v27 = vpack.c.bf16 %v1679_v20, %v1679_v20  ;;  %v1743_v28 = vsel %vm1487_vm3, %v1261_v11, %v1615_v60  ;;  %v3656_v35 = vpop.f32.mrb[41].mxu0 }
 0x138   : > { %v1677_v29 = vsel %vm1421_vm4, %v997_v15, %v1549_v1  ;;  %v1010_v34 = vadd.f32 %v3341_v3, %v3571_v21  ;;  %v3658_v36 = vpop.f32.mrb[41].mxu1  ;;  %v2839_v17 = vpack.c.bf16 %v1743_v28, %v1743_v28  ;;  %vm1426_vm6 = vcmp.ge.f32.partialorder %v1018_v2, 0.0  ;;  %v3661_v39 = vpop.f32.mrb[42].mxu0  ;;  %v3715_v60 = vld [vmem:[%s4019_s2] ss:$0 sm:$0xff] }
 0x139   : > { %v2773_v37 = vpack.c.bf16 %v1677_v29, %v1677_v29  ;;  %v1741_v18 = vsel %vm1485_vm5, %v1253_v13, %v1613_v23  ;;  %v3663_v40 = vpop.f32.mrb[42].mxu1  ;;  %2320 = vst.msk [vmem:[%s3352_s29 + $0x7c] sm:$0xf] %vm2288_vm1, %v2775_v27  ;;  %v1554_v42 = vmul.f32 0.01, %v1018_v2  ;;  %vm1490_vm7 = vcmp.ge.f32.partialorder %v1274_v6, 0.0 }
 0x13a   : > { %v2837_v41 = vpack.c.bf16 %v1741_v18, %v1741_v18  ;;  %v1618_v21 = vmul.f32 0.01, %v1274_v6  ;;  %v3667_v43 = vpop.f32.mrb[43].mxu0  ;;  %2384 = vst.msk [vmem:[%s3352_s29 + $0x17c] sm:$0xf] %vm2288_vm1, %v2839_v17  ;;  %vm1424_vm8 = vcmp.ge.f32.partialorder %v1010_v34, 0.0  ;;  %v1266_v45 = vadd.f32 %v3341_v3, %v3573_v22 }
 0x13b   : > { %2318 = vst.msk [vmem:[%s3352_s29 + $0x74] sm:$0xf] %vm2288_vm1, %v2773_v37  ;;  %v1552_v44 = vmul.f32 0.01, %v1010_v34  ;;  %v1021_v31 = vadd.f32 %v3577_v26, %v3341_v3  ;;  %v3677_v48 = vpop.f32.mrb[43].mxu1  ;;  %v1682_v32 = vsel %vm1426_vm6, %v1018_v2, %v1554_v42  ;;  %v1277_v50 = vadd.f32 %v3581_v30, %v3341_v3 }
 0x13c   : > { %2382 = vst.msk [vmem:[%s3352_s29 + $0x174] sm:$0xf] %vm2288_vm1, %v2837_v41  ;;  %v1746_v49 = vsel %vm1490_vm7, %v1274_v6, %v1618_v21  ;;  %v1013_v46 = vadd.f32 %v3341_v3, %v3583_v33  ;;  %v2778_v22 = vpack.c.bf16 %v1682_v32, %v1682_v32  ;;  %vm1488_vm9 = vcmp.ge.f32.partialorder %v1266_v45, 0.0 }
 0x13d   : > { %v2842_v54 = vpack.c.bf16 %v1746_v49, %v1746_v49  ;;  %v1680_v55 = vsel %vm1424_vm8, %v1010_v34, %v1552_v44  ;;  %v1616_v47 = vmul.f32 0.01, %v1266_v45  ;;  %vm1427_vm10 = vcmp.ge.f32.partialorder %v1021_v31, 0.0  ;;  %v3696_v58 = vpop.f32.mrb[44].mxu0 }
 0x13e   : > { %v2776_v26 = vpack.c.bf16 %v1680_v55, %v1680_v55  ;;  %v1555_v57 = vmul.f32 0.01, %v1021_v31  ;;  %2323 = vst.msk [vmem:[%s3352_s29 + $0x88] sm:$0xf] %vm2288_vm1, %v2778_v22  ;;  %vm1491_vm11 = vcmp.ge.f32.partialorder %v1277_v50, 0.0  ;;  %vm1425_vm12 = vcmp.ge.f32.partialorder %v1013_v46, 0.0 }
 0x13f   : > { %2387 = vst.msk [vmem:[%s3352_s29 + $0x188] sm:$0xf] %vm2288_vm1, %v2842_v54  ;;  %v1619_v61 = vmul.f32 0.01, %v1277_v50  ;;  %v1553_v30 = vmul.f32 0.01, %v1013_v46  ;;  %v1744_v62 = vsel %vm1488_vm9, %v1266_v45, %v1616_v47  ;;  %v1269_v0 = vadd.f32 %v3341_v3, %v3588_v38 }
 0x140   : > { %2321 = vst.msk [vmem:[%s3352_s29 + $0x80] sm:$0xf] %vm2288_vm1, %v2776_v26  ;;  %v1683_v33 = vsel %vm1427_vm10, %v1021_v31, %v1555_v57  ;;  %v1034_v4 = vadd.f32 %v3610_v52, %v3341_v3  ;;  %v3698_v8 = vpop.f32.mrb[44].mxu1  ;;  %v2840_v9 = vpack.c.bf16 %v1744_v62, %v1744_v62  ;;  %v3700_v14 = vpop.f32.mrb[45].mxu0  ;;  %v1290_v1 = vadd.f32 %v3715_v60, %v3612_v53 }
 0x141   : > { %v2779_v10 = vpack.c.bf16 %v1683_v33, %v1683_v33  ;;  %v1747_v11 = vsel %vm1491_vm11, %v1277_v50, %v1619_v61  ;;  %v1681_v12 = vsel %vm1425_vm12, %v1013_v46, %v1553_v30  ;;  %v3702_v15 = vpop.f32.mrb[45].mxu1  ;;  %vm1489_vm13 = vcmp.ge.f32.partialorder %v1269_v0, 0.0  ;;  %v3704_v3 = vpop.f32.mrb[46].mxu0 }
 0x142   : > { %v2843_v13 = vpack.c.bf16 %v1747_v11, %v1747_v11  ;;  %v2777_v38 = vpack.c.bf16 %v1681_v12, %v1681_v12  ;;  %v1617_v16 = vmul.f32 0.01, %v1269_v0  ;;  %v3706_v52 = vpop.f32.mrb[46].mxu1  ;;  %2385 = vst.msk [vmem:[%s3352_s29 + $0x180] sm:$0xf] %vm2288_vm1, %v2840_v9  ;;  %vm1430_vm14 = vcmp.ge.f32.partialorder %v1034_v4, 0.0 }
 0x143   : > { %2324 = vst.msk [vmem:[%s3352_s29 + $0x8c] sm:$0xf] %vm2288_vm1, %v2779_v10  ;;  %v1558_v19 = vmul.f32 0.01, %v1034_v4  ;;  %v1026_v20 = vadd.f32 %v3715_v60, %v3614_v56  ;;  %v3721_v23 = vpop.f32.mrb[47].mxu0  ;;  %v3723_v2 = vpop.f32.mrb[47].mxu1  ;;  %v1282_v27 = vadd.f32 %v3715_v60, %v3616_v51  ;;  %v1037_v28 = vadd.f32 %v3715_v60, %v3618_v63 }
 0x144   : > { %2388 = vst.msk [vmem:[%s3352_s29 + $0x18c] sm:$0xf] %vm2288_vm1, %v2843_v13  ;;  %2322 = vst.msk [vmem:[%s3352_s29 + $0x84] sm:$0xf] %vm2288_vm1, %v2777_v38  ;;  %v1745_v6 = vsel %vm1489_vm13, %v1269_v0, %v1617_v16  ;;  %v1293_v53 = vadd.f32 %v3715_v60, %v3620_v59  ;;  %vm1494_vm15 = vcmp.ge.f32.partialorder %v1290_v1, 0.0  ;;  %v1029_v50 = vadd.f32 %v3715_v60, %v3624_v5 }
 0x145   : > { %v2841_v56 = vpack.c.bf16 %v1745_v6, %v1745_v6  ;;  %v1686_v29 = vsel %vm1430_vm14, %v1034_v4, %v1558_v19  ;;  %v1622_v34 = vmul.f32 0.01, %v1290_v1  ;;  %vm1428_vm0 = vcmp.ge.f32.partialorder %v1026_v20, 0.0  ;;  %v3737_v63 = vpop.f32.mrb[48].mxu0 }
 0x146   : > { %v2782_v17 = vpack.c.bf16 %v1686_v29, %v1686_v29  ;;  %v1556_v37 = vmul.f32 0.01, %v1026_v20  ;;  %vm1492_vm2 = vcmp.ge.f32.partialorder %v1282_v27, 0.0  ;;  %v1620_v41 = vmul.f32 0.01, %v1282_v27  ;;  %v3741_v44 = vpop.f32.mrb[48].mxu1 }
 0x147   : > { %2386 = vst.msk [vmem:[%s3352_s29 + $0x184] sm:$0xf] %vm2288_vm1, %v2841_v56  ;;  %v1750_v18 = vsel %vm1494_vm15, %v1290_v1, %v1622_v34  ;;  %vm1431_vm3 = vcmp.ge.f32.partialorder %v1037_v28, 0.0  ;;  %v1559_v51 = vmul.f32 0.01, %v1037_v28  ;;  %vm1495_vm4 = vcmp.ge.f32.partialorder %v1293_v53, 0.0 }
 0x148   : > { %2327 = vst.msk [vmem:[%s3352_s29 + $0x98] sm:$0xf] %vm2288_vm1, %v2782_v17  ;;  %v2846_v59 = vpack.c.bf16 %v1750_v18, %v1750_v18  ;;  %v1684_v42 = vsel %vm1428_vm0, %v1026_v20, %v1556_v37  ;;  %v1623_v21 = vmul.f32 0.01, %v1293_v53  ;;  %v3743_v45 = vpop.f32.mrb[49].mxu0  ;;  %v1748_v32 = vsel %vm1492_vm2, %v1282_v27, %v1620_v41  ;;  %v3747_v46 = vpop.f32.mrb[49].mxu1 }
 0x149   : > { %v2780_v31 = vpack.c.bf16 %v1684_v42, %v1684_v42  ;;  %v1687_v49 = vsel %vm1431_vm3, %v1037_v28, %v1559_v51  ;;  %v3749_v22 = vpop.f32.mrb[50].mxu0  ;;  %v2844_v54 = vpack.c.bf16 %v1748_v32, %v1748_v32  ;;  %v1285_v47 = vadd.f32 %v3715_v60, %v3626_v7  ;;  %v3755_v57 = vpop.f32.mrb[50].mxu1 }
 0x14a   : > { %2391 = vst.msk [vmem:[%s3352_s29 + $0x198] sm:$0xf] %vm2288_vm1, %v2846_v59  ;;  %v2783_v55 = vpack.c.bf16 %v1687_v49, %v1687_v49  ;;  %v1751_v26 = vsel %vm1495_vm4, %v1293_v53, %v1623_v21  ;;  %v3757_v61 = vpop.f32.mrb[51].mxu0  ;;  %vm1429_vm5 = vcmp.ge.f32.partialorder %v1029_v50, 0.0  ;;  %v1557_v30 = vmul.f32 0.01, %v1029_v50 }
 0x14b   : > { %2325 = vst.msk [vmem:[%s3352_s29 + $0x90] sm:$0xf] %vm2288_vm1, %v2780_v31  ;;  %v2847_v5 = vpack.c.bf16 %v1751_v26, %v1751_v26  ;;  %v1050_v62 = vadd.f32 %v3715_v60, %v3650_v24  ;;  %v3763_v33 = vpop.f32.mrb[51].mxu1  ;;  %2389 = vst.msk [vmem:[%s3352_s29 + $0x190] sm:$0xf] %vm2288_vm1, %v2844_v54  ;;  %vm1493_vm6 = vcmp.ge.f32.partialorder %v1285_v47, 0.0  ;;  %v1306_v0 = vadd.f32 %v3715_v60, %v3652_v25 }
 0x14c   : > { %2328 = vst.msk [vmem:[%s3352_s29 + $0x9c] sm:$0xf] %vm2288_vm1, %v2783_v55  ;;  %v1621_v7 = vmul.f32 0.01, %v1285_v47  ;;  %v1042_v4 = vadd.f32 %v3715_v60, %v3656_v35  ;;  %v1685_v9 = vsel %vm1429_vm5, %v1029_v50, %v1557_v30  ;;  %v1298_v10 = vadd.f32 %v3715_v60, %v3658_v36 }
 0x14d   : > { %2392 = vst.msk [vmem:[%s3352_s29 + $0x19c] sm:$0xf] %vm2288_vm1, %v2847_v5  ;;  %vm1434_vm7 = vcmp.ge.f32.partialorder %v1050_v62, 0.0  ;;  %v1562_v24 = vmul.f32 0.01, %v1050_v62  ;;  %v2781_v11 = vpack.c.bf16 %v1685_v9, %v1685_v9  ;;  %vm1498_vm8 = vcmp.ge.f32.partialorder %v1306_v0, 0.0 }
 0x14e   : > { %v1749_v12 = vsel %vm1493_vm6, %v1285_v47, %v1621_v7  ;;  %v1626_v13 = vmul.f32 0.01, %v1306_v0  ;;  %vm1432_vm9 = vcmp.ge.f32.partialorder %v1042_v4, 0.0  ;;  %v1560_v25 = vmul.f32 0.01, %v1042_v4  ;;  %v3777_v19 = vpop.f32.mrb[52].mxu0 }
 0x14f   : > { %v2845_v38 = vpack.c.bf16 %v1749_v12, %v1749_v12  ;;  %v1690_v16 = vsel %vm1434_vm7, %v1050_v62, %v1562_v24  ;;  %v3779_v35 = vpop.f32.mrb[52].mxu1  ;;  %2326 = vst.msk [vmem:[%s3352_s29 + $0x94] sm:$0xf] %vm2288_vm1, %v2781_v11  ;;  %vm1496_vm10 = vcmp.ge.f32.partialorder %v1298_v10, 0.0  ;;  %v1624_v36 = vmul.f32 0.01, %v1298_v10 }
 0x150   : > { %v2786_v1 = vpack.c.bf16 %v1690_v16, %v1690_v16  ;;  %v1754_v20 = vsel %vm1498_vm8, %v1306_v0, %v1626_v13  ;;  %v3783_v6 = vpop.f32.mrb[53].mxu0  ;;  %v3785_v27 = vpop.f32.mrb[53].mxu1  ;;  %v1688_v53 = vsel %vm1432_vm9, %v1042_v4, %v1560_v25  ;;  %v1053_v56 = vadd.f32 %v3715_v60, %v3661_v39 }
 0x151   : > { %2390 = vst.msk [vmem:[%s3352_s29 + $0x194] sm:$0xf] %vm2288_vm1, %v2845_v38  ;;  %v2850_v28 = vpack.c.bf16 %v1754_v20, %v1754_v20  ;;  %v1309_v29 = vadd.f32 %v3715_v60, %v3663_v40  ;;  %v3793_v34 = vpop.f32.mrb[54].mxu0  ;;  %v3795_v17 = vpop.f32.mrb[54].mxu1  ;;  %v2784_v37 = vpack.c.bf16 %v1688_v53, %v1688_v53  ;;  %v1752_v18 = vsel %vm1496_vm10, %v1298_v10, %v1624_v36 }
 0x152   : > { %2331 = vst.msk [vmem:[%s3352_s29 + $0xa8] sm:$0xf] %vm2288_vm1, %v2786_v1  ;;  %v1045_v41 = vadd.f32 %v3715_v60, %v3667_v43  ;;  %v1301_v51 = vadd.f32 %v3715_v60, %v3677_v48  ;;  %v3803_v39 = vpop.f32.mrb[55].mxu0  ;;  %v3805_v59 = vpop.f32.mrb[55].mxu1  ;;  %v2848_v40 = vpack.c.bf16 %v1752_v18, %v1752_v18  ;;  %vm1435_vm11 = vcmp.ge.f32.partialorder %v1053_v56, 0.0 }
 0x153   : > { %2395 = vst.msk [vmem:[%s3352_s29 + $0x1a8] sm:$0xf] %vm2288_vm1, %v2850_v28  ;;  %v1563_v42 = vmul.f32 0.01, %v1053_v56  ;;  %vm1499_vm12 = vcmp.ge.f32.partialorder %v1309_v29, 0.0  ;;  %v1066_v32 = vadd.f32 %v3715_v60, %v3696_v58  ;;  %v1322_v49 = vadd.f32 %v3715_v60, %v3698_v8 }
 0x154   : > { %2329 = vst.msk [vmem:[%s3352_s29 + $0xa0] sm:$0xf] %vm2288_vm1, %v2784_v37  ;;  %v1627_v21 = vmul.f32 0.01, %v1309_v29  ;;  %vm1433_vm13 = vcmp.ge.f32.partialorder %v1045_v41, 0.0  ;;  %vm1497_vm14 = vcmp.ge.f32.partialorder %v1301_v51, 0.0  ;;  %v1058_v26 = vadd.f32 %v3715_v60, %v3700_v14 }
 0x155   : > { %v1561_v31 = vmul.f32 0.01, %v1045_v41  ;;  %2393 = vst.msk [vmem:[%s3352_s29 + $0x1a0] sm:$0xf] %vm2288_vm1, %v2848_v40  ;;  %v1691_v43 = vsel %vm1435_vm11, %v1053_v56, %v1563_v42  ;;  %v1625_v48 = vmul.f32 0.01, %v1301_v51  ;;  %v1314_v9 = vadd.f32 %v3715_v60, %v3702_v15 }
 0x156   : > { %v2787_v50 = vpack.c.bf16 %v1691_v43, %v1691_v43  ;;  %v1755_v54 = vsel %vm1499_vm12, %v1309_v29, %v1627_v21  ;;  %vm1438_vm15 = vcmp.ge.f32.partialorder %v1066_v32, 0.0  ;;  %v3819_v62 = vpop.f32.mrb[56].mxu0  ;;  %v3821_v7 = vpop.f32.mrb[56].mxu1  ;;  %v1566_v8 = vmul.f32 0.01, %v1066_v32 }
 0x157   : > { %v1689_v55 = vsel %vm1433_vm13, %v1045_v41, %v1561_v31  ;;  %v2851_v47 = vpack.c.bf16 %v1755_v54, %v1755_v54  ;;  %v1753_v30 = vsel %vm1497_vm14, %v1301_v51, %v1625_v48  ;;  %vm1502_vm0 = vcmp.ge.f32.partialorder %v1322_v49, 0.0  ;;  %v3825_v4 = vpop.f32.mrb[57].mxu0  ;;  %v3835_v10 = vpop.f32.mrb[57].mxu1 }
 0x158   : > { %v2785_v5 = vpack.c.bf16 %v1689_v55, %v1689_v55  ;;  %2332 = vst.msk [vmem:[%s3352_s29 + $0xac] sm:$0xf] %vm2288_vm1, %v2787_v50  ;;  %v2849_v58 = vpack.c.bf16 %v1753_v30, %v1753_v30  ;;  %v1630_v0 = vmul.f32 0.01, %v1322_v49  ;;  %vm1436_vm2 = vcmp.ge.f32.partialorder %v1058_v26, 0.0  ;;  %v3837_v11 = vpop.f32.mrb[58].mxu0 }
 0x159   : > { %2396 = vst.msk [vmem:[%s3352_s29 + $0x1ac] sm:$0xf] %vm2288_vm1, %v2851_v47  ;;  %v1564_v14 = vmul.f32 0.01, %v1058_v26  ;;  %v1069_v24 = vadd.f32 %v3715_v60, %v3704_v3  ;;  %v1694_v12 = vsel %vm1438_vm15, %v1066_v32, %v1566_v8  ;;  %v1325_v38 = vadd.f32 %v3715_v60, %v3706_v52  ;;  %v3846_v16 = vpop.f32.mrb[58].mxu1  ;;  %v3848_v3 = vpop.f32.mrb[59].mxu0 }
 0x15a   : > { %2330 = vst.msk [vmem:[%s3352_s29 + $0xa4] sm:$0xf] %vm2288_vm1, %v2785_v5  ;;  %2394 = vst.msk [vmem:[%s3352_s29 + $0x1a4] sm:$0xf] %vm2288_vm1, %v2849_v58  ;;  %v1758_v13 = vsel %vm1502_vm0, %v1322_v49, %v1630_v0  ;;  %v1061_v15 = vadd.f32 %v3715_v60, %v3721_v23  ;;  %v2790_v25 = vpack.c.bf16 %v1694_v12, %v1694_v12  ;;  %vm1500_vm3 = vcmp.ge.f32.partialorder %v1314_v9, 0.0  ;;  %v3850_v36 = vpop.f32.mrb[59].mxu1 }
 0x15b   : > { %v2854_v1 = vpack.c.bf16 %v1758_v13, %v1758_v13  ;;  %v1692_v20 = vsel %vm1436_vm2, %v1058_v26, %v1564_v14  ;;  %v1628_v53 = vmul.f32 0.01, %v1314_v9  ;;  %vm1439_vm4 = vcmp.ge.f32.partialorder %v1069_v24, 0.0 }
 0x15c   : > { %v2788_v28 = vpack.c.bf16 %v1692_v20, %v1692_v20  ;;  %v1567_v56 = vmul.f32 0.01, %v1069_v24  ;;  %2335 = vst.msk [vmem:[%s3352_s29 + $0xb8] sm:$0xf] %vm2288_vm1, %v2790_v25  ;;  %vm1503_vm5 = vcmp.ge.f32.partialorder %v1325_v38, 0.0  ;;  %vm1437_vm6 = vcmp.ge.f32.partialorder %v1061_v15, 0.0 }
 0x15d   : > { %2399 = vst.msk [vmem:[%s3352_s29 + $0x1b8] sm:$0xf] %vm2288_vm1, %v2854_v1  ;;  %v1631_v52 = vmul.f32 0.01, %v1325_v38  ;;  %v1565_v23 = vmul.f32 0.01, %v1061_v15  ;;  %v1756_v29 = vsel %vm1500_vm3, %v1314_v9, %v1628_v53  ;;  %v1317_v18 = vadd.f32 %v3715_v60, %v3723_v2 }
 0x15e   : > { %2333 = vst.msk [vmem:[%s3352_s29 + $0xb0] sm:$0xf] %vm2288_vm1, %v2788_v28  ;;  %v1695_v37 = vsel %vm1439_vm4, %v1069_v24, %v1567_v56  ;;  %v1082_v41 = vadd.f32 %v3715_v60, %v3737_v63  ;;  %v2852_v51 = vpack.c.bf16 %v1756_v29, %v1756_v29  ;;  %v3862_v31 = vpop.f32.mrb[60].mxu0  ;;  %v3864_v43 = vpop.f32.mrb[60].mxu1  ;;  %v1338_v54 = vadd.f32 %v3715_v60, %v3741_v44 }
 0x15f   : > { %v2791_v40 = vpack.c.bf16 %v1695_v37, %v1695_v37  ;;  %v1759_v42 = vsel %vm1503_vm5, %v1325_v38, %v1631_v52  ;;  %v1693_v21 = vsel %vm1437_vm6, %v1061_v15, %v1565_v23  ;;  %vm1501_vm7 = vcmp.ge.f32.partialorder %v1317_v18, 0.0  ;;  %v3866_v50 = vpop.f32.mrb[61].mxu0  ;;  %v3868_v2 = vpop.f32.mrb[61].mxu1 }
 0x160   : > { %v2855_v48 = vpack.c.bf16 %v1759_v42, %v1759_v42  ;;  %v2789_v32 = vpack.c.bf16 %v1693_v21, %v1693_v21  ;;  %v1629_v49 = vmul.f32 0.01, %v1317_v18  ;;  %2397 = vst.msk [vmem:[%s3352_s29 + $0x1b0] sm:$0xf] %vm2288_vm1, %v2852_v51  ;;  %vm1442_vm8 = vcmp.ge.f32.partialorder %v1082_v41, 0.0  ;;  %v3878_v26 = vpop.f32.mrb[62].mxu0 }
 0x161   : > { %2336 = vst.msk [vmem:[%s3352_s29 + $0xbc] sm:$0xf] %vm2288_vm1, %v2791_v40  ;;  %v1570_v63 = vmul.f32 0.01, %v1082_v41  ;;  %v1074_v55 = vadd.f32 %v3715_v60, %v3743_v45  ;;  %v3880_v47 = vpop.f32.mrb[62].mxu1  ;;  %v1330_v30 = vadd.f32 %v3715_v60, %v3747_v46  ;;  %v1085_v58 = vadd.f32 %v3715_v60, %v3749_v22  ;;  %v3892_v45 = vpop.f32.mrb[63].mxu0 }
 0x162   : > { %2400 = vst.msk [vmem:[%s3352_s29 + $0x1bc] sm:$0xf] %vm2288_vm1, %v2855_v48  ;;  %2334 = vst.msk [vmem:[%s3352_s29 + $0xb4] sm:$0xf] %vm2288_vm1, %v2789_v32  ;;  %v1757_v5 = vsel %vm1501_vm7, %v1317_v18, %v1629_v49  ;;  %v1341_v44 = vadd.f32 %v3715_v60, %v3755_v57  ;;  %v3894_v8 = vpop.f32.mrb[63].mxu1  ;;  %vm1506_vm9 = vcmp.ge.f32.partialorder %v1338_v54, 0.0  ;;  %v1077_v28 = vadd.f32 %v3715_v60, %v3757_v61 }
 0x163   : > { %v2853_v0 = vpack.c.bf16 %v1757_v5, %v1757_v5  ;;  %v1698_v14 = vsel %vm1442_vm8, %v1082_v41, %v1570_v63  ;;  %v1634_v9 = vmul.f32 0.01, %v1338_v54  ;;  %vm1440_vm10 = vcmp.ge.f32.partialorder %v1074_v55, 0.0 }
 0x164   : > { %v2794_v24 = vpack.c.bf16 %v1698_v14, %v1698_v14  ;;  %v1568_v12 = vmul.f32 0.01, %v1074_v55  ;;  %vm1504_vm11 = vcmp.ge.f32.partialorder %v1330_v30, 0.0  ;;  %v1632_v22 = vmul.f32 0.01, %v1330_v30 }
 0x165   : > { %2398 = vst.msk [vmem:[%s3352_s29 + $0x1b4] sm:$0xf] %vm2288_vm1, %v2853_v0  ;;  %v1762_v46 = vsel %vm1506_vm9, %v1338_v54, %v1634_v9  ;;  %vm1443_vm12 = vcmp.ge.f32.partialorder %v1085_v58, 0.0  ;;  %v1571_v57 = vmul.f32 0.01, %v1085_v58  ;;  %vm1507_vm13 = vcmp.ge.f32.partialorder %v1341_v44, 0.0 }
 0x166   : > { %2339 = vst.msk [vmem:[%s3352_s29 + $0xc8] sm:$0xf] %vm2288_vm1, %v2794_v24  ;;  %v2858_v13 = vpack.c.bf16 %v1762_v46, %v1762_v46  ;;  %v1696_v38 = vsel %vm1440_vm10, %v1074_v55, %v1568_v12  ;;  %v1635_v15 = vmul.f32 0.01, %v1341_v44  ;;  %v1760_v1 = vsel %vm1504_vm11, %v1330_v30, %v1632_v22 }
 0x167   : > { %v2792_v25 = vpack.c.bf16 %v1696_v38, %v1696_v38  ;;  %v1699_v20 = vsel %vm1443_vm12, %v1085_v58, %v1571_v57  ;;  %v2856_v53 = vpack.c.bf16 %v1760_v1, %v1760_v1  ;;  %v1333_v23 = vadd.f32 %v3715_v60, %v3763_v33 }
 0x168   : > { %2403 = vst.msk [vmem:[%s3352_s29 + $0x1c8] sm:$0xf] %vm2288_vm1, %v2858_v13  ;;  %v2795_v56 = vpack.c.bf16 %v1699_v20, %v1699_v20  ;;  %v1763_v52 = vsel %vm1507_vm13, %v1341_v44, %v1635_v15  ;;  %vm1441_vm14 = vcmp.ge.f32.partialorder %v1077_v28, 0.0  ;;  %v1569_v37 = vmul.f32 0.01, %v1077_v28 }
 0x169   : > { %2337 = vst.msk [vmem:[%s3352_s29 + $0xc0] sm:$0xf] %vm2288_vm1, %v2792_v25  ;;  %v2859_v29 = vpack.c.bf16 %v1763_v52, %v1763_v52  ;;  %v1098_v18 = vadd.f32 %v3715_v60, %v3777_v19  ;;  %2401 = vst.msk [vmem:[%s3352_s29 + $0x1c0] sm:$0xf] %vm2288_vm1, %v2856_v53  ;;  %vm1505_vm15 = vcmp.ge.f32.partialorder %v1333_v23, 0.0  ;;  %v1354_v41 = vadd.f32 %v3715_v60, %v3779_v35 }
 0x16a   : > { %2340 = vst.msk [vmem:[%s3352_s29 + $0xcc] sm:$0xf] %vm2288_vm1, %v2795_v56  ;;  %v1633_v61 = vmul.f32 0.01, %v1333_v23  ;;  %v1090_v33 = vadd.f32 %v3715_v60, %v3783_v6  ;;  %v1697_v51 = vsel %vm1441_vm14, %v1077_v28, %v1569_v37  ;;  %v1346_v19 = vadd.f32 %v3715_v60, %v3785_v27 }
 0x16b   : > { %2404 = vst.msk [vmem:[%s3352_s29 + $0x1cc] sm:$0xf] %vm2288_vm1, %v2859_v29  ;;  %vm1446_vm0 = vcmp.ge.f32.partialorder %v1098_v18, 0.0  ;;  %v1574_v40 = vmul.f32 0.01, %v1098_v18  ;;  %v2793_v42 = vpack.c.bf16 %v1697_v51, %v1697_v51  ;;  %vm1510_vm2 = vcmp.ge.f32.partialorder %v1354_v41, 0.0 }
 0x16c   : > { %v1761_v21 = vsel %vm1505_vm15, %v1333_v23, %v1633_v61  ;;  %v1638_v48 = vmul.f32 0.01, %v1354_v41  ;;  %vm1444_vm3 = vcmp.ge.f32.partialorder %v1090_v33, 0.0  ;;  %v1572_v35 = vmul.f32 0.01, %v1090_v33 }
 0x16d   : > { %v2857_v32 = vpack.c.bf16 %v1761_v21, %v1761_v21  ;;  %v1702_v49 = vsel %vm1446_vm0, %v1098_v18, %v1574_v40  ;;  %2338 = vst.msk [vmem:[%s3352_s29 + $0xc4] sm:$0xf] %vm2288_vm1, %v2793_v42  ;;  %vm1508_vm4 = vcmp.ge.f32.partialorder %v1346_v19, 0.0  ;;  %v1636_v54 = vmul.f32 0.01, %v1346_v19 }
 0x16e   : > { %v2798_v6 = vpack.c.bf16 %v1702_v49, %v1702_v49  ;;  %v1766_v63 = vsel %vm1510_vm2, %v1354_v41, %v1638_v48  ;;  %v1700_v55 = vsel %vm1444_vm3, %v1090_v33, %v1572_v35  ;;  %v1101_v5 = vadd.f32 %v3715_v60, %v3793_v34 }
 0x16f   : > { %2402 = vst.msk [vmem:[%s3352_s29 + $0x1c4] sm:$0xf] %vm2288_vm1, %v2857_v32  ;;  %v2862_v27 = vpack.c.bf16 %v1766_v63, %v1766_v63  ;;  %v1357_v30 = vadd.f32 %v3715_v60, %v3795_v17  ;;  %v2796_v58 = vpack.c.bf16 %v1700_v55, %v1700_v55  ;;  %v1764_v44 = vsel %vm1508_vm4, %v1346_v19, %v1636_v54 }
 0x170   : > { %2343 = vst.msk [vmem:[%s3352_s29 + $0xd8] sm:$0xf] %vm2288_vm1, %v2798_v6  ;;  %v1093_v0 = vadd.f32 %v3715_v60, %v3803_v39  ;;  %v1349_v14 = vadd.f32 %v3715_v60, %v3805_v59  ;;  %v2860_v9 = vpack.c.bf16 %v1764_v44, %v1764_v44  ;;  %vm1447_vm5 = vcmp.ge.f32.partialorder %v1101_v5, 0.0 }
 0x171   : > { %2407 = vst.msk [vmem:[%s3352_s29 + $0x1d8] sm:$0xf] %vm2288_vm1, %v2862_v27  ;;  %v1575_v24 = vmul.f32 0.01, %v1101_v5  ;;  %vm1511_vm6 = vcmp.ge.f32.partialorder %v1357_v30, 0.0  ;;  %v1114_v59 = vadd.f32 %v3715_v60, %v3819_v62  ;;  %v1370_v46 = vadd.f32 %v3715_v60, %v3821_v7 }
 0x172   : > { %2341 = vst.msk [vmem:[%s3352_s29 + $0xd0] sm:$0xf] %vm2288_vm1, %v2796_v58  ;;  %v1639_v34 = vmul.f32 0.01, %v1357_v30  ;;  %vm1445_vm7 = vcmp.ge.f32.partialorder %v1093_v0, 0.0  ;;  %vm1509_vm8 = vcmp.ge.f32.partialorder %v1349_v14, 0.0  ;;  %v1106_v38 = vadd.f32 %v3715_v60, %v3825_v4 }
 0x173   : > { %v1573_v17 = vmul.f32 0.01, %v1093_v0  ;;  %2405 = vst.msk [vmem:[%s3352_s29 + $0x1d0] sm:$0xf] %vm2288_vm1, %v2860_v9  ;;  %v1703_v12 = vsel %vm1447_vm5, %v1101_v5, %v1575_v24  ;;  %v1637_v39 = vmul.f32 0.01, %v1349_v14  ;;  %v1362_v4 = vadd.f32 %v3715_v60, %v3835_v10 }
 0x174   : > { %v2799_v22 = vpack.c.bf16 %v1703_v12, %v1703_v12  ;;  %v1767_v57 = vsel %vm1511_vm6, %v1357_v30, %v1639_v34  ;;  %vm1450_vm9 = vcmp.ge.f32.partialorder %v1114_v59, 0.0  ;;  %v1578_v28 = vmul.f32 0.01, %v1114_v59 }
 0x175   : > { %v1701_v13 = vsel %vm1445_vm7, %v1093_v0, %v1573_v17  ;;  %v2863_v15 = vpack.c.bf16 %v1767_v57, %v1767_v57  ;;  %v1765_v1 = vsel %vm1509_vm8, %v1349_v14, %v1637_v39  ;;  %vm1514_vm10 = vcmp.ge.f32.partialorder %v1370_v46, 0.0 }
 0x176   : > { %v2797_v25 = vpack.c.bf16 %v1701_v13, %v1701_v13  ;;  %2344 = vst.msk [vmem:[%s3352_s29 + $0xdc] sm:$0xf] %vm2288_vm1, %v2799_v22  ;;  %v2861_v20 = vpack.c.bf16 %v1765_v1, %v1765_v1  ;;  %v1642_v62 = vmul.f32 0.01, %v1370_v46  ;;  %vm1448_vm11 = vcmp.ge.f32.partialorder %v1106_v38, 0.0 }
 0x177   : > { %2408 = vst.msk [vmem:[%s3352_s29 + $0x1dc] sm:$0xf] %vm2288_vm1, %v2863_v15  ;;  %v1576_v7 = vmul.f32 0.01, %v1106_v38  ;;  %v1117_v53 = vadd.f32 %v3715_v60, %v3837_v11  ;;  %v1706_v56 = vsel %vm1450_vm9, %v1114_v59, %v1578_v28  ;;  %v1373_v23 = vadd.f32 %v3715_v60, %v3846_v16 }
 0x178   : > { %2342 = vst.msk [vmem:[%s3352_s29 + $0xd4] sm:$0xf] %vm2288_vm1, %v2797_v25  ;;  %2406 = vst.msk [vmem:[%s3352_s29 + $0x1d4] sm:$0xf] %vm2288_vm1, %v2861_v20  ;;  %v1770_v52 = vsel %vm1514_vm10, %v1370_v46, %v1642_v62  ;;  %v1109_v29 = vadd.f32 %v3715_v60, %v3848_v3  ;;  %v2802_v37 = vpack.c.bf16 %v1706_v56, %v1706_v56  ;;  %vm1512_vm12 = vcmp.ge.f32.partialorder %v1362_v4, 0.0 }
 0x179   : > { %v2866_v18 = vpack.c.bf16 %v1770_v52, %v1770_v52  ;;  %v1704_v61 = vsel %vm1448_vm11, %v1106_v38, %v1576_v7  ;;  %v1640_v41 = vmul.f32 0.01, %v1362_v4  ;;  %vm1451_vm13 = vcmp.ge.f32.partialorder %v1117_v53, 0.0 }
 0x17a   : > { %v2800_v10 = vpack.c.bf16 %v1704_v61, %v1704_v61  ;;  %v1579_v33 = vmul.f32 0.01, %v1117_v53  ;;  %2347 = vst.msk [vmem:[%s3352_s29 + $0xe8] sm:$0xf] %vm2288_vm1, %v2802_v37  ;;  %vm1515_vm14 = vcmp.ge.f32.partialorder %v1373_v23, 0.0  ;;  %vm1449_vm15 = vcmp.ge.f32.partialorder %v1109_v29, 0.0 }
 0x17b   : > { %2411 = vst.msk [vmem:[%s3352_s29 + $0x1e8] sm:$0xf] %vm2288_vm1, %v2866_v18  ;;  %v1643_v11 = vmul.f32 0.01, %v1373_v23  ;;  %v1577_v16 = vmul.f32 0.01, %v1109_v29  ;;  %v1768_v3 = vsel %vm1512_vm12, %v1362_v4, %v1640_v41  ;;  %v1365_v40 = vadd.f32 %v3715_v60, %v3850_v36 }
 0x17c   : > { %2345 = vst.msk [vmem:[%s3352_s29 + $0xe0] sm:$0xf] %vm2288_vm1, %v2800_v10  ;;  %v1707_v51 = vsel %vm1451_vm13, %v1117_v53, %v1579_v33  ;;  %v1130_v19 = vadd.f32 %v3715_v60, %v3862_v31  ;;  %v2864_v42 = vpack.c.bf16 %v1768_v3, %v1768_v3  ;;  %v1386_v36 = vadd.f32 %v3715_v60, %v3864_v43 }
 0x17d   : > { %v2803_v21 = vpack.c.bf16 %v1707_v51, %v1707_v51  ;;  %v1771_v48 = vsel %vm1515_vm14, %v1373_v23, %v1643_v11  ;;  %v1705_v32 = vsel %vm1449_vm15, %v1109_v29, %v1577_v16  ;;  %vm1513_vm0 = vcmp.ge.f32.partialorder %v1365_v40, 0.0 }
 0x17e   : > { %v2867_v49 = vpack.c.bf16 %v1771_v48, %v1771_v48  ;;  %v2801_v35 = vpack.c.bf16 %v1705_v32, %v1705_v32  ;;  %v1641_v6 = vmul.f32 0.01, %v1365_v40  ;;  %2409 = vst.msk [vmem:[%s3352_s29 + $0x1e0] sm:$0xf] %vm2288_vm1, %v2864_v42  ;;  %vm1454_vm2 = vcmp.ge.f32.partialorder %v1130_v19, 0.0 }
 0x17f   : > { %2348 = vst.msk [vmem:[%s3352_s29 + $0xec] sm:$0xf] %vm2288_vm1, %v2803_v21  ;;  %v1582_v63 = vmul.f32 0.01, %v1130_v19  ;;  %v1122_v31 = vadd.f32 %v3715_v60, %v3866_v50  ;;  %v1378_v27 = vadd.f32 %v3715_v60, %v3868_v2  ;;  %v1133_v55 = vadd.f32 %v3715_v60, %v3878_v26 }
 0x180   : > { %2412 = vst.msk [vmem:[%s3352_s29 + $0x1ec] sm:$0xf] %vm2288_vm1, %v2867_v49  ;;  %2346 = vst.msk [vmem:[%s3352_s29 + $0xe4] sm:$0xf] %vm2288_vm1, %v2801_v35  ;;  %v1769_v54 = vsel %vm1513_vm0, %v1365_v40, %v1641_v6  ;;  %v1389_v5 = vadd.f32 %v3715_v60, %v3880_v47  ;;  %vm1518_vm3 = vcmp.ge.f32.partialorder %v1386_v36, 0.0  ;;  %v1125_v12 = vadd.f32 %v3715_v60, %v3892_v45 }
 0x181   : > { %v2865_v43 = vpack.c.bf16 %v1769_v54, %v1769_v54  ;;  %v1710_v30 = vsel %vm1454_vm2, %v1130_v19, %v1582_v63  ;;  %v1646_v58 = vmul.f32 0.01, %v1386_v36  ;;  %vm1452_vm4 = vcmp.ge.f32.partialorder %v1122_v31, 0.0 }
 0x182   : > { %v2806_v50 = vpack.c.bf16 %v1710_v30, %v1710_v30  ;;  %v1580_v44 = vmul.f32 0.01, %v1122_v31  ;;  %vm1516_vm5 = vcmp.ge.f32.partialorder %v1378_v27, 0.0  ;;  %v1644_v2 = vmul.f32 0.01, %v1378_v27 }
 0x183   : > { %2410 = vst.msk [vmem:[%s3352_s29 + $0x1e4] sm:$0xf] %vm2288_vm1, %v2865_v43  ;;  %v1774_v0 = vsel %vm1518_vm3, %v1386_v36, %v1646_v58  ;;  %vm1455_vm6 = vcmp.ge.f32.partialorder %v1133_v55, 0.0  ;;  %v1583_v14 = vmul.f32 0.01, %v1133_v55  ;;  %vm1519_vm7 = vcmp.ge.f32.partialorder %v1389_v5, 0.0 }
 0x184   : > { %2351 = vst.msk [vmem:[%s3352_s29 + $0xf8] sm:$0xf] %vm2288_vm1, %v2806_v50  ;;  %v2870_v26 = vpack.c.bf16 %v1774_v0, %v1774_v0  ;;  %v1708_v47 = vsel %vm1452_vm4, %v1122_v31, %v1580_v44  ;;  %v1647_v9 = vmul.f32 0.01, %v1389_v5  ;;  %v1772_v34 = vsel %vm1516_vm5, %v1378_v27, %v1644_v2 }
 0x185   : > { %v2804_v24 = vpack.c.bf16 %v1708_v47, %v1708_v47  ;;  %v1711_v17 = vsel %vm1455_vm6, %v1133_v55, %v1583_v14  ;;  %v2868_v39 = vpack.c.bf16 %v1772_v34, %v1772_v34  ;;  %v1381_v22 = vadd.f32 %v3715_v60, %v3894_v8 }
 0x186   : > { %2415 = vst.msk [vmem:[%s3352_s29 + $0x1f8] sm:$0xf] %vm2288_vm1, %v2870_v26  ;;  %v2807_v59 = vpack.c.bf16 %v1711_v17, %v1711_v17  ;;  %v1775_v46 = vsel %vm1519_vm7, %v1389_v5, %v1647_v9  ;;  %vm1453_vm8 = vcmp.ge.f32.partialorder %v1125_v12, 0.0  ;;  %v1581_v13 = vmul.f32 0.01, %v1125_v12 }
 0x187   : > { %2349 = vst.msk [vmem:[%s3352_s29 + $0xf0] sm:$0xf] %vm2288_vm1, %v2804_v24  ;;  %v2871_v57 = vpack.c.bf16 %v1775_v46, %v1775_v46  ;;  %2413 = vst.msk [vmem:[%s3352_s29 + $0x1f0] sm:$0xf] %vm2288_vm1, %v2868_v39  ;;  %vm1517_vm9 = vcmp.ge.f32.partialorder %v1381_v22, 0.0 }
 0x188   : > { %2352 = vst.msk [vmem:[%s3352_s29 + $0xfc] sm:$0xf] %vm2288_vm1, %v2807_v59  ;;  %v1645_v45 = vmul.f32 0.01, %v1381_v22  ;;  %v1709_v38 = vsel %vm1453_vm8, %v1125_v12, %v1581_v13 }
 0x189   : > { %2416 = vst.msk [vmem:[%s3352_s29 + $0x1fc] sm:$0xf] %vm2288_vm1, %v2871_v57  ;;  %v2805_v15 = vpack.c.bf16 %v1709_v38, %v1709_v38 }
 0x18a   : > { %v1773_v25 = vsel %vm1517_vm9, %v1381_v22, %v1645_v45 }
 0x18b   : > { %v2869_v1 = vpack.c.bf16 %v1773_v25, %v1773_v25  ;;  %2350 = vst.msk [vmem:[%s3352_s29 + $0xf4] sm:$0xf] %vm2288_vm1, %v2805_v15 }
 0x18d   : > { %2414 = vst.msk [vmem:[%s3352_s29 + $0x1f4] sm:$0xf] %vm2288_vm1, %v2869_v1 }
 0x18e PF: > { %s13_s12 = sadd.s32 1, %s3161_s12  }
 0x18f   : > { %p10_p4 = scmp.ge.s32.totalorder %s13_s12, 10  }
 0x191   :  { %12 = sbr.rel (!%p10_p4) target bundleno = 1 (0x1), region = 62 }

// kernel: cnn_forward.8
= control target key start
LH: loop header
LB: loop body
LE: loop exit
PB: predicated region body
PF: predicated region fallthrough
CT: control target
= control target key end

     0   :  { %s1752_s12 = smov 0   ;;  %s2112_s0 = inlined_call_operand.vmem [shape: bf16[2048,128], index: 0, kind: input, shape index: {}]   ;;  %s2113_s1 = inlined_call_operand.vmem [shape: bf16[128,16], index: 1, kind: input, shape index: {}]   ;;  %s2114_s2 = inlined_call_operand.vmem [shape: f32[1,16], index: 2, kind: input, shape index: {}]   ;;  %s2115_s3 = inlined_call_operand.vmem [shape: bf16[2048,16], index: 3, kind: output, shape index: {}]  }
   0x1 LB: > { %s1360_s13 = sadd.s32 4294967295, %s1730_s12   ;;  %p1364_p0 = scmp.ge.s32.totalorder %s1730_s12, 1  ;;  %s1730_s12 = sphi %s1752_s12, %s13_s12  }
   0x2   : > { %p138_p1 = scmp.lt.s32.totalorder %s1730_s12, 5 }
   0x4   : > { %p139_p2 = pnand %p1364_p0, %p138_p1 }
   0x5   : > { %v1684_v0 = vld [vmem:[%s2113_s1] sm:$0xff] (!%p139_p2)   ;;  %s1365_s16 = sshll.u32 (!%p139_p2), %s1360_s13, 6  ;;  %v1685_v1 = vld [vmem:[%s2113_s1 + $0x8] sm:$0xff] (!%p139_p2)   ;;  %v1686_v2 = vld [vmem:[%s2113_s1 + $0x10] sm:$0xff] (!%p139_p2)   ;;  %vm1239_vm0 = vcmask (!%p139_p2), 125952  }
   0x6   : > { %142 = sbr.rel (%p139_p2) target bundleno = 335 (0x14f), region = 32  ;;  %p163_p3 = scmp.lt.s32.totalorder (!%p139_p2), %s1365_s16, 255  ;;  %1580 = vmatprep.subr.bf16.mxu0 (!%p139_p2), %v1684_v0  ;;  %1660 = vmatprep.subr.bf16.mxu1 (!%p139_p2), %v1684_v0  ;;  %v1687_v3 = vld [vmem:[%s2113_s1 + $0x18] sm:$0xff] (!%p139_p2)   ;;  %v1688_v6 = vld [vmem:[%s2113_s1 + $0x20] sm:$0xff] (!%p139_p2)   ;;  %v1689_v7 = vld [vmem:[%s2113_s1 + $0x28] sm:$0xff] (!%p139_p2)  }
   0x7   : > { %1581 = vmatpush3.bf16.msra.mxu0 (!%p139_p2), %v1684_v0  ;;  %1668 = vmatpush3.bf16.msra.mxu1 (!%p139_p2), %v1684_v0  ;;  %v1690_v8 = vld [vmem:[%s2113_s1 + $0x30] sm:$0xff] (!%p139_p2)   ;;  %v1691_v9 = vld [vmem:[%s2113_s1 + $0x38] sm:$0xff] (!%p139_p2)   ;;  %v1829_v40 = vld [vmem:[%s2114_s2] ss:$0 sm:$0xff] (!%p139_p2) }
   0x8   : > { %1582 = vmatprep.subr.bf16.mxu0 (!%p139_p2), %v1685_v1  ;;  %1661 = vmatprep.subr.bf16.mxu1 (!%p139_p2), %v1685_v1 }
   0xb   : > { %1583 = vmatpush3.bf16.msra.mxu0 (!%p139_p2), %v1685_v1  ;;  %1669 = vmatpush3.bf16.msra.mxu1 (!%p139_p2), %v1685_v1 }
   0xc   : > { %1584 = vmatprep.subr.bf16.mxu0 (!%p139_p2), %v1686_v2  ;;  %1662 = vmatprep.subr.bf16.mxu1 (!%p139_p2), %v1686_v2 }
   0xd   : > { %s2117_s16 = smov (!%p163_p3, %s1365_s16), 255 }
   0xe   : > { %s1366_s21 = sshll.u32 %s2117_s16, 2 }
   0xf   : > { %s1777_s24 = scalar_lea.vmem %s2112_s0, %s1366_s21  ;;  %1585 = vmatpush3.bf16.msra.mxu0 %v1686_v2  ;;  %1670 = vmatpush3.bf16.msra.mxu1 %v1686_v2  ;;  %s1840_s13 = scalar_lea.vmem %s2115_s3, %s1366_s21 }
  0x10   : > { %v1692_v4 = vld [vmem:[%s1777_s24] sm:$0xff]   ;;  %1586 = vmatprep.subr.bf16.mxu0 %v1687_v3  ;;  %1663 = vmatprep.subr.bf16.mxu1 %v1687_v3  ;;  %v1694_v10 = vld [vmem:[%s1777_s24 + $0x8] sm:$0xff]   ;;  %v1696_v12 = vld [vmem:[%s1777_s24 + $0x10] sm:$0xff]  }
  0x11   : > { %v1693_v5 = vld [vmem:[%s1777_s24 + $0x80] sm:$0xff]   ;;  %1596 = vmatprep.mubr.bf16.mxu0 %v1692_v4  ;;  %v1695_v11 = vld [vmem:[%s1777_s24 + $0x88] sm:$0xff]   ;;  %v1697_v13 = vld [vmem:[%s1777_s24 + $0x90] sm:$0xff]  }
  0x12   : > { %1628 = vmatprep.mubr.bf16.mxu1 %v1693_v5  ;;  %v1698_v14 = vld [vmem:[%s1777_s24 + $0x18] sm:$0xff]   ;;  %v1700_v16 = vld [vmem:[%s1777_s24 + $0x20] sm:$0xff]   ;;  %v1702_v18 = vld [vmem:[%s1777_s24 + $0x28] sm:$0xff]  }
  0x13   : > { %1587 = vmatpush3.bf16.msra.mxu0 %v1687_v3  ;;  %1671 = vmatpush3.bf16.msra.mxu1 %v1687_v3  ;;  %v1699_v15 = vld [vmem:[%s1777_s24 + $0x98] sm:$0xff]   ;;  %v1701_v17 = vld [vmem:[%s1777_s24 + $0xa0] sm:$0xff]   ;;  %v1703_v19 = vld [vmem:[%s1777_s24 + $0xa8] sm:$0xff]  }
  0x14   : > { %1588 = vmatprep.subr.bf16.mxu0 %v1688_v6  ;;  %1664 = vmatprep.subr.bf16.mxu1 %v1688_v6  ;;  %v1704_v20 = vld [vmem:[%s1777_s24 + $0x30] sm:$0xff]   ;;  %v1706_v22 = vld [vmem:[%s1777_s24 + $0x38] sm:$0xff]   ;;  %v1708_v24 = vld [vmem:[%s1777_s24 + $0x40] sm:$0xff]  }
  0x15   : > { %v1705_v21 = vld [vmem:[%s1777_s24 + $0xb0] sm:$0xff]   ;;  %v1707_v23 = vld [vmem:[%s1777_s24 + $0xb8] sm:$0xff]   ;;  %v1709_v25 = vld [vmem:[%s1777_s24 + $0xc0] sm:$0xff]  }
  0x16   : > { %v1710_v26 = vld [vmem:[%s1777_s24 + $0x48] sm:$0xff]   ;;  %v1712_v28 = vld [vmem:[%s1777_s24 + $0x50] sm:$0xff]   ;;  %v1714_v30 = vld [vmem:[%s1777_s24 + $0x58] sm:$0xff]  }
  0x17   : > { %1589 = vmatpush3.bf16.msra.mxu0 %v1688_v6  ;;  %1672 = vmatpush3.bf16.msra.mxu1 %v1688_v6  ;;  %v1711_v27 = vld [vmem:[%s1777_s24 + $0xc8] sm:$0xff]   ;;  %v1713_v29 = vld [vmem:[%s1777_s24 + $0xd0] sm:$0xff]   ;;  %v1715_v31 = vld [vmem:[%s1777_s24 + $0xd8] sm:$0xff]  }
  0x18   : > { %1590 = vmatprep.subr.bf16.mxu0 %v1689_v7  ;;  %1665 = vmatprep.subr.bf16.mxu1 %v1689_v7  ;;  %v1716_v32 = vld [vmem:[%s1777_s24 + $0x60] sm:$0xff]   ;;  %v1718_v34 = vld [vmem:[%s1777_s24 + $0x68] sm:$0xff]   ;;  %v1720_v36 = vld [vmem:[%s1777_s24 + $0x70] sm:$0xff]  }
  0x19   : > { %v1717_v33 = vld [vmem:[%s1777_s24 + $0xe0] sm:$0xff]   ;;  %v1719_v35 = vld [vmem:[%s1777_s24 + $0xe8] sm:$0xff]   ;;  %v1721_v37 = vld [vmem:[%s1777_s24 + $0xf0] sm:$0xff]  }
  0x1a   : > { %v1722_v38 = vld [vmem:[%s1777_s24 + $0x78] sm:$0xff]  }
  0x1b   : > { %1591 = vmatpush3.bf16.msra.mxu0 %v1689_v7  ;;  %1673 = vmatpush3.bf16.msra.mxu1 %v1689_v7  ;;  %v1723_v39 = vld [vmem:[%s1777_s24 + $0xf8] sm:$0xff]  }
  0x1c   : > { %1592 = vmatprep.subr.bf16.mxu0 %v1690_v8  ;;  %1666 = vmatprep.subr.bf16.mxu1 %v1690_v8 }
  0x1f   : > { %1593 = vmatpush3.bf16.msra.mxu0 %v1690_v8  ;;  %1674 = vmatpush3.bf16.msra.mxu1 %v1690_v8 }
  0x20   : > { %1594 = vmatprep.subr.bf16.mxu0 %v1691_v9  ;;  %1667 = vmatprep.subr.bf16.mxu1 %v1691_v9 }
  0x23   : > { %1595 = vmatpush3.bf16.msra.mxu0 %v1691_v9  ;;  %1675 = vmatpush3.bf16.msra.mxu1 %v1691_v9 }
  0x26   : > { %1597 = vmatmul.mubr.bf16.vlgmr.msra.gmra.mrb[0].mxu0 %v1694_v10  ;;  %1629 = vmatmul.mubr.bf16.vlgmr.msra.gmra.mrb[0].mxu1 %v1695_v11 }
  0x27   : > { %1600 = vmatprep.mubr.bf16.mxu0 %v1696_v12  ;;  %1632 = vmatprep.mubr.bf16.mxu1 %v1697_v13 }
  0x2e   : > { %1601 = vmatmul.mubr.bf16.gmra.mrb[4].mxu0 %v1698_v14  ;;  %1633 = vmatmul.mubr.bf16.gmra.mrb[4].mxu1 %v1699_v15 }
  0x2f   : > { %1604 = vmatprep.mubr.bf16.mxu0 %v1700_v16  ;;  %1636 = vmatprep.mubr.bf16.mxu1 %v1701_v17 }
  0x36   : > { %1605 = vmatmul.mubr.bf16.gmra.mrb[8].mxu0 %v1702_v18  ;;  %1637 = vmatmul.mubr.bf16.gmra.mrb[8].mxu1 %v1703_v19 }
  0x37   : > { %1608 = vmatprep.mubr.bf16.mxu0 %v1704_v20  ;;  %1640 = vmatprep.mubr.bf16.mxu1 %v1705_v21 }
  0x3e   : > { %1609 = vmatmul.mubr.bf16.gmra.mrb[12].mxu0 %v1706_v22  ;;  %1641 = vmatmul.mubr.bf16.gmra.mrb[12].mxu1 %v1707_v23 }
  0x3f   : > { %1612 = vmatprep.mubr.bf16.mxu0 %v1708_v24  ;;  %1644 = vmatprep.mubr.bf16.mxu1 %v1709_v25 }
  0x46   : > { %1613 = vmatmul.mubr.bf16.gmra.mrb[16].mxu0 %v1710_v26  ;;  %1645 = vmatmul.mubr.bf16.gmra.mrb[16].mxu1 %v1711_v27 }
  0x47   : > { %1616 = vmatprep.mubr.bf16.mxu0 %v1712_v28  ;;  %1648 = vmatprep.mubr.bf16.mxu1 %v1713_v29 }
  0x4e   : > { %1617 = vmatmul.mubr.bf16.gmra.mrb[20].mxu0 %v1714_v30  ;;  %1649 = vmatmul.mubr.bf16.gmra.mrb[20].mxu1 %v1715_v31 }
  0x4f   : > { %1620 = vmatprep.mubr.bf16.mxu0 %v1716_v32  ;;  %1652 = vmatprep.mubr.bf16.mxu1 %v1717_v33 }
  0x56   : > { %1621 = vmatmul.mubr.bf16.gmra.mrb[24].mxu0 %v1718_v34  ;;  %1653 = vmatmul.mubr.bf16.gmra.mrb[24].mxu1 %v1719_v35 }
  0x57   : > { %1624 = vmatprep.mubr.bf16.mxu0 %v1720_v36  ;;  %1656 = vmatprep.mubr.bf16.mxu1 %v1721_v37 }
  0x5e   : > { %1625 = vmatmul.mubr.bf16.gmra.mrb[28].mxu0 %v1722_v38  ;;  %1657 = vmatmul.mubr.bf16.gmra.mrb[28].mxu1 %v1723_v39 }
  0xf9   : > { %v1598_v41 = vpop.f32.mrb[0].mxu0  ;;  %v1630_v42 = vpop.f32.mrb[0].mxu1 }
  0xfa   : > { %v545_v43 = vadd.f32 %v1598_v41, %v1829_v40  ;;  %v673_v44 = vadd.f32 %v1630_v42, %v1829_v40  ;;  %v536_v45 = vpop.f32.mrb[1].mxu0  ;;  %v664_v46 = vpop.f32.mrb[1].mxu1 }
  0xfb   : > { %v537_v47 = vadd.f32 %v1829_v40, %v536_v45  ;;  %v665_v48 = vadd.f32 %v1829_v40, %v664_v46  ;;  %v1599_v49 = vpop.f32.mrb[2].mxu0  ;;  %v1631_v50 = vpop.f32.mrb[2].mxu1 }
  0xfc   : > { %vm793_vm1 = vcmp.ge.f32.partialorder %v545_v43, 0.0  ;;  %v857_v51 = vmul.f32 0.01, %v545_v43  ;;  %vm825_vm2 = vcmp.ge.f32.partialorder %v673_v44, 0.0  ;;  %v889_v52 = vmul.f32 0.01, %v673_v44 }
  0xfd   : > { %vm791_vm3 = vcmp.ge.f32.partialorder %v537_v47, 0.0  ;;  %v855_v53 = vmul.f32 0.01, %v537_v47  ;;  %vm823_vm4 = vcmp.ge.f32.partialorder %v665_v48, 0.0  ;;  %v887_v54 = vmul.f32 0.01, %v665_v48 }
  0xfe   : > { %v921_v55 = vsel %vm793_vm1, %v545_v43, %v857_v51  ;;  %v953_v56 = vsel %vm825_vm2, %v673_v44, %v889_v52  ;;  %v548_v57 = vadd.f32 %v1599_v49, %v1829_v40  ;;  %v676_v58 = vadd.f32 %v1631_v50, %v1829_v40  ;;  %v539_v59 = vpop.f32.mrb[3].mxu0  ;;  %v667_v60 = vpop.f32.mrb[3].mxu1 }
  0xff   : > { %v1478_v61 = vpack.c.bf16 %v921_v55, %v921_v55  ;;  %v1510_v62 = vpack.c.bf16 %v953_v56, %v953_v56  ;;  %v919_v63 = vsel %vm791_vm3, %v537_v47, %v855_v53  ;;  %v951_v0 = vsel %vm823_vm4, %v665_v48, %v887_v54 }
 0x100   : > { %v1476_v1 = vpack.c.bf16 %v919_v63, %v919_v63  ;;  %v1508_v2 = vpack.c.bf16 %v951_v0, %v951_v0  ;;  %vm794_vm5 = vcmp.ge.f32.partialorder %v548_v57, 0.0  ;;  %v858_v3 = vmul.f32 0.01, %v548_v57 }
 0x101   : > { %1242 = vst.msk [vmem:[%s1840_s13 + $0x8] sm:$0xf] %vm1239_vm0, %v1478_v61  ;;  %1274 = vst.msk [vmem:[%s1840_s13 + $0x88] sm:$0xf] %vm1239_vm0, %v1510_v62  ;;  %vm826_vm6 = vcmp.ge.f32.partialorder %v676_v58, 0.0  ;;  %v540_v5 = vadd.f32 %v1829_v40, %v539_v59  ;;  %v668_v6 = vadd.f32 %v1829_v40, %v667_v60  ;;  %v1602_v7 = vpop.f32.mrb[4].mxu0 }
 0x102   : > { %v890_v4 = vmul.f32 0.01, %v676_v58  ;;  %v1634_v8 = vpop.f32.mrb[4].mxu1  ;;  %1240 = vst.msk [vmem:[%s1840_s13] sm:$0xf] %vm1239_vm0, %v1476_v1  ;;  %v922_v9 = vsel %vm794_vm5, %v548_v57, %v858_v3  ;;  %v561_v10 = vadd.f32 %v1602_v7, %v1829_v40  ;;  %v552_v12 = vpop.f32.mrb[5].mxu0 }
 0x103   : > { %1272 = vst.msk [vmem:[%s1840_s13 + $0x80] sm:$0xf] %vm1239_vm0, %v1508_v2  ;;  %v689_v11 = vadd.f32 %v1634_v8, %v1829_v40  ;;  %v680_v13 = vpop.f32.mrb[5].mxu1  ;;  %v1479_v14 = vpack.c.bf16 %v922_v9, %v922_v9  ;;  %vm792_vm7 = vcmp.ge.f32.partialorder %v540_v5, 0.0  ;;  %v856_v16 = vmul.f32 0.01, %v540_v5 }
 0x104   : > { %v954_v15 = vsel %vm826_vm6, %v676_v58, %v890_v4  ;;  %v1603_v17 = vpop.f32.mrb[6].mxu0  ;;  %v1635_v18 = vpop.f32.mrb[6].mxu1  ;;  %vm824_vm8 = vcmp.ge.f32.partialorder %v668_v6, 0.0  ;;  %v888_v20 = vmul.f32 0.01, %v668_v6  ;;  %vm797_vm9 = vcmp.ge.f32.partialorder %v561_v10, 0.0 }
 0x105   : > { %v1511_v19 = vpack.c.bf16 %v954_v15, %v954_v15  ;;  %v555_v21 = vpop.f32.mrb[7].mxu0  ;;  %v683_v22 = vpop.f32.mrb[7].mxu1  ;;  %1243 = vst.msk [vmem:[%s1840_s13 + $0xc] sm:$0xf] %vm1239_vm0, %v1479_v14  ;;  %v920_v23 = vsel %vm792_vm7, %v540_v5, %v856_v16  ;;  %v861_v24 = vmul.f32 0.01, %v561_v10  ;;  %v553_v28 = vadd.f32 %v1829_v40, %v552_v12 }
 0x106   : > { %vm829_vm10 = vcmp.ge.f32.partialorder %v689_v11, 0.0  ;;  %v893_v25 = vmul.f32 0.01, %v689_v11  ;;  %v1477_v26 = vpack.c.bf16 %v920_v23, %v920_v23  ;;  %v952_v27 = vsel %vm824_vm8, %v668_v6, %v888_v20 }
 0x107   : > { %1275 = vst.msk [vmem:[%s1840_s13 + $0x8c] sm:$0xf] %vm1239_vm0, %v1511_v19  ;;  %v681_v29 = vadd.f32 %v1829_v40, %v680_v13  ;;  %v1509_v30 = vpack.c.bf16 %v952_v27, %v952_v27  ;;  %v925_v31 = vsel %vm797_vm9, %v561_v10, %v861_v24  ;;  %v564_v33 = vadd.f32 %v1603_v17, %v1829_v40 }
 0x108   : > { %v957_v32 = vsel %vm829_vm10, %v689_v11, %v893_v25  ;;  %1241 = vst.msk [vmem:[%s1840_s13 + $0x4] sm:$0xf] %vm1239_vm0, %v1477_v26  ;;  %v1482_v34 = vpack.c.bf16 %v925_v31, %v925_v31  ;;  %vm795_vm11 = vcmp.ge.f32.partialorder %v553_v28, 0.0  ;;  %v859_v36 = vmul.f32 0.01, %v553_v28 }
 0x109   : > { %v1514_v35 = vpack.c.bf16 %v957_v32, %v957_v32  ;;  %1273 = vst.msk [vmem:[%s1840_s13 + $0x84] sm:$0xf] %vm1239_vm0, %v1509_v30  ;;  %vm827_vm12 = vcmp.ge.f32.partialorder %v681_v29, 0.0  ;;  %v891_v37 = vmul.f32 0.01, %v681_v29  ;;  %vm798_vm13 = vcmp.ge.f32.partialorder %v564_v33, 0.0 }
 0x10a   : > { %v862_v38 = vmul.f32 0.01, %v564_v33  ;;  %1246 = vst.msk [vmem:[%s1840_s13 + $0x18] sm:$0xf] %vm1239_vm0, %v1482_v34  ;;  %v923_v39 = vsel %vm795_vm11, %v553_v28, %v859_v36  ;;  %v692_v41 = vadd.f32 %v1635_v18, %v1829_v40  ;;  %v556_v42 = vadd.f32 %v1829_v40, %v555_v21  ;;  %v1606_v44 = vpop.f32.mrb[8].mxu0  ;;  %v1638_v45 = vpop.f32.mrb[8].mxu1 }
 0x10b   : > { %1278 = vst.msk [vmem:[%s1840_s13 + $0x98] sm:$0xf] %vm1239_vm0, %v1514_v35  ;;  %v684_v43 = vadd.f32 %v1829_v40, %v683_v22  ;;  %v1480_v46 = vpack.c.bf16 %v923_v39, %v923_v39  ;;  %v955_v47 = vsel %vm827_vm12, %v681_v29, %v891_v37  ;;  %v577_v49 = vadd.f32 %v1606_v44, %v1829_v40  ;;  %v568_v50 = vpop.f32.mrb[9].mxu0  ;;  %v696_v51 = vpop.f32.mrb[9].mxu1 }
 0x10c   : > { %v926_v48 = vsel %vm798_vm13, %v564_v33, %v862_v38  ;;  %v1512_v52 = vpack.c.bf16 %v955_v47, %v955_v47  ;;  %vm830_vm14 = vcmp.ge.f32.partialorder %v692_v41, 0.0  ;;  %v894_v54 = vmul.f32 0.01, %v692_v41  ;;  %v1607_v55 = vpop.f32.mrb[10].mxu0  ;;  %v1639_v56 = vpop.f32.mrb[10].mxu1 }
 0x10d   : > { %v1483_v53 = vpack.c.bf16 %v926_v48, %v926_v48  ;;  %1244 = vst.msk [vmem:[%s1840_s13 + $0x10] sm:$0xf] %vm1239_vm0, %v1480_v46  ;;  %vm796_vm15 = vcmp.ge.f32.partialorder %v556_v42, 0.0  ;;  %v860_v57 = vmul.f32 0.01, %v556_v42  ;;  %vm828_vm1 = vcmp.ge.f32.partialorder %v684_v43, 0.0 }
 0x10e   : > { %v892_v58 = vmul.f32 0.01, %v684_v43  ;;  %1276 = vst.msk [vmem:[%s1840_s13 + $0x90] sm:$0xf] %vm1239_vm0, %v1512_v52  ;;  %v958_v59 = vsel %vm830_vm14, %v692_v41, %v894_v54  ;;  %vm801_vm2 = vcmp.ge.f32.partialorder %v577_v49, 0.0  ;;  %v705_v61 = vadd.f32 %v1638_v45, %v1829_v40  ;;  %v571_v62 = vpop.f32.mrb[11].mxu0 }
 0x10f   : > { %1247 = vst.msk [vmem:[%s1840_s13 + $0x1c] sm:$0xf] %vm1239_vm0, %v1483_v53  ;;  %v865_v60 = vmul.f32 0.01, %v577_v49  ;;  %v699_v63 = vpop.f32.mrb[11].mxu1  ;;  %v1515_v0 = vpack.c.bf16 %v958_v59, %v958_v59  ;;  %v924_v1 = vsel %vm796_vm15, %v556_v42, %v860_v57  ;;  %v569_v3 = vadd.f32 %v1829_v40, %v568_v50 }
 0x110   : > { %v956_v2 = vsel %vm828_vm1, %v684_v43, %v892_v58  ;;  %v1481_v4 = vpack.c.bf16 %v924_v1, %v924_v1  ;;  %vm833_vm3 = vcmp.ge.f32.partialorder %v705_v61, 0.0  ;;  %v897_v8 = vmul.f32 0.01, %v705_v61 }
 0x111   : > { %v1513_v5 = vpack.c.bf16 %v956_v2, %v956_v2  ;;  %v929_v6 = vsel %vm801_vm2, %v577_v49, %v865_v60  ;;  %1279 = vst.msk [vmem:[%s1840_s13 + $0x9c] sm:$0xf] %vm1239_vm0, %v1515_v0  ;;  %vm799_vm4 = vcmp.ge.f32.partialorder %v569_v3, 0.0  ;;  %v863_v9 = vmul.f32 0.01, %v569_v3  ;;  %v1610_v10 = vpop.f32.mrb[12].mxu0 }
 0x112   : > { %v1486_v7 = vpack.c.bf16 %v929_v6, %v929_v6  ;;  %1245 = vst.msk [vmem:[%s1840_s13 + $0x14] sm:$0xf] %vm1239_vm0, %v1481_v4  ;;  %v697_v11 = vadd.f32 %v1829_v40, %v696_v51  ;;  %v580_v12 = vadd.f32 %v1607_v55, %v1829_v40  ;;  %v708_v13 = vadd.f32 %v1639_v56, %v1829_v40  ;;  %v1642_v15 = vpop.f32.mrb[12].mxu1  ;;  %v584_v16 = vpop.f32.mrb[13].mxu0 }
 0x113   : > { %1277 = vst.msk [vmem:[%s1840_s13 + $0x94] sm:$0xf] %vm1239_vm0, %v1513_v5  ;;  %v572_v14 = vadd.f32 %v1829_v40, %v571_v62  ;;  %v961_v17 = vsel %vm833_vm3, %v705_v61, %v897_v8  ;;  %v927_v18 = vsel %vm799_vm4, %v569_v3, %v863_v9  ;;  %v700_v19 = vadd.f32 %v1829_v40, %v699_v63  ;;  %v712_v21 = vpop.f32.mrb[13].mxu1  ;;  %v1611_v22 = vpop.f32.mrb[14].mxu0 }
 0x114   : > { %1250 = vst.msk [vmem:[%s1840_s13 + $0x28] sm:$0xf] %vm1239_vm0, %v1486_v7  ;;  %v593_v20 = vadd.f32 %v1610_v10, %v1829_v40  ;;  %v1518_v23 = vpack.c.bf16 %v961_v17, %v961_v17  ;;  %v1484_v24 = vpack.c.bf16 %v927_v18, %v927_v18  ;;  %vm831_vm5 = vcmp.ge.f32.partialorder %v697_v11, 0.0  ;;  %v1643_v26 = vpop.f32.mrb[14].mxu1  ;;  %v587_v27 = vpop.f32.mrb[15].mxu0 }
 0x115   : > { %v895_v25 = vmul.f32 0.01, %v697_v11  ;;  %vm802_vm6 = vcmp.ge.f32.partialorder %v580_v12, 0.0  ;;  %v866_v28 = vmul.f32 0.01, %v580_v12  ;;  %vm834_vm7 = vcmp.ge.f32.partialorder %v708_v13, 0.0 }
 0x116   : > { %v898_v29 = vmul.f32 0.01, %v708_v13  ;;  %1282 = vst.msk [vmem:[%s1840_s13 + $0xa8] sm:$0xf] %vm1239_vm0, %v1518_v23  ;;  %1248 = vst.msk [vmem:[%s1840_s13 + $0x20] sm:$0xf] %vm1239_vm0, %v1484_v24  ;;  %v721_v44 = vadd.f32 %v1642_v15, %v1829_v40  ;;  %v585_v48 = vadd.f32 %v1829_v40, %v584_v16  ;;  %v713_v49 = vadd.f32 %v1829_v40, %v712_v21 }
 0x117   : > { %v959_v30 = vsel %vm831_vm5, %v697_v11, %v895_v25  ;;  %vm800_vm8 = vcmp.ge.f32.partialorder %v572_v14, 0.0  ;;  %v864_v31 = vmul.f32 0.01, %v572_v14  ;;  %vm832_vm9 = vcmp.ge.f32.partialorder %v700_v19, 0.0  ;;  %v715_v32 = vpop.f32.mrb[15].mxu1 }
 0x118   : > { %v1516_v33 = vpack.c.bf16 %v959_v30, %v959_v30  ;;  %v930_v34 = vsel %vm802_vm6, %v580_v12, %v866_v28  ;;  %v962_v35 = vsel %vm834_vm7, %v708_v13, %v898_v29  ;;  %v896_v36 = vmul.f32 0.01, %v700_v19 }
 0x119   : > { %v1487_v37 = vpack.c.bf16 %v930_v34, %v930_v34  ;;  %v1519_v38 = vpack.c.bf16 %v962_v35, %v962_v35  ;;  %v928_v39 = vsel %vm800_vm8, %v572_v14, %v864_v31  ;;  %vm805_vm10 = vcmp.ge.f32.partialorder %v593_v20, 0.0  ;;  %v1614_v45 = vpop.f32.mrb[16].mxu0  ;;  %v1646_v46 = vpop.f32.mrb[16].mxu1 }
 0x11a   : > { %1280 = vst.msk [vmem:[%s1840_s13 + $0xa0] sm:$0xf] %vm1239_vm0, %v1516_v33  ;;  %v1485_v41 = vpack.c.bf16 %v928_v39, %v928_v39  ;;  %v960_v42 = vsel %vm832_vm9, %v700_v19, %v896_v36  ;;  %v869_v43 = vmul.f32 0.01, %v593_v20  ;;  %v596_v50 = vadd.f32 %v1611_v22, %v1829_v40  ;;  %v600_v51 = vpop.f32.mrb[17].mxu0  ;;  %v728_v52 = vpop.f32.mrb[17].mxu1 }
 0x11b   : > { %1251 = vst.msk [vmem:[%s1840_s13 + $0x2c] sm:$0xf] %vm1239_vm0, %v1487_v37  ;;  %1283 = vst.msk [vmem:[%s1840_s13 + $0xac] sm:$0xf] %vm1239_vm0, %v1519_v38  ;;  %v1517_v47 = vpack.c.bf16 %v960_v42, %v960_v42  ;;  %vm837_vm11 = vcmp.ge.f32.partialorder %v721_v44, 0.0  ;;  %v724_v55 = vadd.f32 %v1643_v26, %v1829_v40  ;;  %v1916_v56 = vpop.f32.mrb[18].mxu0  ;;  %v588_v7 = vadd.f32 %v1829_v40, %v587_v27 }
 0x11c   : > { %1249 = vst.msk [vmem:[%s1840_s13 + $0x24] sm:$0xf] %vm1239_vm0, %v1485_v41  ;;  %v933_v53 = vsel %vm805_vm10, %v593_v20, %v869_v43  ;;  %v901_v54 = vmul.f32 0.01, %v721_v44  ;;  %v1918_v57 = vpop.f32.mrb[18].mxu1  ;;  %vm803_vm12 = vcmp.ge.f32.partialorder %v585_v48, 0.0  ;;  %v716_v11 = vadd.f32 %v1829_v40, %v715_v32 }
 0x11d   : > { %1281 = vst.msk [vmem:[%s1840_s13 + $0xa4] sm:$0xf] %vm1239_vm0, %v1517_v47  ;;  %v1490_v58 = vpack.c.bf16 %v933_v53, %v933_v53  ;;  %v867_v59 = vmul.f32 0.01, %v585_v48  ;;  %vm835_vm13 = vcmp.ge.f32.partialorder %v713_v49, 0.0  ;;  %v1922_v60 = vpop.f32.mrb[19].mxu0  ;;  %v609_v14 = vadd.f32 %v1614_v45, %v1829_v40 }
 0x11e   : > { %v1924_v61 = vpop.f32.mrb[19].mxu1  ;;  %v965_v62 = vsel %vm837_vm11, %v721_v44, %v901_v54  ;;  %v899_v63 = vmul.f32 0.01, %v713_v49  ;;  %vm806_vm14 = vcmp.ge.f32.partialorder %v596_v50, 0.0  ;;  %v870_v0 = vmul.f32 0.01, %v596_v50 }
 0x11f   : > { %1254 = vst.msk [vmem:[%s1840_s13 + $0x38] sm:$0xf] %vm1239_vm0, %v1490_v58  ;;  %v1522_v1 = vpack.c.bf16 %v965_v62, %v965_v62  ;;  %v931_v2 = vsel %vm803_vm12, %v585_v48, %v867_v59  ;;  %vm838_vm15 = vcmp.ge.f32.partialorder %v724_v55, 0.0  ;;  %v902_v3 = vmul.f32 0.01, %v724_v55 }
 0x120   : > { %v1488_v4 = vpack.c.bf16 %v931_v2, %v931_v2  ;;  %v963_v5 = vsel %vm835_vm13, %v713_v49, %v899_v63  ;;  %v934_v6 = vsel %vm806_vm14, %v596_v50, %v870_v0  ;;  %vm804_vm1 = vcmp.ge.f32.partialorder %v588_v7, 0.0 }
 0x121   : > { %1286 = vst.msk [vmem:[%s1840_s13 + $0xb8] sm:$0xf] %vm1239_vm0, %v1522_v1  ;;  %v1520_v8 = vpack.c.bf16 %v963_v5, %v963_v5  ;;  %v1491_v9 = vpack.c.bf16 %v934_v6, %v934_v6  ;;  %v966_v10 = vsel %vm838_vm15, %v724_v55, %v902_v3  ;;  %v868_v13 = vmul.f32 0.01, %v588_v7  ;;  %v1618_v15 = vpop.f32.mrb[20].mxu0  ;;  %v1650_v16 = vpop.f32.mrb[20].mxu1 }
 0x122   : > { %1252 = vst.msk [vmem:[%s1840_s13 + $0x30] sm:$0xf] %vm1239_vm0, %v1488_v4  ;;  %v1523_v12 = vpack.c.bf16 %v966_v10, %v966_v10  ;;  %vm836_vm2 = vcmp.ge.f32.partialorder %v716_v11, 0.0  ;;  %v900_v17 = vmul.f32 0.01, %v716_v11  ;;  %v737_v18 = vadd.f32 %v1646_v46, %v1829_v40  ;;  %v616_v20 = vpop.f32.mrb[21].mxu0 }
 0x123   : > { %1284 = vst.msk [vmem:[%s1840_s13 + $0xb0] sm:$0xf] %vm1239_vm0, %v1520_v8  ;;  %1255 = vst.msk [vmem:[%s1840_s13 + $0x3c] sm:$0xf] %vm1239_vm0, %v1491_v9  ;;  %v601_v19 = vadd.f32 %v1829_v40, %v600_v51  ;;  %v1941_v21 = vpop.f32.mrb[21].mxu1  ;;  %v932_v22 = vsel %vm804_vm1, %v588_v7, %v868_v13  ;;  %vm809_vm3 = vcmp.ge.f32.partialorder %v609_v14, 0.0  ;;  %v729_v24 = vadd.f32 %v1829_v40, %v728_v52 }
 0x124   : > { %1287 = vst.msk [vmem:[%s1840_s13 + $0xbc] sm:$0xf] %vm1239_vm0, %v1523_v12  ;;  %v873_v23 = vmul.f32 0.01, %v609_v14  ;;  %v1946_v25 = vpop.f32.mrb[22].mxu0  ;;  %v1948_v26 = vpop.f32.mrb[22].mxu1  ;;  %v1489_v27 = vpack.c.bf16 %v932_v22, %v932_v22  ;;  %v964_v28 = vsel %vm836_vm2, %v716_v11, %v900_v17  ;;  %v612_v41 = vadd.f32 %v1916_v56, %v1829_v40 }
 0x125   : > { %vm841_vm4 = vcmp.ge.f32.partialorder %v737_v18, 0.0  ;;  %v905_v29 = vmul.f32 0.01, %v737_v18  ;;  %v1950_v30 = vpop.f32.mrb[23].mxu0  ;;  %v1952_v31 = vpop.f32.mrb[23].mxu1  ;;  %v1521_v32 = vpack.c.bf16 %v964_v28, %v964_v28  ;;  %vm807_vm5 = vcmp.ge.f32.partialorder %v601_v19, 0.0 }
 0x126   : > { %v937_v33 = vsel %vm809_vm3, %v609_v14, %v873_v23  ;;  %v871_v34 = vmul.f32 0.01, %v601_v19  ;;  %1253 = vst.msk [vmem:[%s1840_s13 + $0x34] sm:$0xf] %vm1239_vm0, %v1489_v27  ;;  %vm839_vm6 = vcmp.ge.f32.partialorder %v729_v24, 0.0  ;;  %v740_v42 = vadd.f32 %v1918_v57, %v1829_v40 }
 0x127   : > { %v1494_v35 = vpack.c.bf16 %v937_v33, %v937_v33  ;;  %v969_v36 = vsel %vm841_vm4, %v737_v18, %v905_v29  ;;  %v903_v37 = vmul.f32 0.01, %v729_v24  ;;  %1285 = vst.msk [vmem:[%s1840_s13 + $0xb4] sm:$0xf] %vm1239_vm0, %v1521_v32  ;;  %v604_v45 = vadd.f32 %v1829_v40, %v1922_v60 }
 0x128   : > { %v1526_v38 = vpack.c.bf16 %v969_v36, %v969_v36  ;;  %v935_v39 = vsel %vm807_vm5, %v601_v19, %v871_v34  ;;  %v732_v46 = vadd.f32 %v1829_v40, %v1924_v61  ;;  %vm810_vm7 = vcmp.ge.f32.partialorder %v612_v41, 0.0 }
 0x129   : > { %1258 = vst.msk [vmem:[%s1840_s13 + $0x48] sm:$0xf] %vm1239_vm0, %v1494_v35  ;;  %v1492_v43 = vpack.c.bf16 %v935_v39, %v935_v39  ;;  %v967_v44 = vsel %vm839_vm6, %v729_v24, %v903_v37  ;;  %v874_v48 = vmul.f32 0.01, %v612_v41  ;;  %vm842_vm8 = vcmp.ge.f32.partialorder %v740_v42, 0.0  ;;  %v1970_v49 = vpop.f32.mrb[24].mxu0 }
 0x12a   : > { %1290 = vst.msk [vmem:[%s1840_s13 + $0xc8] sm:$0xf] %vm1239_vm0, %v1526_v38  ;;  %v1524_v47 = vpack.c.bf16 %v967_v44, %v967_v44  ;;  %v1972_v50 = vpop.f32.mrb[24].mxu1  ;;  %v906_v51 = vmul.f32 0.01, %v740_v42  ;;  %vm808_vm9 = vcmp.ge.f32.partialorder %v604_v45, 0.0  ;;  %v625_v55 = vadd.f32 %v1618_v15, %v1829_v40 }
 0x12b   : > { %1256 = vst.msk [vmem:[%s1840_s13 + $0x40] sm:$0xf] %vm1239_vm0, %v1492_v43  ;;  %v872_v52 = vmul.f32 0.01, %v604_v45  ;;  %vm840_vm10 = vcmp.ge.f32.partialorder %v732_v46, 0.0  ;;  %v938_v53 = vsel %vm810_vm7, %v612_v41, %v874_v48  ;;  %v753_v56 = vadd.f32 %v1650_v16, %v1829_v40  ;;  %v1980_v57 = vpop.f32.mrb[25].mxu0 }
 0x12c   : > { %1288 = vst.msk [vmem:[%s1840_s13 + $0xc0] sm:$0xf] %vm1239_vm0, %v1524_v47  ;;  %v904_v54 = vmul.f32 0.01, %v732_v46  ;;  %v1982_v58 = vpop.f32.mrb[25].mxu1  ;;  %v1495_v59 = vpack.c.bf16 %v938_v53, %v938_v53  ;;  %v970_v60 = vsel %vm842_vm8, %v740_v42, %v906_v51  ;;  %v617_v62 = vadd.f32 %v1829_v40, %v616_v20  ;;  %v1986_v63 = vpop.f32.mrb[26].mxu0 }
 0x12d   : > { %v936_v61 = vsel %vm808_vm9, %v604_v45, %v872_v52  ;;  %v1988_v0 = vpop.f32.mrb[26].mxu1  ;;  %v1527_v1 = vpack.c.bf16 %v970_v60, %v970_v60  ;;  %vm813_vm11 = vcmp.ge.f32.partialorder %v625_v55, 0.0  ;;  %v1991_v4 = vpop.f32.mrb[27].mxu0  ;;  %v877_v7 = vmul.f32 0.01, %v625_v55 }
 0x12e   : > { %v1493_v2 = vpack.c.bf16 %v936_v61, %v936_v61  ;;  %v968_v3 = vsel %vm840_vm10, %v732_v46, %v904_v54  ;;  %v1993_v5 = vpop.f32.mrb[27].mxu1  ;;  %1259 = vst.msk [vmem:[%s1840_s13 + $0x4c] sm:$0xf] %vm1239_vm0, %v1495_v59  ;;  %vm845_vm12 = vcmp.ge.f32.partialorder %v753_v56, 0.0  ;;  %v909_v8 = vmul.f32 0.01, %v753_v56 }
 0x12f   : > { %v1525_v6 = vpack.c.bf16 %v968_v3, %v968_v3  ;;  %1291 = vst.msk [vmem:[%s1840_s13 + $0xcc] sm:$0xf] %vm1239_vm0, %v1527_v1  ;;  %vm811_vm13 = vcmp.ge.f32.partialorder %v617_v62, 0.0  ;;  %v875_v9 = vmul.f32 0.01, %v617_v62  ;;  %v745_v10 = vadd.f32 %v1829_v40, %v1941_v21 }
 0x130   : > { %1257 = vst.msk [vmem:[%s1840_s13 + $0x44] sm:$0xf] %vm1239_vm0, %v1493_v2  ;;  %v628_v11 = vadd.f32 %v1946_v25, %v1829_v40  ;;  %v941_v12 = vsel %vm813_vm11, %v625_v55, %v877_v7  ;;  %v973_v13 = vsel %vm845_vm12, %v753_v56, %v909_v8  ;;  %v756_v14 = vadd.f32 %v1948_v26, %v1829_v40 }
 0x131   : > { %1289 = vst.msk [vmem:[%s1840_s13 + $0xc4] sm:$0xf] %vm1239_vm0, %v1525_v6  ;;  %v620_v15 = vadd.f32 %v1829_v40, %v1950_v30  ;;  %v1498_v16 = vpack.c.bf16 %v941_v12, %v941_v12  ;;  %v1530_v17 = vpack.c.bf16 %v973_v13, %v973_v13  ;;  %v939_v18 = vsel %vm811_vm13, %v617_v62, %v875_v9  ;;  %v2011_v19 = vpop.f32.mrb[28].mxu0  ;;  %v2013_v20 = vpop.f32.mrb[28].mxu1 }
 0x132   : > { %vm843_vm14 = vcmp.ge.f32.partialorder %v745_v10, 0.0  ;;  %v1496_v21 = vpack.c.bf16 %v939_v18, %v939_v18  ;;  %v907_v22 = vmul.f32 0.01, %v745_v10  ;;  %vm814_vm15 = vcmp.ge.f32.partialorder %v628_v11, 0.0  ;;  %v2015_v24 = vpop.f32.mrb[29].mxu0  ;;  %v2027_v32 = vpop.f32.mrb[29].mxu1 }
 0x133   : > { %v878_v23 = vmul.f32 0.01, %v628_v11  ;;  %1262 = vst.msk [vmem:[%s1840_s13 + $0x58] sm:$0xf] %vm1239_vm0, %v1498_v16  ;;  %1294 = vst.msk [vmem:[%s1840_s13 + $0xd8] sm:$0xf] %vm1239_vm0, %v1530_v17  ;;  %v748_v29 = vadd.f32 %v1829_v40, %v1952_v31  ;;  %v641_v30 = vadd.f32 %v1970_v49, %v1829_v40  ;;  %v769_v45 = vadd.f32 %v1972_v50, %v1829_v40 }
 0x134   : > { %vm846_vm1 = vcmp.ge.f32.partialorder %v756_v14, 0.0  ;;  %v910_v25 = vmul.f32 0.01, %v756_v14  ;;  %vm812_vm2 = vcmp.ge.f32.partialorder %v620_v15, 0.0  ;;  %v876_v26 = vmul.f32 0.01, %v620_v15 }
 0x135   : > { %1260 = vst.msk [vmem:[%s1840_s13 + $0x50] sm:$0xf] %vm1239_vm0, %v1496_v21  ;;  %v971_v27 = vsel %vm843_vm14, %v745_v10, %v907_v22  ;;  %v942_v28 = vsel %vm814_vm15, %v628_v11, %v878_v23  ;;  %v2029_v33 = vpop.f32.mrb[30].mxu0  ;;  %v2031_v38 = vpop.f32.mrb[30].mxu1  ;;  %vm844_vm3 = vcmp.ge.f32.partialorder %v748_v29, 0.0  ;;  %vm817_vm4 = vcmp.ge.f32.partialorder %v641_v30, 0.0 }
 0x136   : > { %v1528_v34 = vpack.c.bf16 %v971_v27, %v971_v27  ;;  %v1499_v35 = vpack.c.bf16 %v942_v28, %v942_v28  ;;  %v974_v36 = vsel %vm846_vm1, %v756_v14, %v910_v25  ;;  %v940_v37 = vsel %vm812_vm2, %v620_v15, %v876_v26  ;;  %v2033_v39 = vpop.f32.mrb[31].mxu0  ;;  %v2035_v43 = vpop.f32.mrb[31].mxu1 }
 0x137   : > { %v1531_v41 = vpack.c.bf16 %v974_v36, %v974_v36  ;;  %v1497_v31 = vpack.c.bf16 %v940_v37, %v940_v37  ;;  %v908_v42 = vmul.f32 0.01, %v748_v29  ;;  %v881_v44 = vmul.f32 0.01, %v641_v30 }
 0x138   : > { %1292 = vst.msk [vmem:[%s1840_s13 + $0xd0] sm:$0xf] %vm1239_vm0, %v1528_v34  ;;  %1263 = vst.msk [vmem:[%s1840_s13 + $0x5c] sm:$0xf] %vm1239_vm0, %v1499_v35  ;;  %v633_v46 = vadd.f32 %v1829_v40, %v1980_v57  ;;  %v761_v48 = vadd.f32 %v1829_v40, %v1982_v58  ;;  %v644_v49 = vadd.f32 %v1986_v63, %v1829_v40  ;;  %vm849_vm5 = vcmp.ge.f32.partialorder %v769_v45, 0.0 }
 0x139   : > { %1295 = vst.msk [vmem:[%s1840_s13 + $0xdc] sm:$0xf] %vm1239_vm0, %v1531_v41  ;;  %1261 = vst.msk [vmem:[%s1840_s13 + $0x54] sm:$0xf] %vm1239_vm0, %v1497_v31  ;;  %v972_v47 = vsel %vm844_vm3, %v748_v29, %v908_v42  ;;  %v772_v51 = vadd.f32 %v1988_v0, %v1829_v40  ;;  %v945_v52 = vsel %vm817_vm4, %v641_v30, %v881_v44  ;;  %v913_v53 = vmul.f32 0.01, %v769_v45 }
 0x13a   : > { %v1529_v50 = vpack.c.bf16 %v972_v47, %v972_v47  ;;  %v1502_v54 = vpack.c.bf16 %v945_v52, %v945_v52  ;;  %vm815_vm6 = vcmp.ge.f32.partialorder %v633_v46, 0.0  ;;  %v879_v55 = vmul.f32 0.01, %v633_v46 }
 0x13b   : > { %vm847_vm7 = vcmp.ge.f32.partialorder %v761_v48, 0.0  ;;  %v977_v56 = vsel %vm849_vm5, %v769_v45, %v913_v53  ;;  %v911_v57 = vmul.f32 0.01, %v761_v48  ;;  %vm818_vm8 = vcmp.ge.f32.partialorder %v644_v49, 0.0 }
 0x13c   : > { %1293 = vst.msk [vmem:[%s1840_s13 + $0xd4] sm:$0xf] %vm1239_vm0, %v1529_v50  ;;  %v882_v58 = vmul.f32 0.01, %v644_v49  ;;  %1266 = vst.msk [vmem:[%s1840_s13 + $0x68] sm:$0xf] %vm1239_vm0, %v1502_v54  ;;  %v1534_v59 = vpack.c.bf16 %v977_v56, %v977_v56  ;;  %v943_v60 = vsel %vm815_vm6, %v633_v46, %v879_v55  ;;  %v636_v1 = vadd.f32 %v1829_v40, %v1991_v4 }
 0x13d   : > { %vm850_vm9 = vcmp.ge.f32.partialorder %v772_v51, 0.0  ;;  %v914_v61 = vmul.f32 0.01, %v772_v51  ;;  %v1500_v62 = vpack.c.bf16 %v943_v60, %v943_v60  ;;  %v975_v63 = vsel %vm847_vm7, %v761_v48, %v911_v57 }
 0x13e   : > { %v946_v0 = vsel %vm818_vm8, %v644_v49, %v882_v58  ;;  %1298 = vst.msk [vmem:[%s1840_s13 + $0xe8] sm:$0xf] %vm1239_vm0, %v1534_v59  ;;  %v1532_v2 = vpack.c.bf16 %v975_v63, %v975_v63  ;;  %v764_v7 = vadd.f32 %v1829_v40, %v1993_v5  ;;  %vm816_vm10 = vcmp.ge.f32.partialorder %v636_v1, 0.0 }
 0x13f   : > { %v1503_v3 = vpack.c.bf16 %v946_v0, %v946_v0  ;;  %v978_v6 = vsel %vm850_vm9, %v772_v51, %v914_v61  ;;  %1264 = vst.msk [vmem:[%s1840_s13 + $0x60] sm:$0xf] %vm1239_vm0, %v1500_v62  ;;  %v880_v9 = vmul.f32 0.01, %v636_v1  ;;  %v657_v10 = vadd.f32 %v2011_v19, %v1829_v40 }
 0x140   : > { %v1535_v8 = vpack.c.bf16 %v978_v6, %v978_v6  ;;  %1296 = vst.msk [vmem:[%s1840_s13 + $0xe0] sm:$0xf] %vm1239_vm0, %v1532_v2  ;;  %vm848_vm11 = vcmp.ge.f32.partialorder %v764_v7, 0.0  ;;  %v912_v4 = vmul.f32 0.01, %v764_v7  ;;  %v785_v11 = vadd.f32 %v2013_v20, %v1829_v40 }
 0x141   : > { %1267 = vst.msk [vmem:[%s1840_s13 + $0x6c] sm:$0xf] %vm1239_vm0, %v1503_v3  ;;  %v649_v5 = vadd.f32 %v1829_v40, %v2015_v24  ;;  %v944_v12 = vsel %vm816_vm10, %v636_v1, %v880_v9  ;;  %vm821_vm12 = vcmp.ge.f32.partialorder %v657_v10, 0.0  ;;  %v885_v13 = vmul.f32 0.01, %v657_v10 }
 0x142   : > { %1299 = vst.msk [vmem:[%s1840_s13 + $0xec] sm:$0xf] %vm1239_vm0, %v1535_v8  ;;  %v777_v14 = vadd.f32 %v1829_v40, %v2027_v32  ;;  %v1501_v15 = vpack.c.bf16 %v944_v12, %v944_v12  ;;  %v976_v16 = vsel %vm848_vm11, %v764_v7, %v912_v4  ;;  %vm853_vm13 = vcmp.ge.f32.partialorder %v785_v11, 0.0 }
 0x143   : > { %v917_v17 = vmul.f32 0.01, %v785_v11  ;;  %v1533_v18 = vpack.c.bf16 %v976_v16, %v976_v16  ;;  %v949_v19 = vsel %vm821_vm12, %v657_v10, %v885_v13  ;;  %vm819_vm14 = vcmp.ge.f32.partialorder %v649_v5, 0.0 }
 0x144   : > { %v883_v20 = vmul.f32 0.01, %v649_v5  ;;  %1265 = vst.msk [vmem:[%s1840_s13 + $0x64] sm:$0xf] %vm1239_vm0, %v1501_v15  ;;  %v1506_v21 = vpack.c.bf16 %v949_v19, %v949_v19  ;;  %vm851_vm15 = vcmp.ge.f32.partialorder %v777_v14, 0.0  ;;  %v660_v26 = vadd.f32 %v2029_v33, %v1829_v40 }
 0x145   : > { %v981_v22 = vsel %vm853_vm13, %v785_v11, %v917_v17  ;;  %v915_v23 = vmul.f32 0.01, %v777_v14  ;;  %1297 = vst.msk [vmem:[%s1840_s13 + $0xe4] sm:$0xf] %vm1239_vm0, %v1533_v18  ;;  %v788_v27 = vadd.f32 %v2031_v38, %v1829_v40  ;;  %v652_v30 = vadd.f32 %v1829_v40, %v2033_v39 }
 0x146   : > { %v1538_v24 = vpack.c.bf16 %v981_v22, %v981_v22  ;;  %v947_v25 = vsel %vm819_vm14, %v649_v5, %v883_v20  ;;  %1270 = vst.msk [vmem:[%s1840_s13 + $0x78] sm:$0xf] %vm1239_vm0, %v1506_v21  ;;  %v780_v32 = vadd.f32 %v1829_v40, %v2035_v43  ;;  %vm822_vm1 = vcmp.ge.f32.partialorder %v660_v26, 0.0 }
 0x147   : > { %v1504_v28 = vpack.c.bf16 %v947_v25, %v947_v25  ;;  %v979_v29 = vsel %vm851_vm15, %v777_v14, %v915_v23  ;;  %v886_v35 = vmul.f32 0.01, %v660_v26  ;;  %vm854_vm2 = vcmp.ge.f32.partialorder %v788_v27, 0.0 }
 0x148   : > { %1302 = vst.msk [vmem:[%s1840_s13 + $0xf8] sm:$0xf] %vm1239_vm0, %v1538_v24  ;;  %v1536_v34 = vpack.c.bf16 %v979_v29, %v979_v29  ;;  %v918_v33 = vmul.f32 0.01, %v788_v27  ;;  %vm820_vm3 = vcmp.ge.f32.partialorder %v652_v30, 0.0  ;;  %vm852_vm4 = vcmp.ge.f32.partialorder %v780_v32, 0.0 }
 0x149   : > { %1268 = vst.msk [vmem:[%s1840_s13 + $0x70] sm:$0xf] %vm1239_vm0, %v1504_v28  ;;  %v884_v36 = vmul.f32 0.01, %v652_v30  ;;  %v950_v37 = vsel %vm822_vm1, %v660_v26, %v886_v35  ;;  %v916_v40 = vmul.f32 0.01, %v780_v32 }
 0x14a   : > { %1300 = vst.msk [vmem:[%s1840_s13 + $0xf0] sm:$0xf] %vm1239_vm0, %v1536_v34  ;;  %v1507_v38 = vpack.c.bf16 %v950_v37, %v950_v37  ;;  %v982_v39 = vsel %vm854_vm2, %v788_v27, %v918_v33 }
 0x14b   : > { %v948_v41 = vsel %vm820_vm3, %v652_v30, %v884_v36  ;;  %v1539_v31 = vpack.c.bf16 %v982_v39, %v982_v39  ;;  %v980_v43 = vsel %vm852_vm4, %v780_v32, %v916_v40 }
 0x14c   : > { %v1505_v42 = vpack.c.bf16 %v948_v41, %v948_v41  ;;  %1271 = vst.msk [vmem:[%s1840_s13 + $0x7c] sm:$0xf] %vm1239_vm0, %v1507_v38  ;;  %v1537_v44 = vpack.c.bf16 %v980_v43, %v980_v43 }
 0x14d   : > { %1303 = vst.msk [vmem:[%s1840_s13 + $0xfc] sm:$0xf] %vm1239_vm0, %v1539_v31 }
 0x14e   : > { %1269 = vst.msk [vmem:[%s1840_s13 + $0x74] sm:$0xf] %vm1239_vm0, %v1505_v42  ;;  %1301 = vst.msk [vmem:[%s1840_s13 + $0xf4] sm:$0xf] %vm1239_vm0, %v1537_v44 }
 0x14f PF: > { %s13_s12 = sadd.s32 1, %s1730_s12  }
 0x150   : > { %p10_p4 = scmp.ge.s32.totalorder %s13_s12, 6  }
 0x152   :  { %12 = sbr.rel (!%p10_p4) target bundleno = 1 (0x1), region = 62 }

// kernel: cnn_forward.9
= control target key start
LH: loop header
LB: loop body
LE: loop exit
PB: predicated region body
PF: predicated region fallthrough
CT: control target
= control target key end

     0   :  { %s1333_s12 = smov 0   ;;  %s1539_s0 = inlined_call_operand.vmem [shape: bf16[512,256], index: 0, kind: input, shape index: {}]   ;;  %s1540_s1 = inlined_call_operand.vmem [shape: bf16[256,32], index: 1, kind: input, shape index: {}]   ;;  %s1541_s2 = inlined_call_operand.vmem [shape: f32[1,32], index: 2, kind: input, shape index: {}]   ;;  %s1542_s3 = inlined_call_operand.vmem [shape: bf16[512,32], index: 3, kind: output, shape index: {}]  }
   0x1 LB: > { %s979_s13 = sadd.s32 4294967295, %s1311_s12   ;;  %p983_p0 = scmp.ge.s32.totalorder %s1311_s12, 1  ;;  %s1311_s12 = sphi %s1333_s12, %s13_s12  }
   0x2   : > { %p139_p1 = scmp.lt.s32.totalorder %s1311_s12, 3 }
   0x4   : > { %p140_p2 = pnand %p983_p0, %p139_p1 }
   0x5   : > { %v1241_v0 = vld [vmem:[%s1540_s1 + $0x40] sm:$0xff] (!%p140_p2)   ;;  %s984_s16 = sshll.u32 (!%p140_p2), %s979_s13, 5  ;;  %v1243_v2 = vld [vmem:[%s1540_s1 + $0x48] sm:$0xff] (!%p140_p2)   ;;  %v1245_v4 = vld [vmem:[%s1540_s1 + $0x50] sm:$0xff] (!%p140_p2)   ;;  %vm890_vm2 = vcmask (!%p140_p2), 257024  }
   0x6   : > { %143 = sbr.rel (%p140_p2) target bundleno = 321 (0x141), region = 32  ;;  %v1242_v1 = vld [vmem:[%s1540_s1] sm:$0xff] (!%p140_p2)   ;;  %1105 = vmatprep.subr.bf16.mxu0 (!%p140_p2), %v1241_v0  ;;  %1217 = vmatprep.subr.bf16.mxu1 (!%p140_p2), %v1241_v0  ;;  %v1244_v3 = vld [vmem:[%s1540_s1 + $0x8] sm:$0xff] (!%p140_p2)   ;;  %p165_p3 = scmp.lt.s32.totalorder (!%p140_p2), %s984_s16, 63  ;;  %v1246_v5 = vld [vmem:[%s1540_s1 + $0x10] sm:$0xff] (!%p140_p2)  }
   0x7   : > { %1106 = vmatpush3.bf16.msra.mxu0 (!%p140_p2), %v1242_v1  ;;  %1225 = vmatpush3.bf16.msra.mxu1 (!%p140_p2), %v1242_v1  ;;  %v1247_v6 = vld [vmem:[%s1540_s1 + $0x58] sm:$0xff] (!%p140_p2)   ;;  %v1249_v8 = vld [vmem:[%s1540_s1 + $0x60] sm:$0xff] (!%p140_p2)   ;;  %v1251_v10 = vld [vmem:[%s1540_s1 + $0x68] sm:$0xff] (!%p140_p2)  }
   0x8   : > { %1107 = vmatprep.subr.bf16.mxu0 (!%p140_p2), %v1243_v2  ;;  %1218 = vmatprep.subr.bf16.mxu1 (!%p140_p2), %v1243_v2  ;;  %v1248_v7 = vld [vmem:[%s1540_s1 + $0x18] sm:$0xff] (!%p140_p2)   ;;  %v1250_v9 = vld [vmem:[%s1540_s1 + $0x20] sm:$0xff] (!%p140_p2)   ;;  %v1252_v13 = vld [vmem:[%s1540_s1 + $0x28] sm:$0xff] (!%p140_p2)  }
   0x9   : > { %v1253_v14 = vld [vmem:[%s1540_s1 + $0x70] sm:$0xff] (!%p140_p2)   ;;  %v1255_v16 = vld [vmem:[%s1540_s1 + $0x78] sm:$0xff] (!%p140_p2)   ;;  %v1432_v50 = vld [vmem:[%s1541_s2] ss:$0 sm:$0xff] (!%p140_p2) }
   0xa   : > { %v1254_v15 = vld [vmem:[%s1540_s1 + $0x30] sm:$0xff] (!%p140_p2)   ;;  %v1256_v17 = vld [vmem:[%s1540_s1 + $0x38] sm:$0xff] (!%p140_p2)  }
   0xb   : > { %1108 = vmatpush3.bf16.msra.mxu0 (!%p140_p2), %v1244_v3  ;;  %1226 = vmatpush3.bf16.msra.mxu1 (!%p140_p2), %v1244_v3 }
   0xc   : > { %1109 = vmatprep.subr.bf16.mxu0 (!%p140_p2), %v1245_v4  ;;  %1219 = vmatprep.subr.bf16.mxu1 (!%p140_p2), %v1245_v4 }
   0xd   : > { %s1544_s16 = smov (!%p165_p3, %s984_s16), 63 }
   0xe   : > { %s1072_s4 = sshll.u32 %s1544_s16, 3  ;;  %s988_s28 = sshll.u32 %s1544_s16, 2 }
   0xf   : > { %1110 = vmatpush3.bf16.msra.mxu0 %v1246_v5  ;;  %1227 = vmatpush3.bf16.msra.mxu1 %v1246_v5  ;;  %s1374_s9 = scalar_lea.vmem %s1539_s0, %s1072_s4  ;;  %s1442_s4 = scalar_lea.vmem %s1542_s3, %s988_s28 }
  0x10   : > { %1111 = vmatprep.subr.bf16.mxu0 %v1247_v6  ;;  %1220 = vmatprep.subr.bf16.mxu1 %v1247_v6  ;;  %v1259_v11 = vld [vmem:[%s1374_s9 + $0x4] ss:$8 sps:$4 sm:$0xff]   ;;  %v1257_v18 = vld [vmem:[%s1374_s9] ss:$8 sps:$4 sm:$0xff]   ;;  %v1263_v20 = vld [vmem:[%s1374_s9 + $0x14] ss:$8 sps:$4 sm:$0xff]  }
  0x11   : > { %v1262_v12 = vld [vmem:[%s1374_s9 + $0x84] ss:$8 sps:$4 sm:$0xff]   ;;  %537 = vmatprep.mubr.bf16.mxu0 %v1259_v11  ;;  %v1260_v19 = vld [vmem:[%s1374_s9 + $0x80] ss:$8 sps:$4 sm:$0xff]   ;;  %v1265_v21 = vld [vmem:[%s1374_s9 + $0x94] ss:$8 sps:$4 sm:$0xff]  }
  0x12   : > { %601 = vmatprep.mubr.bf16.mxu1 %v1262_v12  ;;  %v1267_v22 = vld [vmem:[%s1374_s9 + $0x10] ss:$8 sps:$4 sm:$0xff]   ;;  %v1269_v24 = vld [vmem:[%s1374_s9 + $0x24] ss:$8 sps:$4 sm:$0xff]   ;;  %v1273_v26 = vld [vmem:[%s1374_s9 + $0x20] ss:$8 sps:$4 sm:$0xff]  }
  0x13   : > { %1112 = vmatpush3.bf16.msra.mxu0 %v1248_v7  ;;  %1228 = vmatpush3.bf16.msra.mxu1 %v1248_v7  ;;  %v1268_v23 = vld [vmem:[%s1374_s9 + $0x90] ss:$8 sps:$4 sm:$0xff]   ;;  %v1271_v25 = vld [vmem:[%s1374_s9 + $0xa4] ss:$8 sps:$4 sm:$0xff]   ;;  %v1274_v27 = vld [vmem:[%s1374_s9 + $0xa0] ss:$8 sps:$4 sm:$0xff]  }
  0x14   : > { %1113 = vmatprep.subr.bf16.mxu0 %v1249_v8  ;;  %1221 = vmatprep.subr.bf16.mxu1 %v1249_v8  ;;  %v1275_v28 = vld [vmem:[%s1374_s9 + $0x34] ss:$8 sps:$4 sm:$0xff]   ;;  %v1279_v30 = vld [vmem:[%s1374_s9 + $0x30] ss:$8 sps:$4 sm:$0xff]   ;;  %v1281_v32 = vld [vmem:[%s1374_s9 + $0x44] ss:$8 sps:$4 sm:$0xff]  }
  0x15   : > { %v1277_v29 = vld [vmem:[%s1374_s9 + $0xb4] ss:$8 sps:$4 sm:$0xff]   ;;  %v1280_v31 = vld [vmem:[%s1374_s9 + $0xb0] ss:$8 sps:$4 sm:$0xff]   ;;  %v1283_v33 = vld [vmem:[%s1374_s9 + $0xc4] ss:$8 sps:$4 sm:$0xff]  }
  0x16   : > { %v1285_v34 = vld [vmem:[%s1374_s9 + $0x40] ss:$8 sps:$4 sm:$0xff]   ;;  %v1287_v36 = vld [vmem:[%s1374_s9 + $0x54] ss:$8 sps:$4 sm:$0xff]   ;;  %v1291_v38 = vld [vmem:[%s1374_s9 + $0x50] ss:$8 sps:$4 sm:$0xff]  }
  0x17   : > { %1114 = vmatpush3.bf16.msra.mxu0 %v1250_v9  ;;  %1229 = vmatpush3.bf16.msra.mxu1 %v1250_v9  ;;  %v1286_v35 = vld [vmem:[%s1374_s9 + $0xc0] ss:$8 sps:$4 sm:$0xff]   ;;  %v1289_v37 = vld [vmem:[%s1374_s9 + $0xd4] ss:$8 sps:$4 sm:$0xff]   ;;  %v1292_v39 = vld [vmem:[%s1374_s9 + $0xd0] ss:$8 sps:$4 sm:$0xff]  }
  0x18   : > { %1115 = vmatprep.subr.bf16.mxu0 %v1251_v10  ;;  %1222 = vmatprep.subr.bf16.mxu1 %v1251_v10  ;;  %v1293_v40 = vld [vmem:[%s1374_s9 + $0x64] ss:$8 sps:$4 sm:$0xff]   ;;  %v1297_v42 = vld [vmem:[%s1374_s9 + $0x60] ss:$8 sps:$4 sm:$0xff]   ;;  %v1299_v44 = vld [vmem:[%s1374_s9 + $0x74] ss:$8 sps:$4 sm:$0xff]  }
  0x19   : > { %v1295_v41 = vld [vmem:[%s1374_s9 + $0xe4] ss:$8 sps:$4 sm:$0xff]   ;;  %v1298_v43 = vld [vmem:[%s1374_s9 + $0xe0] ss:$8 sps:$4 sm:$0xff]   ;;  %v1301_v45 = vld [vmem:[%s1374_s9 + $0xf4] ss:$8 sps:$4 sm:$0xff]  }
  0x1a   : > { %v1303_v46 = vld [vmem:[%s1374_s9 + $0x70] ss:$8 sps:$4 sm:$0xff]  }
  0x1b   : > { %1116 = vmatpush3.bf16.msra.mxu0 %v1252_v13  ;;  %1230 = vmatpush3.bf16.msra.mxu1 %v1252_v13  ;;  %v1304_v47 = vld [vmem:[%s1374_s9 + $0xf0] ss:$8 sps:$4 sm:$0xff]  }
  0x1c   : > { %1117 = vmatprep.subr.bf16.mxu0 %v1253_v14  ;;  %1223 = vmatprep.subr.bf16.mxu1 %v1253_v14 }
  0x1f   : > { %1118 = vmatpush3.bf16.msra.mxu0 %v1254_v15  ;;  %1231 = vmatpush3.bf16.msra.mxu1 %v1254_v15 }
  0x20   : > { %1119 = vmatprep.subr.bf16.mxu0 %v1255_v16  ;;  %1224 = vmatprep.subr.bf16.mxu1 %v1255_v16 }
  0x23   : > { %1120 = vmatpush3.bf16.msra.mxu0 %v1256_v17  ;;  %1232 = vmatpush3.bf16.msra.mxu1 %v1256_v17 }
  0x26   : > { %538 = vmatmul.mubr.bf16.vlgmr.msra.gmra.mrb[0].mxu0 %v1257_v18  ;;  %602 = vmatmul.mubr.bf16.vlgmr.msra.gmra.mrb[0].mxu1 %v1260_v19 }
  0x27   : > { %545 = vmatprep.mubr.bf16.mxu0 %v1263_v20  ;;  %609 = vmatprep.mubr.bf16.mxu1 %v1265_v21 }
  0x2e   : > { %546 = vmatmul.mubr.bf16.gmra.mrb[4].mxu0 %v1267_v22  ;;  %610 = vmatmul.mubr.bf16.gmra.mrb[4].mxu1 %v1268_v23 }
  0x2f   : > { %553 = vmatprep.mubr.bf16.mxu0 %v1269_v24  ;;  %617 = vmatprep.mubr.bf16.mxu1 %v1271_v25 }
  0x36   : > { %554 = vmatmul.mubr.bf16.gmra.mrb[8].mxu0 %v1273_v26  ;;  %618 = vmatmul.mubr.bf16.gmra.mrb[8].mxu1 %v1274_v27 }
  0x37   : > { %561 = vmatprep.mubr.bf16.mxu0 %v1275_v28  ;;  %625 = vmatprep.mubr.bf16.mxu1 %v1277_v29 }
  0x3e   : > { %562 = vmatmul.mubr.bf16.gmra.mrb[12].mxu0 %v1279_v30  ;;  %626 = vmatmul.mubr.bf16.gmra.mrb[12].mxu1 %v1280_v31 }
  0x3f   : > { %569 = vmatprep.mubr.bf16.mxu0 %v1281_v32  ;;  %633 = vmatprep.mubr.bf16.mxu1 %v1283_v33 }
  0x46   : > { %570 = vmatmul.mubr.bf16.gmra.mrb[16].mxu0 %v1285_v34  ;;  %634 = vmatmul.mubr.bf16.gmra.mrb[16].mxu1 %v1286_v35 }
  0x47   : > { %577 = vmatprep.mubr.bf16.mxu0 %v1287_v36  ;;  %641 = vmatprep.mubr.bf16.mxu1 %v1289_v37 }
  0x4e   : > { %578 = vmatmul.mubr.bf16.gmra.mrb[20].mxu0 %v1291_v38  ;;  %642 = vmatmul.mubr.bf16.gmra.mrb[20].mxu1 %v1292_v39 }
  0x4f   : > { %585 = vmatprep.mubr.bf16.mxu0 %v1293_v40  ;;  %649 = vmatprep.mubr.bf16.mxu1 %v1295_v41 }
  0x56   : > { %586 = vmatmul.mubr.bf16.gmra.mrb[24].mxu0 %v1297_v42  ;;  %650 = vmatmul.mubr.bf16.gmra.mrb[24].mxu1 %v1298_v43 }
  0x57   : > { %593 = vmatprep.mubr.bf16.mxu0 %v1299_v44  ;;  %657 = vmatprep.mubr.bf16.mxu1 %v1301_v45 }
  0x5e   : > { %594 = vmatmul.mubr.bf16.gmra.mrb[28].mxu0 %v1303_v46  ;;  %658 = vmatmul.mubr.bf16.gmra.mrb[28].mxu1 %v1304_v47 }
  0xf9   : > { %v1121_v48 = vpop.f32.mrb[0].mxu0  ;;  %v1169_v49 = vpop.f32.mrb[0].mxu1 }
  0xfa   : > { %v1122_v51 = vpop.f32.mrb[1].mxu0  ;;  %v1170_v52 = vpop.f32.mrb[1].mxu1 }
  0xfb   : > { %v1123_v53 = vadd.f32 %v1122_v51, %v1121_v48  ;;  %v1171_v54 = vadd.f32 %v1170_v52, %v1169_v49  ;;  %v1124_v55 = vpop.f32.mrb[2].mxu0  ;;  %v1172_v56 = vpop.f32.mrb[2].mxu1 }
  0xfc   : > { %v1125_v57 = vpop.f32.mrb[3].mxu0  ;;  %v1173_v58 = vpop.f32.mrb[3].mxu1 }
  0xfd   : > { %v540_v59 = vadd.f32 %v1123_v53, %v1432_v50  ;;  %v604_v60 = vadd.f32 %v1171_v54, %v1432_v50  ;;  %v1126_v61 = vadd.f32 %v1125_v57, %v1124_v55  ;;  %v1174_v62 = vadd.f32 %v1173_v58, %v1172_v56 }
  0xff   : > { %vm666_vm0 = vcmp.ge.f32.partialorder %v540_v59, 0.0  ;;  %v698_v63 = vmul.f32 0.01, %v540_v59  ;;  %vm682_vm1 = vcmp.ge.f32.partialorder %v604_v60, 0.0  ;;  %v714_v0 = vmul.f32 0.01, %v604_v60 }
 0x100   : > { %v543_v1 = vadd.f32 %v1126_v61, %v1432_v50  ;;  %v607_v2 = vadd.f32 %v1174_v62, %v1432_v50 }
 0x101   : > { %v730_v3 = vsel %vm666_vm0, %v540_v59, %v698_v63  ;;  %v746_v4 = vsel %vm682_vm1, %v604_v60, %v714_v0  ;;  %v1127_v5 = vpop.f32.mrb[4].mxu0  ;;  %v1175_v6 = vpop.f32.mrb[4].mxu1 }
 0x102   : > { %v1073_v7 = vpack.c.bf16 %v730_v3, %v730_v3  ;;  %v1089_v8 = vpack.c.bf16 %v746_v4, %v746_v4  ;;  %vm667_vm3 = vcmp.ge.f32.partialorder %v543_v1, 0.0  ;;  %v699_v9 = vmul.f32 0.01, %v543_v1  ;;  %v1128_v10 = vpop.f32.mrb[5].mxu0  ;;  %v1176_v11 = vpop.f32.mrb[5].mxu1 }
 0x103   : > { %vm683_vm4 = vcmp.ge.f32.partialorder %v607_v2, 0.0  ;;  %v715_v12 = vmul.f32 0.01, %v607_v2  ;;  %v1129_v13 = vadd.f32 %v1128_v10, %v1127_v5  ;;  %v1177_v14 = vadd.f32 %v1176_v11, %v1175_v6  ;;  %v1130_v15 = vpop.f32.mrb[6].mxu0  ;;  %v1178_v16 = vpop.f32.mrb[6].mxu1 }
 0x104   : > { %891 = vst.msk [vmem:[%s1442_s4] sm:$0xf] %vm890_vm2, %v1073_v7  ;;  %907 = vst.msk [vmem:[%s1442_s4 + $0x40] sm:$0xf] %vm890_vm2, %v1089_v8  ;;  %v731_v17 = vsel %vm667_vm3, %v543_v1, %v699_v9  ;;  %v1131_v18 = vpop.f32.mrb[7].mxu0  ;;  %v1179_v19 = vpop.f32.mrb[7].mxu1 }
 0x105   : > { %v1074_v20 = vpack.c.bf16 %v731_v17, %v731_v17  ;;  %v747_v21 = vsel %vm683_vm4, %v607_v2, %v715_v12  ;;  %v548_v22 = vadd.f32 %v1129_v13, %v1432_v50  ;;  %v612_v23 = vadd.f32 %v1177_v14, %v1432_v50 }
 0x106   : > { %v1090_v24 = vpack.c.bf16 %v747_v21, %v747_v21  ;;  %v1132_v25 = vadd.f32 %v1131_v18, %v1130_v15  ;;  %v1180_v26 = vadd.f32 %v1179_v19, %v1178_v16 }
 0x107   : > { %892 = vst.msk [vmem:[%s1442_s4 + $0x4] sm:$0xf] %vm890_vm2, %v1074_v20  ;;  %vm668_vm5 = vcmp.ge.f32.partialorder %v548_v22, 0.0  ;;  %v700_v27 = vmul.f32 0.01, %v548_v22  ;;  %vm684_vm6 = vcmp.ge.f32.partialorder %v612_v23, 0.0 }
 0x108   : > { %v716_v28 = vmul.f32 0.01, %v612_v23  ;;  %908 = vst.msk [vmem:[%s1442_s4 + $0x44] sm:$0xf] %vm890_vm2, %v1090_v24  ;;  %v551_v29 = vadd.f32 %v1132_v25, %v1432_v50  ;;  %v615_v30 = vadd.f32 %v1180_v26, %v1432_v50 }
 0x109   : > { %v732_v31 = vsel %vm668_vm5, %v548_v22, %v700_v27  ;;  %v1133_v33 = vpop.f32.mrb[8].mxu0  ;;  %v1181_v34 = vpop.f32.mrb[8].mxu1 }
 0x10a   : > { %v748_v32 = vsel %vm684_vm6, %v612_v23, %v716_v28  ;;  %v1075_v35 = vpack.c.bf16 %v732_v31, %v732_v31  ;;  %vm669_vm7 = vcmp.ge.f32.partialorder %v551_v29, 0.0  ;;  %v701_v37 = vmul.f32 0.01, %v551_v29  ;;  %v1134_v38 = vpop.f32.mrb[9].mxu0  ;;  %v1182_v39 = vpop.f32.mrb[9].mxu1 }
 0x10b   : > { %v1091_v36 = vpack.c.bf16 %v748_v32, %v748_v32  ;;  %vm685_vm8 = vcmp.ge.f32.partialorder %v615_v30, 0.0  ;;  %v717_v40 = vmul.f32 0.01, %v615_v30  ;;  %v1135_v41 = vadd.f32 %v1134_v38, %v1133_v33  ;;  %v1136_v43 = vpop.f32.mrb[10].mxu0  ;;  %v1184_v44 = vpop.f32.mrb[10].mxu1 }
 0x10c   : > { %v1183_v42 = vadd.f32 %v1182_v39, %v1181_v34  ;;  %893 = vst.msk [vmem:[%s1442_s4 + $0x8] sm:$0xf] %vm890_vm2, %v1075_v35  ;;  %v733_v45 = vsel %vm669_vm7, %v551_v29, %v701_v37  ;;  %v1137_v46 = vpop.f32.mrb[11].mxu0  ;;  %v1185_v47 = vpop.f32.mrb[11].mxu1 }
 0x10d   : > { %909 = vst.msk [vmem:[%s1442_s4 + $0x48] sm:$0xf] %vm890_vm2, %v1091_v36  ;;  %v1076_v48 = vpack.c.bf16 %v733_v45, %v733_v45  ;;  %v749_v49 = vsel %vm685_vm8, %v615_v30, %v717_v40  ;;  %v556_v51 = vadd.f32 %v1135_v41, %v1432_v50  ;;  %v1138_v54 = vadd.f32 %v1137_v46, %v1136_v43 }
 0x10e   : > { %v620_v52 = vadd.f32 %v1183_v42, %v1432_v50  ;;  %v1092_v53 = vpack.c.bf16 %v749_v49, %v749_v49  ;;  %v1186_v55 = vadd.f32 %v1185_v47, %v1184_v44 }
 0x10f   : > { %894 = vst.msk [vmem:[%s1442_s4 + $0xc] sm:$0xf] %vm890_vm2, %v1076_v48  ;;  %vm670_vm9 = vcmp.ge.f32.partialorder %v556_v51, 0.0  ;;  %v702_v56 = vmul.f32 0.01, %v556_v51  ;;  %v559_v58 = vadd.f32 %v1138_v54, %v1432_v50 }
 0x110   : > { %vm686_vm10 = vcmp.ge.f32.partialorder %v620_v52, 0.0  ;;  %v718_v57 = vmul.f32 0.01, %v620_v52  ;;  %910 = vst.msk [vmem:[%s1442_s4 + $0x4c] sm:$0xf] %vm890_vm2, %v1092_v53  ;;  %v623_v59 = vadd.f32 %v1186_v55, %v1432_v50 }
 0x111   : > { %v734_v60 = vsel %vm670_vm9, %v556_v51, %v702_v56  ;;  %v1139_v62 = vpop.f32.mrb[12].mxu0  ;;  %v1187_v63 = vpop.f32.mrb[12].mxu1  ;;  %vm671_vm11 = vcmp.ge.f32.partialorder %v559_v58, 0.0  ;;  %v703_v2 = vmul.f32 0.01, %v559_v58 }
 0x112   : > { %v750_v61 = vsel %vm686_vm10, %v620_v52, %v718_v57  ;;  %v1077_v0 = vpack.c.bf16 %v734_v60, %v734_v60  ;;  %v1140_v3 = vpop.f32.mrb[13].mxu0  ;;  %v1188_v4 = vpop.f32.mrb[13].mxu1  ;;  %vm687_vm12 = vcmp.ge.f32.partialorder %v623_v59, 0.0  ;;  %v719_v5 = vmul.f32 0.01, %v623_v59 }
 0x113   : > { %v1093_v1 = vpack.c.bf16 %v750_v61, %v750_v61  ;;  %v1141_v6 = vadd.f32 %v1140_v3, %v1139_v62  ;;  %v1189_v7 = vadd.f32 %v1188_v4, %v1187_v63  ;;  %v1142_v8 = vpop.f32.mrb[14].mxu0  ;;  %v1190_v9 = vpop.f32.mrb[14].mxu1  ;;  %v735_v10 = vsel %vm671_vm11, %v559_v58, %v703_v2 }
 0x114   : > { %895 = vst.msk [vmem:[%s1442_s4 + $0x10] sm:$0xf] %vm890_vm2, %v1077_v0  ;;  %v1143_v11 = vpop.f32.mrb[15].mxu0  ;;  %v1191_v12 = vpop.f32.mrb[15].mxu1  ;;  %v1078_v13 = vpack.c.bf16 %v735_v10, %v735_v10  ;;  %v751_v14 = vsel %vm687_vm12, %v623_v59, %v719_v5 }
 0x115   : > { %911 = vst.msk [vmem:[%s1442_s4 + $0x50] sm:$0xf] %vm890_vm2, %v1093_v1  ;;  %v564_v15 = vadd.f32 %v1141_v6, %v1432_v50  ;;  %v628_v16 = vadd.f32 %v1189_v7, %v1432_v50  ;;  %v1094_v17 = vpack.c.bf16 %v751_v14, %v751_v14  ;;  %v1144_v18 = vadd.f32 %v1143_v11, %v1142_v8 }
 0x116   : > { %v1192_v19 = vadd.f32 %v1191_v12, %v1190_v9  ;;  %896 = vst.msk [vmem:[%s1442_s4 + $0x14] sm:$0xf] %vm890_vm2, %v1078_v13 }
 0x117   : > { %vm672_vm13 = vcmp.ge.f32.partialorder %v564_v15, 0.0  ;;  %v704_v20 = vmul.f32 0.01, %v564_v15  ;;  %vm688_vm14 = vcmp.ge.f32.partialorder %v628_v16, 0.0  ;;  %v720_v21 = vmul.f32 0.01, %v628_v16 }
 0x118   : > { %912 = vst.msk [vmem:[%s1442_s4 + $0x54] sm:$0xf] %vm890_vm2, %v1094_v17  ;;  %v567_v22 = vadd.f32 %v1144_v18, %v1432_v50  ;;  %v631_v23 = vadd.f32 %v1192_v19, %v1432_v50 }
 0x119   : > { %v736_v24 = vsel %vm672_vm13, %v564_v15, %v704_v20  ;;  %v752_v25 = vsel %vm688_vm14, %v628_v16, %v720_v21  ;;  %v1145_v26 = vpop.f32.mrb[16].mxu0  ;;  %v1193_v27 = vpop.f32.mrb[16].mxu1 }
 0x11a   : > { %v1079_v28 = vpack.c.bf16 %v736_v24, %v736_v24  ;;  %v1095_v29 = vpack.c.bf16 %v752_v25, %v752_v25  ;;  %vm673_vm15 = vcmp.ge.f32.partialorder %v567_v22, 0.0  ;;  %v705_v30 = vmul.f32 0.01, %v567_v22  ;;  %v1146_v31 = vpop.f32.mrb[17].mxu0  ;;  %v1194_v32 = vpop.f32.mrb[17].mxu1 }
 0x11b   : > { %vm689_vm0 = vcmp.ge.f32.partialorder %v631_v23, 0.0  ;;  %v721_v33 = vmul.f32 0.01, %v631_v23  ;;  %v1147_v34 = vadd.f32 %v1146_v31, %v1145_v26  ;;  %v1195_v35 = vadd.f32 %v1194_v32, %v1193_v27  ;;  %v1148_v36 = vpop.f32.mrb[18].mxu0  ;;  %v1196_v37 = vpop.f32.mrb[18].mxu1 }
 0x11c   : > { %897 = vst.msk [vmem:[%s1442_s4 + $0x18] sm:$0xf] %vm890_vm2, %v1079_v28  ;;  %913 = vst.msk [vmem:[%s1442_s4 + $0x58] sm:$0xf] %vm890_vm2, %v1095_v29  ;;  %v737_v38 = vsel %vm673_vm15, %v567_v22, %v705_v30  ;;  %v1149_v39 = vpop.f32.mrb[19].mxu0  ;;  %v1197_v40 = vpop.f32.mrb[19].mxu1 }
 0x11d   : > { %v1080_v41 = vpack.c.bf16 %v737_v38, %v737_v38  ;;  %v753_v42 = vsel %vm689_vm0, %v631_v23, %v721_v33  ;;  %v572_v43 = vadd.f32 %v1147_v34, %v1432_v50  ;;  %v636_v44 = vadd.f32 %v1195_v35, %v1432_v50 }
 0x11e   : > { %v1096_v45 = vpack.c.bf16 %v753_v42, %v753_v42  ;;  %v1150_v46 = vadd.f32 %v1149_v39, %v1148_v36  ;;  %v1198_v47 = vadd.f32 %v1197_v40, %v1196_v37 }
 0x11f   : > { %898 = vst.msk [vmem:[%s1442_s4 + $0x1c] sm:$0xf] %vm890_vm2, %v1080_v41  ;;  %vm674_vm1 = vcmp.ge.f32.partialorder %v572_v43, 0.0  ;;  %v706_v48 = vmul.f32 0.01, %v572_v43  ;;  %vm690_vm3 = vcmp.ge.f32.partialorder %v636_v44, 0.0 }
 0x120   : > { %v722_v49 = vmul.f32 0.01, %v636_v44  ;;  %914 = vst.msk [vmem:[%s1442_s4 + $0x5c] sm:$0xf] %vm890_vm2, %v1096_v45  ;;  %v575_v51 = vadd.f32 %v1150_v46, %v1432_v50  ;;  %v639_v52 = vadd.f32 %v1198_v47, %v1432_v50 }
 0x121   : > { %v738_v53 = vsel %vm674_vm1, %v572_v43, %v706_v48  ;;  %v1151_v55 = vpop.f32.mrb[20].mxu0  ;;  %v1199_v56 = vpop.f32.mrb[20].mxu1 }
 0x122   : > { %v754_v54 = vsel %vm690_vm3, %v636_v44, %v722_v49  ;;  %v1081_v57 = vpack.c.bf16 %v738_v53, %v738_v53  ;;  %vm675_vm4 = vcmp.ge.f32.partialorder %v575_v51, 0.0  ;;  %v707_v59 = vmul.f32 0.01, %v575_v51  ;;  %v1152_v60 = vpop.f32.mrb[21].mxu0  ;;  %v1200_v61 = vpop.f32.mrb[21].mxu1 }
 0x123   : > { %v1097_v58 = vpack.c.bf16 %v754_v54, %v754_v54  ;;  %vm691_vm5 = vcmp.ge.f32.partialorder %v639_v52, 0.0  ;;  %v723_v62 = vmul.f32 0.01, %v639_v52  ;;  %v1153_v63 = vadd.f32 %v1152_v60, %v1151_v55  ;;  %v1154_v1 = vpop.f32.mrb[22].mxu0  ;;  %v1202_v2 = vpop.f32.mrb[22].mxu1 }
 0x124   : > { %v1201_v0 = vadd.f32 %v1200_v61, %v1199_v56  ;;  %899 = vst.msk [vmem:[%s1442_s4 + $0x20] sm:$0xf] %vm890_vm2, %v1081_v57  ;;  %v739_v3 = vsel %vm675_vm4, %v575_v51, %v707_v59  ;;  %v1155_v4 = vpop.f32.mrb[23].mxu0  ;;  %v1203_v5 = vpop.f32.mrb[23].mxu1 }
 0x125   : > { %915 = vst.msk [vmem:[%s1442_s4 + $0x60] sm:$0xf] %vm890_vm2, %v1097_v58  ;;  %v1082_v6 = vpack.c.bf16 %v739_v3, %v739_v3  ;;  %v755_v7 = vsel %vm691_vm5, %v639_v52, %v723_v62  ;;  %v580_v8 = vadd.f32 %v1153_v63, %v1432_v50  ;;  %v1156_v11 = vadd.f32 %v1155_v4, %v1154_v1 }
 0x126   : > { %v644_v9 = vadd.f32 %v1201_v0, %v1432_v50  ;;  %v1098_v10 = vpack.c.bf16 %v755_v7, %v755_v7  ;;  %v1204_v12 = vadd.f32 %v1203_v5, %v1202_v2 }
 0x127   : > { %900 = vst.msk [vmem:[%s1442_s4 + $0x24] sm:$0xf] %vm890_vm2, %v1082_v6  ;;  %vm676_vm6 = vcmp.ge.f32.partialorder %v580_v8, 0.0  ;;  %v708_v13 = vmul.f32 0.01, %v580_v8  ;;  %v583_v15 = vadd.f32 %v1156_v11, %v1432_v50 }
 0x128   : > { %vm692_vm7 = vcmp.ge.f32.partialorder %v644_v9, 0.0  ;;  %v724_v14 = vmul.f32 0.01, %v644_v9  ;;  %916 = vst.msk [vmem:[%s1442_s4 + $0x64] sm:$0xf] %vm890_vm2, %v1098_v10  ;;  %v647_v16 = vadd.f32 %v1204_v12, %v1432_v50 }
 0x129   : > { %v740_v17 = vsel %vm676_vm6, %v580_v8, %v708_v13  ;;  %v1157_v19 = vpop.f32.mrb[24].mxu0  ;;  %v1205_v20 = vpop.f32.mrb[24].mxu1  ;;  %vm677_vm8 = vcmp.ge.f32.partialorder %v583_v15, 0.0  ;;  %v709_v23 = vmul.f32 0.01, %v583_v15 }
 0x12a   : > { %v756_v18 = vsel %vm692_vm7, %v644_v9, %v724_v14  ;;  %v1083_v21 = vpack.c.bf16 %v740_v17, %v740_v17  ;;  %v1158_v24 = vpop.f32.mrb[25].mxu0  ;;  %v1206_v25 = vpop.f32.mrb[25].mxu1  ;;  %vm693_vm9 = vcmp.ge.f32.partialorder %v647_v16, 0.0  ;;  %v725_v26 = vmul.f32 0.01, %v647_v16 }
 0x12b   : > { %v1099_v22 = vpack.c.bf16 %v756_v18, %v756_v18  ;;  %v1159_v27 = vadd.f32 %v1158_v24, %v1157_v19  ;;  %v1207_v28 = vadd.f32 %v1206_v25, %v1205_v20  ;;  %v1160_v29 = vpop.f32.mrb[26].mxu0  ;;  %v1208_v30 = vpop.f32.mrb[26].mxu1  ;;  %v741_v31 = vsel %vm677_vm8, %v583_v15, %v709_v23 }
 0x12c   : > { %901 = vst.msk [vmem:[%s1442_s4 + $0x28] sm:$0xf] %vm890_vm2, %v1083_v21  ;;  %v1161_v32 = vpop.f32.mrb[27].mxu0  ;;  %v1209_v33 = vpop.f32.mrb[27].mxu1  ;;  %v1084_v34 = vpack.c.bf16 %v741_v31, %v741_v31  ;;  %v757_v35 = vsel %vm693_vm9, %v647_v16, %v725_v26 }
 0x12d   : > { %917 = vst.msk [vmem:[%s1442_s4 + $0x68] sm:$0xf] %vm890_vm2, %v1099_v22  ;;  %v588_v36 = vadd.f32 %v1159_v27, %v1432_v50  ;;  %v652_v37 = vadd.f32 %v1207_v28, %v1432_v50  ;;  %v1100_v38 = vpack.c.bf16 %v757_v35, %v757_v35  ;;  %v1162_v39 = vadd.f32 %v1161_v32, %v1160_v29 }
 0x12e   : > { %v1210_v40 = vadd.f32 %v1209_v33, %v1208_v30  ;;  %902 = vst.msk [vmem:[%s1442_s4 + $0x2c] sm:$0xf] %vm890_vm2, %v1084_v34 }
 0x12f   : > { %vm678_vm10 = vcmp.ge.f32.partialorder %v588_v36, 0.0  ;;  %v710_v41 = vmul.f32 0.01, %v588_v36  ;;  %vm694_vm11 = vcmp.ge.f32.partialorder %v652_v37, 0.0  ;;  %v726_v42 = vmul.f32 0.01, %v652_v37 }
 0x130   : > { %918 = vst.msk [vmem:[%s1442_s4 + $0x6c] sm:$0xf] %vm890_vm2, %v1100_v38  ;;  %v591_v43 = vadd.f32 %v1162_v39, %v1432_v50  ;;  %v655_v44 = vadd.f32 %v1210_v40, %v1432_v50 }
 0x131   : > { %v742_v45 = vsel %vm678_vm10, %v588_v36, %v710_v41  ;;  %v758_v46 = vsel %vm694_vm11, %v652_v37, %v726_v42  ;;  %v1163_v47 = vpop.f32.mrb[28].mxu0  ;;  %v1211_v48 = vpop.f32.mrb[28].mxu1 }
 0x132   : > { %v1085_v49 = vpack.c.bf16 %v742_v45, %v742_v45  ;;  %v1101_v51 = vpack.c.bf16 %v758_v46, %v758_v46  ;;  %vm679_vm12 = vcmp.ge.f32.partialorder %v591_v43, 0.0  ;;  %v711_v52 = vmul.f32 0.01, %v591_v43  ;;  %v1164_v53 = vpop.f32.mrb[29].mxu0  ;;  %v1212_v54 = vpop.f32.mrb[29].mxu1 }
 0x133   : > { %vm695_vm13 = vcmp.ge.f32.partialorder %v655_v44, 0.0  ;;  %v727_v55 = vmul.f32 0.01, %v655_v44  ;;  %v1165_v56 = vadd.f32 %v1164_v53, %v1163_v47  ;;  %v1213_v57 = vadd.f32 %v1212_v54, %v1211_v48  ;;  %v1166_v58 = vpop.f32.mrb[30].mxu0  ;;  %v1214_v59 = vpop.f32.mrb[30].mxu1 }
 0x134   : > { %903 = vst.msk [vmem:[%s1442_s4 + $0x30] sm:$0xf] %vm890_vm2, %v1085_v49  ;;  %919 = vst.msk [vmem:[%s1442_s4 + $0x70] sm:$0xf] %vm890_vm2, %v1101_v51  ;;  %v743_v60 = vsel %vm679_vm12, %v591_v43, %v711_v52  ;;  %v1167_v61 = vpop.f32.mrb[31].mxu0  ;;  %v1215_v62 = vpop.f32.mrb[31].mxu1 }
 0x135   : > { %v1086_v63 = vpack.c.bf16 %v743_v60, %v743_v60  ;;  %v759_v0 = vsel %vm695_vm13, %v655_v44, %v727_v55  ;;  %v596_v1 = vadd.f32 %v1165_v56, %v1432_v50  ;;  %v660_v2 = vadd.f32 %v1213_v57, %v1432_v50 }
 0x136   : > { %v1102_v3 = vpack.c.bf16 %v759_v0, %v759_v0  ;;  %v1168_v4 = vadd.f32 %v1167_v61, %v1166_v58  ;;  %v1216_v5 = vadd.f32 %v1215_v62, %v1214_v59 }
 0x137   : > { %904 = vst.msk [vmem:[%s1442_s4 + $0x34] sm:$0xf] %vm890_vm2, %v1086_v63  ;;  %vm680_vm14 = vcmp.ge.f32.partialorder %v596_v1, 0.0  ;;  %v712_v6 = vmul.f32 0.01, %v596_v1  ;;  %vm696_vm15 = vcmp.ge.f32.partialorder %v660_v2, 0.0 }
 0x138   : > { %v728_v7 = vmul.f32 0.01, %v660_v2  ;;  %920 = vst.msk [vmem:[%s1442_s4 + $0x74] sm:$0xf] %vm890_vm2, %v1102_v3  ;;  %v599_v8 = vadd.f32 %v1168_v4, %v1432_v50  ;;  %v663_v9 = vadd.f32 %v1216_v5, %v1432_v50 }
 0x139   : > { %v744_v10 = vsel %vm680_vm14, %v596_v1, %v712_v6 }
 0x13a   : > { %v760_v11 = vsel %vm696_vm15, %v660_v2, %v728_v7  ;;  %v1087_v12 = vpack.c.bf16 %v744_v10, %v744_v10  ;;  %vm681_vm0 = vcmp.ge.f32.partialorder %v599_v8, 0.0  ;;  %v713_v14 = vmul.f32 0.01, %v599_v8 }
 0x13b   : > { %v1103_v13 = vpack.c.bf16 %v760_v11, %v760_v11  ;;  %vm697_vm1 = vcmp.ge.f32.partialorder %v663_v9, 0.0  ;;  %v729_v15 = vmul.f32 0.01, %v663_v9 }
 0x13c   : > { %905 = vst.msk [vmem:[%s1442_s4 + $0x38] sm:$0xf] %vm890_vm2, %v1087_v12  ;;  %v745_v16 = vsel %vm681_vm0, %v599_v8, %v713_v14 }
 0x13d   : > { %921 = vst.msk [vmem:[%s1442_s4 + $0x78] sm:$0xf] %vm890_vm2, %v1103_v13  ;;  %v1088_v17 = vpack.c.bf16 %v745_v16, %v745_v16  ;;  %v761_v18 = vsel %vm697_vm1, %v663_v9, %v729_v15 }
 0x13e   : > { %v1104_v19 = vpack.c.bf16 %v761_v18, %v761_v18 }
 0x13f   : > { %906 = vst.msk [vmem:[%s1442_s4 + $0x3c] sm:$0xf] %vm890_vm2, %v1088_v17 }
 0x140   : > { %922 = vst.msk [vmem:[%s1442_s4 + $0x7c] sm:$0xf] %vm890_vm2, %v1104_v19 }
 0x141 PF: > { %s13_s12 = sadd.s32 1, %s1311_s12  }
 0x142   : > { %p10_p4 = scmp.ge.s32.totalorder %s13_s12, 4  }
 0x144   :  { %12 = sbr.rel (!%p10_p4) target bundleno = 1 (0x1), region = 62 }

// kernel: cnn_forward.10
= control target key start
LH: loop header
LB: loop body
LE: loop exit
PB: predicated region body
PF: predicated region fallthrough
CT: control target
= control target key end

     0   :  { %vm776_vm1 = vcmask 519168   ;;  %s1399_s1 = inlined_call_operand.vmem [shape: bf16[512,64], index: 1, kind: input, shape index: {}]   ;;  %s1400_s0 = inlined_call_operand.vmem [shape: bf16[128,512], index: 0, kind: input, shape index: {}]   ;;  %s1401_s2 = inlined_call_operand.vmem [shape: f32[1,64], index: 2, kind: input, shape index: {}]   ;;  %s1402_s3 = inlined_call_operand.vmem [shape: bf16[128,64], index: 3, kind: output, shape index: {}]  }
   0x1   :  { %v1022_v0 = vld [vmem:[%s1399_s1 + $0x40] sm:$0xff]   ;;  %v1026_v4 = vld [vmem:[%s1399_s1 + $0x48] sm:$0xff]   ;;  %v1030_v8 = vld [vmem:[%s1399_s1 + $0x50] sm:$0xff]  }
   0x2   :  { %v1023_v1 = vld [vmem:[%s1399_s1 + $0xc0] sm:$0xff]   ;;  %894 = vmatprep.subr.bf16.mxu0 %v1022_v0  ;;  %v1027_v5 = vld [vmem:[%s1399_s1 + $0xc8] sm:$0xff]   ;;  %v1031_v9 = vld [vmem:[%s1399_s1 + $0xd0] sm:$0xff]  }
   0x3   :  { %v1024_v2 = vld [vmem:[%s1399_s1] sm:$0xff]   ;;  %958 = vmatprep.subr.bf16.mxu1 %v1023_v1  ;;  %v1028_v6 = vld [vmem:[%s1399_s1 + $0x8] sm:$0xff]   ;;  %v1032_v10 = vld [vmem:[%s1399_s1 + $0x10] sm:$0xff]  }
   0x4   :  { %v1025_v3 = vld [vmem:[%s1399_s1 + $0x80] sm:$0xff]   ;;  %895 = vmatpush3.bf16.msra.mxu0 %v1024_v2  ;;  %v1029_v7 = vld [vmem:[%s1399_s1 + $0x88] sm:$0xff]   ;;  %v1033_v11 = vld [vmem:[%s1399_s1 + $0x90] sm:$0xff]  }
   0x5   :  { %959 = vmatpush3.bf16.msra.mxu1 %v1025_v3  ;;  %896 = vmatprep.subr.bf16.mxu0 %v1026_v4  ;;  %v1034_v12 = vld [vmem:[%s1399_s1 + $0x58] sm:$0xff]   ;;  %v1038_v16 = vld [vmem:[%s1399_s1 + $0x60] sm:$0xff]   ;;  %v1042_v20 = vld [vmem:[%s1399_s1 + $0x68] sm:$0xff]  }
   0x6   :  { %960 = vmatprep.subr.bf16.mxu1 %v1027_v5  ;;  %v1035_v13 = vld [vmem:[%s1399_s1 + $0xd8] sm:$0xff]   ;;  %v1039_v17 = vld [vmem:[%s1399_s1 + $0xe0] sm:$0xff]   ;;  %v1043_v21 = vld [vmem:[%s1399_s1 + $0xe8] sm:$0xff]  }
   0x7   :  { %v1036_v14 = vld [vmem:[%s1399_s1 + $0x18] sm:$0xff]   ;;  %v1040_v18 = vld [vmem:[%s1399_s1 + $0x20] sm:$0xff]   ;;  %v1044_v22 = vld [vmem:[%s1399_s1 + $0x28] sm:$0xff]  }
   0x8   :  { %897 = vmatpush3.bf16.msra.mxu0 %v1028_v6  ;;  %v1037_v15 = vld [vmem:[%s1399_s1 + $0x98] sm:$0xff]   ;;  %v1041_v19 = vld [vmem:[%s1399_s1 + $0xa0] sm:$0xff]   ;;  %v1045_v23 = vld [vmem:[%s1399_s1 + $0xa8] sm:$0xff]  }
   0x9   :  { %961 = vmatpush3.bf16.msra.mxu1 %v1029_v7  ;;  %898 = vmatprep.subr.bf16.mxu0 %v1030_v8  ;;  %v1046_v24 = vld [vmem:[%s1399_s1 + $0x70] sm:$0xff]   ;;  %v1050_v28 = vld [vmem:[%s1399_s1 + $0x78] sm:$0xff]   ;;  %v1317_v2 = vld [vmem:[%s1401_s2] ss:$0 sm:$0xff] }
   0xa   :  { %962 = vmatprep.subr.bf16.mxu1 %v1031_v9  ;;  %v1047_v25 = vld [vmem:[%s1399_s1 + $0xf0] sm:$0xff]   ;;  %v1051_v29 = vld [vmem:[%s1399_s1 + $0xf8] sm:$0xff]  }
   0xb   :  { %v1048_v26 = vld [vmem:[%s1399_s1 + $0x30] sm:$0xff]   ;;  %v1052_v30 = vld [vmem:[%s1399_s1 + $0x38] sm:$0xff]  }
   0xc   :  { %899 = vmatpush3.bf16.msra.mxu0 %v1032_v10  ;;  %v1049_v27 = vld [vmem:[%s1399_s1 + $0xb0] sm:$0xff]   ;;  %v1053_v31 = vld [vmem:[%s1399_s1 + $0xb8] sm:$0xff]  }
   0xd   :  { %963 = vmatpush3.bf16.msra.mxu1 %v1033_v11  ;;  %900 = vmatprep.subr.bf16.mxu0 %v1034_v12  ;;  %v1054_v32 = vld [vmem:[%s1400_s0] ss:$16 sps:$4 sm:$0xff]   ;;  %v1056_v33 = vld [vmem:[%s1400_s0 + $0x4] ss:$16 sps:$4 sm:$0xff]   ;;  %v1057_v34 = vld [vmem:[%s1400_s0 + $0x8] ss:$16 sps:$4 sm:$0xff]  }
   0xe   :  { %964 = vmatprep.subr.bf16.mxu1 %v1035_v13  ;;  %v1059_v35 = vld [vmem:[%s1400_s0 + $0xc] ss:$16 sps:$4 sm:$0xff]   ;;  %502 = vmatprep.mubr.bf16.mxu0 %v1056_v33  ;;  %v1060_v36 = vld [vmem:[%s1400_s0 + $0x24] ss:$16 sps:$4 sm:$0xff]   ;;  %v1064_v38 = vld [vmem:[%s1400_s0 + $0x20] ss:$16 sps:$4 sm:$0xff]  }
   0xf   :  { %599 = vmatprep.mubr.bf16.mxu1 %v1059_v35  ;;  %v1062_v37 = vld [vmem:[%s1400_s0 + $0x2c] ss:$16 sps:$4 sm:$0xff]   ;;  %v1065_v39 = vld [vmem:[%s1400_s0 + $0x28] ss:$16 sps:$4 sm:$0xff]   ;;  %v1066_v40 = vld [vmem:[%s1400_s0 + $0x44] ss:$16 sps:$4 sm:$0xff]  }
  0x10   :  { %901 = vmatpush3.bf16.msra.mxu0 %v1036_v14  ;;  %v1068_v41 = vld [vmem:[%s1400_s0 + $0x4c] ss:$16 sps:$4 sm:$0xff]   ;;  %v1070_v42 = vld [vmem:[%s1400_s0 + $0x40] ss:$16 sps:$4 sm:$0xff]   ;;  %v1071_v43 = vld [vmem:[%s1400_s0 + $0x48] ss:$16 sps:$4 sm:$0xff]  }
  0x11   :  { %965 = vmatpush3.bf16.msra.mxu1 %v1037_v15  ;;  %902 = vmatprep.subr.bf16.mxu0 %v1038_v16  ;;  %v1072_v44 = vld [vmem:[%s1400_s0 + $0x64] ss:$16 sps:$4 sm:$0xff]   ;;  %v1074_v45 = vld [vmem:[%s1400_s0 + $0x6c] ss:$16 sps:$4 sm:$0xff]   ;;  %v1076_v46 = vld [vmem:[%s1400_s0 + $0x60] ss:$16 sps:$4 sm:$0xff]  }
  0x12   :  { %966 = vmatprep.subr.bf16.mxu1 %v1039_v17  ;;  %v1077_v47 = vld [vmem:[%s1400_s0 + $0x68] ss:$16 sps:$4 sm:$0xff]   ;;  %v1078_v48 = vld [vmem:[%s1400_s0 + $0x84] ss:$16 sps:$4 sm:$0xff]   ;;  %v1080_v49 = vld [vmem:[%s1400_s0 + $0x8c] ss:$16 sps:$4 sm:$0xff]  }
  0x13   :  { %v1082_v50 = vld [vmem:[%s1400_s0 + $0x80] ss:$16 sps:$4 sm:$0xff]   ;;  %v1083_v51 = vld [vmem:[%s1400_s0 + $0x88] ss:$16 sps:$4 sm:$0xff]   ;;  %v1084_v52 = vld [vmem:[%s1400_s0 + $0xa4] ss:$16 sps:$4 sm:$0xff]  }
  0x14   :  { %903 = vmatpush3.bf16.msra.mxu0 %v1040_v18  ;;  %v1086_v53 = vld [vmem:[%s1400_s0 + $0xac] ss:$16 sps:$4 sm:$0xff]   ;;  %v1088_v54 = vld [vmem:[%s1400_s0 + $0xa0] ss:$16 sps:$4 sm:$0xff]   ;;  %v1089_v55 = vld [vmem:[%s1400_s0 + $0xa8] ss:$16 sps:$4 sm:$0xff]  }
  0x15   :  { %967 = vmatpush3.bf16.msra.mxu1 %v1041_v19  ;;  %904 = vmatprep.subr.bf16.mxu0 %v1042_v20  ;;  %v1090_v56 = vld [vmem:[%s1400_s0 + $0xc4] ss:$16 sps:$4 sm:$0xff]   ;;  %v1092_v57 = vld [vmem:[%s1400_s0 + $0xcc] ss:$16 sps:$4 sm:$0xff]   ;;  %v1094_v58 = vld [vmem:[%s1400_s0 + $0xc0] ss:$16 sps:$4 sm:$0xff]  }
  0x16   :  { %968 = vmatprep.subr.bf16.mxu1 %v1043_v21  ;;  %v1095_v59 = vld [vmem:[%s1400_s0 + $0xc8] ss:$16 sps:$4 sm:$0xff]   ;;  %v1096_v60 = vld [vmem:[%s1400_s0 + $0xe4] ss:$16 sps:$4 sm:$0xff]   ;;  %v1098_v61 = vld [vmem:[%s1400_s0 + $0xec] ss:$16 sps:$4 sm:$0xff]  }
  0x17   :  { %v1100_v62 = vld [vmem:[%s1400_s0 + $0xe0] ss:$16 sps:$4 sm:$0xff]   ;;  %v1101_v63 = vld [vmem:[%s1400_s0 + $0xe8] ss:$16 sps:$4 sm:$0xff]  }
  0x18   :  { %905 = vmatpush3.bf16.msra.mxu0 %v1044_v22 }
  0x19   :  { %969 = vmatpush3.bf16.msra.mxu1 %v1045_v23  ;;  %906 = vmatprep.subr.bf16.mxu0 %v1046_v24 }
  0x1a   :  { %970 = vmatprep.subr.bf16.mxu1 %v1047_v25 }
  0x1c   :  { %907 = vmatpush3.bf16.msra.mxu0 %v1048_v26 }
  0x1d   :  { %971 = vmatpush3.bf16.msra.mxu1 %v1049_v27  ;;  %908 = vmatprep.subr.bf16.mxu0 %v1050_v28 }
  0x1e   :  { %972 = vmatprep.subr.bf16.mxu1 %v1051_v29 }
  0x20   :  { %909 = vmatpush3.bf16.msra.mxu0 %v1052_v30 }
  0x21   :  { %973 = vmatpush3.bf16.msra.mxu1 %v1053_v31 }
  0x23   :  { %503 = vmatmul.mubr.bf16.vlgmr.msra.gmra.mrb[0].mxu0 %v1054_v32 }
  0x24   :  { %600 = vmatmul.mubr.bf16.vlgmr.msra.gmra.mrb[0].mxu1 %v1057_v34  ;;  %510 = vmatprep.mubr.bf16.mxu0 %v1060_v36 }
  0x25   :  { %607 = vmatprep.mubr.bf16.mxu1 %v1062_v37 }
  0x2b   :  { %511 = vmatmul.mubr.bf16.gmra.mrb[4].mxu0 %v1064_v38 }
  0x2c   :  { %608 = vmatmul.mubr.bf16.gmra.mrb[4].mxu1 %v1065_v39  ;;  %518 = vmatprep.mubr.bf16.mxu0 %v1066_v40 }
  0x2d   :  { %615 = vmatprep.mubr.bf16.mxu1 %v1068_v41 }
  0x33   :  { %519 = vmatmul.mubr.bf16.gmra.mrb[8].mxu0 %v1070_v42 }
  0x34   :  { %616 = vmatmul.mubr.bf16.gmra.mrb[8].mxu1 %v1071_v43  ;;  %526 = vmatprep.mubr.bf16.mxu0 %v1072_v44 }
  0x35   :  { %623 = vmatprep.mubr.bf16.mxu1 %v1074_v45 }
  0x3b   :  { %527 = vmatmul.mubr.bf16.gmra.mrb[12].mxu0 %v1076_v46 }
  0x3c   :  { %624 = vmatmul.mubr.bf16.gmra.mrb[12].mxu1 %v1077_v47  ;;  %534 = vmatprep.mubr.bf16.mxu0 %v1078_v48 }
  0x3d   :  { %631 = vmatprep.mubr.bf16.mxu1 %v1080_v49 }
  0x43   :  { %535 = vmatmul.mubr.bf16.gmra.mrb[16].mxu0 %v1082_v50 }
  0x44   :  { %632 = vmatmul.mubr.bf16.gmra.mrb[16].mxu1 %v1083_v51  ;;  %542 = vmatprep.mubr.bf16.mxu0 %v1084_v52 }
  0x45   :  { %639 = vmatprep.mubr.bf16.mxu1 %v1086_v53 }
  0x4b   :  { %543 = vmatmul.mubr.bf16.gmra.mrb[20].mxu0 %v1088_v54 }
  0x4c   :  { %640 = vmatmul.mubr.bf16.gmra.mrb[20].mxu1 %v1089_v55  ;;  %550 = vmatprep.mubr.bf16.mxu0 %v1090_v56 }
  0x4d   :  { %647 = vmatprep.mubr.bf16.mxu1 %v1092_v57 }
  0x53   :  { %551 = vmatmul.mubr.bf16.gmra.mrb[24].mxu0 %v1094_v58 }
  0x54   :  { %648 = vmatmul.mubr.bf16.gmra.mrb[24].mxu1 %v1095_v59  ;;  %558 = vmatprep.mubr.bf16.mxu0 %v1096_v60 }
  0x55   :  { %655 = vmatprep.mubr.bf16.mxu1 %v1098_v61 }
  0x5b   :  { %559 = vmatmul.mubr.bf16.gmra.mrb[28].mxu0 %v1100_v62 }
  0x5c   :  { %656 = vmatmul.mubr.bf16.gmra.mrb[28].mxu1 %v1101_v63 }
  0xf6   :  { %v910_v0 = vpop.f32.mrb[0].mxu0 }
  0xf7   :  { %v974_v1 = vpop.f32.mrb[0].mxu1  ;;  %v911_v3 = vpop.f32.mrb[1].mxu0 }
  0xf8   :  { %v912_v4 = vadd.f32 %v911_v3, %v910_v0  ;;  %v975_v5 = vpop.f32.mrb[1].mxu1  ;;  %v913_v6 = vpop.f32.mrb[2].mxu0 }
  0xf9   :  { %v976_v7 = vadd.f32 %v975_v5, %v974_v1  ;;  %v977_v8 = vpop.f32.mrb[2].mxu1  ;;  %v914_v9 = vpop.f32.mrb[3].mxu0 }
  0xfa   :  { %v505_v10 = vadd.f32 %v912_v4, %v1317_v2  ;;  %v915_v11 = vadd.f32 %v914_v9, %v913_v6  ;;  %v978_v12 = vpop.f32.mrb[3].mxu1 }
  0xfb   :  { %v979_v13 = vadd.f32 %v978_v12, %v977_v8 }
  0xfc   :  { %v602_v14 = vadd.f32 %v976_v7, %v505_v10  ;;  %v508_v15 = vadd.f32 %v915_v11, %v1317_v2 }
  0xfe   :  { %vm664_vm0 = vcmp.ge.f32.partialorder %v602_v14, 0.0  ;;  %v680_v16 = vmul.f32 0.01, %v602_v14  ;;  %v605_v17 = vadd.f32 %v979_v13, %v508_v15  ;;  %v916_v18 = vpop.f32.mrb[4].mxu0 }
  0xff   :  { %v980_v19 = vpop.f32.mrb[4].mxu1  ;;  %v917_v20 = vpop.f32.mrb[5].mxu0 }
 0x100   :  { %v696_v21 = vsel %vm664_vm0, %v602_v14, %v680_v16  ;;  %vm665_vm2 = vcmp.ge.f32.partialorder %v605_v17, 0.0  ;;  %v681_v22 = vmul.f32 0.01, %v605_v17  ;;  %v918_v23 = vadd.f32 %v917_v20, %v916_v18  ;;  %v981_v24 = vpop.f32.mrb[5].mxu1  ;;  %v919_v25 = vpop.f32.mrb[6].mxu0 }
 0x101   :  { %v878_v26 = vpack.c.bf16 %v696_v21, %v696_v21  ;;  %v982_v27 = vadd.f32 %v981_v24, %v980_v19  ;;  %v983_v28 = vpop.f32.mrb[6].mxu1  ;;  %v920_v29 = vpop.f32.mrb[7].mxu0 }
 0x102   :  { %v697_v30 = vsel %vm665_vm2, %v605_v17, %v681_v22  ;;  %v513_v31 = vadd.f32 %v918_v23, %v1317_v2  ;;  %v921_v32 = vadd.f32 %v920_v29, %v919_v25  ;;  %v984_v33 = vpop.f32.mrb[7].mxu1 }
 0x103   :  { %777 = vst.msk [vmem:[%s1402_s3] sm:$0xf] %vm776_vm1, %v878_v26  ;;  %v879_v34 = vpack.c.bf16 %v697_v30, %v697_v30  ;;  %v985_v35 = vadd.f32 %v984_v33, %v983_v28 }
 0x104   :  { %v610_v36 = vadd.f32 %v982_v27, %v513_v31  ;;  %v516_v37 = vadd.f32 %v921_v32, %v1317_v2 }
 0x105   :  { %778 = vst.msk [vmem:[%s1402_s3 + $0x4] sm:$0xf] %vm776_vm1, %v879_v34 }
 0x106   :  { %vm666_vm3 = vcmp.ge.f32.partialorder %v610_v36, 0.0  ;;  %v682_v38 = vmul.f32 0.01, %v610_v36  ;;  %v613_v39 = vadd.f32 %v985_v35, %v516_v37  ;;  %v922_v40 = vpop.f32.mrb[8].mxu0 }
 0x107   :  { %v986_v41 = vpop.f32.mrb[8].mxu1  ;;  %v923_v42 = vpop.f32.mrb[9].mxu0 }
 0x108   :  { %v698_v43 = vsel %vm666_vm3, %v610_v36, %v682_v38  ;;  %vm667_vm4 = vcmp.ge.f32.partialorder %v613_v39, 0.0  ;;  %v683_v44 = vmul.f32 0.01, %v613_v39  ;;  %v924_v45 = vadd.f32 %v923_v42, %v922_v40  ;;  %v987_v46 = vpop.f32.mrb[9].mxu1  ;;  %v925_v47 = vpop.f32.mrb[10].mxu0 }
 0x109   :  { %v880_v48 = vpack.c.bf16 %v698_v43, %v698_v43  ;;  %v988_v49 = vadd.f32 %v987_v46, %v986_v41  ;;  %v989_v50 = vpop.f32.mrb[10].mxu1  ;;  %v926_v51 = vpop.f32.mrb[11].mxu0 }
 0x10a   :  { %v699_v52 = vsel %vm667_vm4, %v613_v39, %v683_v44  ;;  %v521_v53 = vadd.f32 %v924_v45, %v1317_v2  ;;  %v927_v54 = vadd.f32 %v926_v51, %v925_v47  ;;  %v990_v55 = vpop.f32.mrb[11].mxu1 }
 0x10b   :  { %779 = vst.msk [vmem:[%s1402_s3 + $0x8] sm:$0xf] %vm776_vm1, %v880_v48  ;;  %v881_v56 = vpack.c.bf16 %v699_v52, %v699_v52  ;;  %v991_v57 = vadd.f32 %v990_v55, %v989_v50 }
 0x10c   :  { %v618_v58 = vadd.f32 %v988_v49, %v521_v53  ;;  %v524_v59 = vadd.f32 %v927_v54, %v1317_v2 }
 0x10d   :  { %780 = vst.msk [vmem:[%s1402_s3 + $0xc] sm:$0xf] %vm776_vm1, %v881_v56 }
 0x10e   :  { %vm668_vm5 = vcmp.ge.f32.partialorder %v618_v58, 0.0  ;;  %v684_v60 = vmul.f32 0.01, %v618_v58  ;;  %v621_v61 = vadd.f32 %v991_v57, %v524_v59  ;;  %v928_v62 = vpop.f32.mrb[12].mxu0 }
 0x10f   :  { %v992_v63 = vpop.f32.mrb[12].mxu1  ;;  %v929_v0 = vpop.f32.mrb[13].mxu0 }
 0x110   :  { %v700_v1 = vsel %vm668_vm5, %v618_v58, %v684_v60  ;;  %vm669_vm6 = vcmp.ge.f32.partialorder %v621_v61, 0.0  ;;  %v685_v3 = vmul.f32 0.01, %v621_v61  ;;  %v930_v4 = vadd.f32 %v929_v0, %v928_v62  ;;  %v993_v5 = vpop.f32.mrb[13].mxu1  ;;  %v931_v6 = vpop.f32.mrb[14].mxu0 }
 0x111   :  { %v882_v7 = vpack.c.bf16 %v700_v1, %v700_v1  ;;  %v994_v8 = vadd.f32 %v993_v5, %v992_v63  ;;  %v995_v9 = vpop.f32.mrb[14].mxu1  ;;  %v932_v10 = vpop.f32.mrb[15].mxu0 }
 0x112   :  { %v701_v11 = vsel %vm669_vm6, %v621_v61, %v685_v3  ;;  %v529_v12 = vadd.f32 %v930_v4, %v1317_v2  ;;  %v933_v13 = vadd.f32 %v932_v10, %v931_v6  ;;  %v996_v14 = vpop.f32.mrb[15].mxu1 }
 0x113   :  { %781 = vst.msk [vmem:[%s1402_s3 + $0x10] sm:$0xf] %vm776_vm1, %v882_v7  ;;  %v883_v15 = vpack.c.bf16 %v701_v11, %v701_v11  ;;  %v997_v16 = vadd.f32 %v996_v14, %v995_v9 }
 0x114   :  { %v626_v17 = vadd.f32 %v994_v8, %v529_v12  ;;  %v532_v18 = vadd.f32 %v933_v13, %v1317_v2 }
 0x115   :  { %782 = vst.msk [vmem:[%s1402_s3 + $0x14] sm:$0xf] %vm776_vm1, %v883_v15 }
 0x116   :  { %vm670_vm7 = vcmp.ge.f32.partialorder %v626_v17, 0.0  ;;  %v686_v19 = vmul.f32 0.01, %v626_v17  ;;  %v629_v20 = vadd.f32 %v997_v16, %v532_v18  ;;  %v934_v21 = vpop.f32.mrb[16].mxu0 }
 0x117   :  { %v998_v22 = vpop.f32.mrb[16].mxu1  ;;  %v935_v23 = vpop.f32.mrb[17].mxu0 }
 0x118   :  { %v702_v24 = vsel %vm670_vm7, %v626_v17, %v686_v19  ;;  %vm671_vm8 = vcmp.ge.f32.partialorder %v629_v20, 0.0  ;;  %v687_v25 = vmul.f32 0.01, %v629_v20  ;;  %v936_v26 = vadd.f32 %v935_v23, %v934_v21  ;;  %v999_v27 = vpop.f32.mrb[17].mxu1  ;;  %v937_v28 = vpop.f32.mrb[18].mxu0 }
 0x119   :  { %v884_v29 = vpack.c.bf16 %v702_v24, %v702_v24  ;;  %v1000_v30 = vadd.f32 %v999_v27, %v998_v22  ;;  %v1001_v31 = vpop.f32.mrb[18].mxu1  ;;  %v938_v32 = vpop.f32.mrb[19].mxu0 }
 0x11a   :  { %v703_v33 = vsel %vm671_vm8, %v629_v20, %v687_v25  ;;  %v537_v34 = vadd.f32 %v936_v26, %v1317_v2  ;;  %v939_v35 = vadd.f32 %v938_v32, %v937_v28  ;;  %v1002_v36 = vpop.f32.mrb[19].mxu1 }
 0x11b   :  { %783 = vst.msk [vmem:[%s1402_s3 + $0x18] sm:$0xf] %vm776_vm1, %v884_v29  ;;  %v885_v37 = vpack.c.bf16 %v703_v33, %v703_v33  ;;  %v1003_v38 = vadd.f32 %v1002_v36, %v1001_v31 }
 0x11c   :  { %v634_v39 = vadd.f32 %v1000_v30, %v537_v34  ;;  %v540_v40 = vadd.f32 %v939_v35, %v1317_v2 }
 0x11d   :  { %784 = vst.msk [vmem:[%s1402_s3 + $0x1c] sm:$0xf] %vm776_vm1, %v885_v37 }
 0x11e   :  { %vm672_vm9 = vcmp.ge.f32.partialorder %v634_v39, 0.0  ;;  %v688_v41 = vmul.f32 0.01, %v634_v39  ;;  %v637_v42 = vadd.f32 %v1003_v38, %v540_v40  ;;  %v940_v43 = vpop.f32.mrb[20].mxu0 }
 0x11f   :  { %v1004_v44 = vpop.f32.mrb[20].mxu1  ;;  %v941_v45 = vpop.f32.mrb[21].mxu0 }
 0x120   :  { %v704_v46 = vsel %vm672_vm9, %v634_v39, %v688_v41  ;;  %vm673_vm10 = vcmp.ge.f32.partialorder %v637_v42, 0.0  ;;  %v689_v47 = vmul.f32 0.01, %v637_v42  ;;  %v942_v48 = vadd.f32 %v941_v45, %v940_v43  ;;  %v1005_v49 = vpop.f32.mrb[21].mxu1  ;;  %v943_v50 = vpop.f32.mrb[22].mxu0 }
 0x121   :  { %v886_v51 = vpack.c.bf16 %v704_v46, %v704_v46  ;;  %v1006_v52 = vadd.f32 %v1005_v49, %v1004_v44  ;;  %v1007_v53 = vpop.f32.mrb[22].mxu1  ;;  %v944_v54 = vpop.f32.mrb[23].mxu0 }
 0x122   :  { %v705_v55 = vsel %vm673_vm10, %v637_v42, %v689_v47  ;;  %v545_v56 = vadd.f32 %v942_v48, %v1317_v2  ;;  %v945_v57 = vadd.f32 %v944_v54, %v943_v50  ;;  %v1008_v58 = vpop.f32.mrb[23].mxu1 }
 0x123   :  { %785 = vst.msk [vmem:[%s1402_s3 + $0x20] sm:$0xf] %vm776_vm1, %v886_v51  ;;  %v887_v59 = vpack.c.bf16 %v705_v55, %v705_v55  ;;  %v1009_v60 = vadd.f32 %v1008_v58, %v1007_v53 }
 0x124   :  { %v642_v61 = vadd.f32 %v1006_v52, %v545_v56  ;;  %v548_v62 = vadd.f32 %v945_v57, %v1317_v2 }
 0x125   :  { %786 = vst.msk [vmem:[%s1402_s3 + $0x24] sm:$0xf] %vm776_vm1, %v887_v59 }
 0x126   :  { %vm674_vm11 = vcmp.ge.f32.partialorder %v642_v61, 0.0  ;;  %v690_v63 = vmul.f32 0.01, %v642_v61  ;;  %v645_v0 = vadd.f32 %v1009_v60, %v548_v62  ;;  %v946_v1 = vpop.f32.mrb[24].mxu0 }
 0x127   :  { %v1010_v3 = vpop.f32.mrb[24].mxu1  ;;  %v947_v4 = vpop.f32.mrb[25].mxu0 }
 0x128   :  { %v706_v5 = vsel %vm674_vm11, %v642_v61, %v690_v63  ;;  %vm675_vm12 = vcmp.ge.f32.partialorder %v645_v0, 0.0  ;;  %v691_v6 = vmul.f32 0.01, %v645_v0  ;;  %v948_v7 = vadd.f32 %v947_v4, %v946_v1  ;;  %v1011_v8 = vpop.f32.mrb[25].mxu1  ;;  %v949_v9 = vpop.f32.mrb[26].mxu0 }
 0x129   :  { %v888_v10 = vpack.c.bf16 %v706_v5, %v706_v5  ;;  %v1012_v11 = vadd.f32 %v1011_v8, %v1010_v3  ;;  %v1013_v12 = vpop.f32.mrb[26].mxu1  ;;  %v950_v13 = vpop.f32.mrb[27].mxu0 }
 0x12a   :  { %v707_v14 = vsel %vm675_vm12, %v645_v0, %v691_v6  ;;  %v553_v15 = vadd.f32 %v948_v7, %v1317_v2  ;;  %v951_v16 = vadd.f32 %v950_v13, %v949_v9  ;;  %v1014_v17 = vpop.f32.mrb[27].mxu1 }
 0x12b   :  { %787 = vst.msk [vmem:[%s1402_s3 + $0x28] sm:$0xf] %vm776_vm1, %v888_v10  ;;  %v889_v18 = vpack.c.bf16 %v707_v14, %v707_v14  ;;  %v1015_v19 = vadd.f32 %v1014_v17, %v1013_v12 }
 0x12c   :  { %v650_v20 = vadd.f32 %v1012_v11, %v553_v15  ;;  %v556_v21 = vadd.f32 %v951_v16, %v1317_v2 }
 0x12d   :  { %788 = vst.msk [vmem:[%s1402_s3 + $0x2c] sm:$0xf] %vm776_vm1, %v889_v18 }
 0x12e   :  { %vm676_vm13 = vcmp.ge.f32.partialorder %v650_v20, 0.0  ;;  %v692_v22 = vmul.f32 0.01, %v650_v20  ;;  %v653_v23 = vadd.f32 %v1015_v19, %v556_v21  ;;  %v952_v24 = vpop.f32.mrb[28].mxu0 }
 0x12f   :  { %v1016_v25 = vpop.f32.mrb[28].mxu1  ;;  %v953_v26 = vpop.f32.mrb[29].mxu0 }
 0x130   :  { %v708_v27 = vsel %vm676_vm13, %v650_v20, %v692_v22  ;;  %vm677_vm14 = vcmp.ge.f32.partialorder %v653_v23, 0.0  ;;  %v693_v28 = vmul.f32 0.01, %v653_v23  ;;  %v954_v29 = vadd.f32 %v953_v26, %v952_v24  ;;  %v1017_v30 = vpop.f32.mrb[29].mxu1  ;;  %v955_v31 = vpop.f32.mrb[30].mxu0 }
 0x131   :  { %v890_v32 = vpack.c.bf16 %v708_v27, %v708_v27  ;;  %v1018_v33 = vadd.f32 %v1017_v30, %v1016_v25  ;;  %v1019_v34 = vpop.f32.mrb[30].mxu1  ;;  %v956_v35 = vpop.f32.mrb[31].mxu0 }
 0x132   :  { %v709_v36 = vsel %vm677_vm14, %v653_v23, %v693_v28  ;;  %v561_v37 = vadd.f32 %v954_v29, %v1317_v2  ;;  %v957_v38 = vadd.f32 %v956_v35, %v955_v31  ;;  %v1020_v39 = vpop.f32.mrb[31].mxu1 }
 0x133   :  { %789 = vst.msk [vmem:[%s1402_s3 + $0x30] sm:$0xf] %vm776_vm1, %v890_v32  ;;  %v891_v40 = vpack.c.bf16 %v709_v36, %v709_v36  ;;  %v1021_v41 = vadd.f32 %v1020_v39, %v1019_v34 }
 0x134   :  { %v658_v42 = vadd.f32 %v1018_v33, %v561_v37  ;;  %v564_v43 = vadd.f32 %v957_v38, %v1317_v2 }
 0x135   :  { %790 = vst.msk [vmem:[%s1402_s3 + $0x34] sm:$0xf] %vm776_vm1, %v891_v40 }
 0x136   :  { %vm678_vm15 = vcmp.ge.f32.partialorder %v658_v42, 0.0  ;;  %v694_v44 = vmul.f32 0.01, %v658_v42  ;;  %v661_v45 = vadd.f32 %v1021_v41, %v564_v43 }
 0x138   :  { %v710_v46 = vsel %vm678_vm15, %v658_v42, %v694_v44  ;;  %vm679_vm0 = vcmp.ge.f32.partialorder %v661_v45, 0.0  ;;  %v695_v47 = vmul.f32 0.01, %v661_v45 }
 0x139   :  { %v892_v48 = vpack.c.bf16 %v710_v46, %v710_v46 }
 0x13a   :  { %v711_v49 = vsel %vm679_vm0, %v661_v45, %v695_v47 }
 0x13b   :  { %791 = vst.msk [vmem:[%s1402_s3 + $0x38] sm:$0xf] %vm776_vm1, %v892_v48  ;;  %v893_v50 = vpack.c.bf16 %v711_v49, %v711_v49 }
 0x13d   :  { %792 = vst.msk [vmem:[%s1402_s3 + $0x3c] sm:$0xf] %vm776_vm1, %v893_v50 }

// kernel: cnn_forward.11
= control target key start
LH: loop header
LB: loop body
LE: loop exit
PB: predicated region body
PF: predicated region fallthrough
CT: control target
= control target key end

     0   :  { %vm854_vm1 = vcmask 519168   ;;  %s1407_s1 = inlined_call_operand.vmem [shape: bf16[1024,64], index: 1, kind: input, shape index: {}]   ;;  %s1408_s0 = inlined_call_operand.vmem [shape: bf16[32,1024], index: 0, kind: input, shape index: {}]   ;;  %s1409_s2 = inlined_call_operand.vmem [shape: f32[1,64], index: 2, kind: input, shape index: {}]   ;;  %s1410_s3 = inlined_call_operand.vmem [shape: bf16[32,64], index: 3, kind: output, shape index: {}]  }
   0x1   :  { %v1064_v0 = vld [vmem:[%s1407_s1 + $0x40] sm:$0xff]   ;;  %v1068_v4 = vld [vmem:[%s1407_s1 + $0x48] sm:$0xff]   ;;  %v1072_v8 = vld [vmem:[%s1407_s1 + $0x50] sm:$0xff]  }
   0x2   :  { %v1065_v1 = vld [vmem:[%s1407_s1 + $0xc0] sm:$0xff]   ;;  %952 = vmatprep.subr.bf16.mxu0 %v1064_v0  ;;  %v1069_v5 = vld [vmem:[%s1407_s1 + $0xc8] sm:$0xff]   ;;  %v1073_v9 = vld [vmem:[%s1407_s1 + $0xd0] sm:$0xff]  }
   0x3   :  { %v1066_v2 = vld [vmem:[%s1407_s1] sm:$0xff]   ;;  %980 = vmatprep.subr.bf16.mxu1 %v1065_v1  ;;  %v1070_v6 = vld [vmem:[%s1407_s1 + $0x8] sm:$0xff]   ;;  %v1074_v10 = vld [vmem:[%s1407_s1 + $0x10] sm:$0xff]  }
   0x4   :  { %v1067_v3 = vld [vmem:[%s1407_s1 + $0x80] sm:$0xff]   ;;  %953 = vmatpush3.bf16.msra.mxu0 %v1066_v2  ;;  %v1071_v7 = vld [vmem:[%s1407_s1 + $0x88] sm:$0xff]   ;;  %v1075_v11 = vld [vmem:[%s1407_s1 + $0x90] sm:$0xff]  }
   0x5   :  { %981 = vmatpush3.bf16.msra.mxu1 %v1067_v3  ;;  %954 = vmatprep.subr.bf16.mxu0 %v1068_v4  ;;  %v1076_v12 = vld [vmem:[%s1407_s1 + $0x58] sm:$0xff]   ;;  %v1080_v16 = vld [vmem:[%s1407_s1 + $0x60] sm:$0xff]   ;;  %v1084_v20 = vld [vmem:[%s1407_s1 + $0x68] sm:$0xff]  }
   0x6   :  { %982 = vmatprep.subr.bf16.mxu1 %v1069_v5  ;;  %v1077_v13 = vld [vmem:[%s1407_s1 + $0xd8] sm:$0xff]   ;;  %v1081_v17 = vld [vmem:[%s1407_s1 + $0xe0] sm:$0xff]   ;;  %v1085_v21 = vld [vmem:[%s1407_s1 + $0xe8] sm:$0xff]  }
   0x7   :  { %v1078_v14 = vld [vmem:[%s1407_s1 + $0x18] sm:$0xff]   ;;  %v1082_v18 = vld [vmem:[%s1407_s1 + $0x20] sm:$0xff]   ;;  %v1086_v22 = vld [vmem:[%s1407_s1 + $0x28] sm:$0xff]  }
   0x8   :  { %955 = vmatpush3.bf16.msra.mxu0 %v1070_v6  ;;  %v1079_v15 = vld [vmem:[%s1407_s1 + $0x98] sm:$0xff]   ;;  %v1083_v19 = vld [vmem:[%s1407_s1 + $0xa0] sm:$0xff]   ;;  %v1087_v23 = vld [vmem:[%s1407_s1 + $0xa8] sm:$0xff]  }
   0x9   :  { %983 = vmatpush3.bf16.msra.mxu1 %v1071_v7  ;;  %956 = vmatprep.subr.bf16.mxu0 %v1072_v8  ;;  %v1088_v24 = vld [vmem:[%s1407_s1 + $0x70] sm:$0xff]   ;;  %v1092_v28 = vld [vmem:[%s1407_s1 + $0x78] sm:$0xff]   ;;  %v15_v32 = vld [vmem:[%s1408_s0] sm:$0xff] }
   0xa   :  { %984 = vmatprep.subr.bf16.mxu1 %v1073_v9  ;;  %v1089_v25 = vld [vmem:[%s1407_s1 + $0xf0] sm:$0xff]   ;;  %v1093_v29 = vld [vmem:[%s1407_s1 + $0xf8] sm:$0xff]   ;;  %v19_v33 = vld [vmem:[%s1408_s0 + $0x20] sm:$0xff] }
   0xb   :  { %v1090_v26 = vld [vmem:[%s1407_s1 + $0x30] sm:$0xff]   ;;  %v1094_v30 = vld [vmem:[%s1407_s1 + $0x38] sm:$0xff]   ;;  %v16_v34 = vld [vmem:[%s1408_s0 + $0x8] sm:$0xff]  ;;  %v864_v35 = vcombine.low %v15_v32, %v19_v33  ;;  %v865_v36 = vcombine.high %v15_v32, %v19_v33 }
   0xc   :  { %957 = vmatpush3.bf16.msra.mxu0 %v1074_v10  ;;  %v1091_v27 = vld [vmem:[%s1407_s1 + $0xb0] sm:$0xff]   ;;  %v1095_v31 = vld [vmem:[%s1407_s1 + $0xb8] sm:$0xff]   ;;  %v20_v37 = vld [vmem:[%s1408_s0 + $0x28] sm:$0xff] }
   0xd   :  { %985 = vmatpush3.bf16.msra.mxu1 %v1075_v11  ;;  %958 = vmatprep.subr.bf16.mxu0 %v1076_v12  ;;  %v866_v38 = vcombine.low %v16_v34, %v20_v37  ;;  %v867_v39 = vcombine.high %v16_v34, %v20_v37  ;;  %v1096_v40 = vld [vmem:[%s1407_s1 + $0x140] sm:$0xff]   ;;  %v1100_v44 = vld [vmem:[%s1407_s1 + $0x148] sm:$0xff]   ;;  %v1104_v48 = vld [vmem:[%s1407_s1 + $0x150] sm:$0xff]  }
   0xe   :  { %986 = vmatprep.subr.bf16.mxu1 %v1077_v13  ;;  %662 = vmatprep.mubr.bf16.mxu0 %v865_v36  ;;  %v1097_v41 = vld [vmem:[%s1407_s1 + $0x1c0] sm:$0xff]   ;;  %v1101_v45 = vld [vmem:[%s1407_s1 + $0x1c8] sm:$0xff]   ;;  %v1105_v49 = vld [vmem:[%s1407_s1 + $0x1d0] sm:$0xff]  }
   0xf   :  { %711 = vmatprep.mubr.bf16.mxu1 %v867_v39  ;;  %v1098_v42 = vld [vmem:[%s1407_s1 + $0x100] sm:$0xff]   ;;  %v1102_v46 = vld [vmem:[%s1407_s1 + $0x108] sm:$0xff]   ;;  %v1106_v50 = vld [vmem:[%s1407_s1 + $0x110] sm:$0xff]  }
  0x10   :  { %959 = vmatpush3.bf16.msra.mxu0 %v1078_v14  ;;  %v1099_v43 = vld [vmem:[%s1407_s1 + $0x180] sm:$0xff]   ;;  %v1103_v47 = vld [vmem:[%s1407_s1 + $0x188] sm:$0xff]   ;;  %v1107_v51 = vld [vmem:[%s1407_s1 + $0x190] sm:$0xff]  }
  0x11   :  { %987 = vmatpush3.bf16.msra.mxu1 %v1079_v15  ;;  %960 = vmatprep.subr.bf16.mxu0 %v1080_v16  ;;  %v1108_v52 = vld [vmem:[%s1407_s1 + $0x158] sm:$0xff]   ;;  %v1112_v56 = vld [vmem:[%s1407_s1 + $0x160] sm:$0xff]   ;;  %v1116_v63 = vld [vmem:[%s1407_s1 + $0x168] sm:$0xff]  }
  0x12   :  { %988 = vmatprep.subr.bf16.mxu1 %v1081_v17  ;;  %v1109_v53 = vld [vmem:[%s1407_s1 + $0x1d8] sm:$0xff]   ;;  %v1113_v57 = vld [vmem:[%s1407_s1 + $0x1e0] sm:$0xff]   ;;  %v1117_v1 = vld [vmem:[%s1407_s1 + $0x1e8] sm:$0xff]  }
  0x13   :  { %v1110_v54 = vld [vmem:[%s1407_s1 + $0x118] sm:$0xff]   ;;  %v1114_v58 = vld [vmem:[%s1407_s1 + $0x120] sm:$0xff]   ;;  %v1118_v2 = vld [vmem:[%s1407_s1 + $0x128] sm:$0xff]  }
  0x14   :  { %961 = vmatpush3.bf16.msra.mxu0 %v1082_v18  ;;  %v1111_v55 = vld [vmem:[%s1407_s1 + $0x198] sm:$0xff]   ;;  %v1115_v59 = vld [vmem:[%s1407_s1 + $0x1a0] sm:$0xff]   ;;  %v1119_v3 = vld [vmem:[%s1407_s1 + $0x1a8] sm:$0xff]  }
  0x15   :  { %989 = vmatpush3.bf16.msra.mxu1 %v1083_v19  ;;  %962 = vmatprep.subr.bf16.mxu0 %v1084_v20  ;;  %v23_v60 = vld [vmem:[%s1408_s0 + $0x40] sm:$0xff]  ;;  %v24_v4 = vld [vmem:[%s1408_s0 + $0x48] sm:$0xff]  ;;  %v1120_v8 = vld [vmem:[%s1407_s1 + $0x170] sm:$0xff]  }
  0x16   :  { %990 = vmatprep.subr.bf16.mxu1 %v1085_v21  ;;  %v27_v61 = vld [vmem:[%s1408_s0 + $0x60] sm:$0xff]  ;;  %v28_v5 = vld [vmem:[%s1408_s0 + $0x68] sm:$0xff]  ;;  %v1121_v9 = vld [vmem:[%s1407_s1 + $0x1f0] sm:$0xff]  }
  0x17   :  { %v873_v62 = vcombine.high %v23_v60, %v27_v61  ;;  %v872_v0 = vcombine.low %v23_v60, %v27_v61  ;;  %v875_v6 = vcombine.high %v24_v4, %v28_v5  ;;  %v874_v7 = vcombine.low %v24_v4, %v28_v5  ;;  %v1122_v10 = vld [vmem:[%s1407_s1 + $0x130] sm:$0xff]   ;;  %v1124_v12 = vld [vmem:[%s1407_s1 + $0x178] sm:$0xff]   ;;  %v863_v34 = vld [vmem:[%s1409_s2] ss:$0 sm:$0xff] }
  0x18   :  { %963 = vmatpush3.bf16.msra.mxu0 %v1086_v22  ;;  %v1123_v11 = vld [vmem:[%s1407_s1 + $0x1b0] sm:$0xff]   ;;  %v1125_v13 = vld [vmem:[%s1407_s1 + $0x1f8] sm:$0xff]  }
  0x19   :  { %991 = vmatpush3.bf16.msra.mxu1 %v1087_v23  ;;  %964 = vmatprep.subr.bf16.mxu0 %v1088_v24  ;;  %v1126_v14 = vld [vmem:[%s1407_s1 + $0x138] sm:$0xff]   ;;  %v17_v16 = vld [vmem:[%s1408_s0 + $0x10] sm:$0xff] }
  0x1a   :  { %992 = vmatprep.subr.bf16.mxu1 %v1089_v25  ;;  %v1127_v15 = vld [vmem:[%s1407_s1 + $0x1b8] sm:$0xff]   ;;  %v21_v17 = vld [vmem:[%s1408_s0 + $0x30] sm:$0xff] }
  0x1b   :  { %v18_v18 = vld [vmem:[%s1408_s0 + $0x18] sm:$0xff]  ;;  %v868_v20 = vcombine.low %v17_v16, %v21_v17  ;;  %v869_v21 = vcombine.high %v17_v16, %v21_v17  ;;  %v25_v24 = vld [vmem:[%s1408_s0 + $0x50] sm:$0xff] }
  0x1c   :  { %965 = vmatpush3.bf16.msra.mxu0 %v1090_v26  ;;  %v22_v19 = vld [vmem:[%s1408_s0 + $0x38] sm:$0xff]  ;;  %v29_v25 = vld [vmem:[%s1408_s0 + $0x70] sm:$0xff] }
  0x1d   :  { %993 = vmatpush3.bf16.msra.mxu1 %v1091_v27  ;;  %966 = vmatprep.subr.bf16.mxu0 %v1092_v28  ;;  %v870_v22 = vcombine.low %v18_v18, %v22_v19  ;;  %v871_v23 = vcombine.high %v18_v18, %v22_v19  ;;  %v26_v26 = vld [vmem:[%s1408_s0 + $0x58] sm:$0xff]  ;;  %v877_v27 = vcombine.high %v25_v24, %v29_v25 }
  0x1e   :  { %994 = vmatprep.subr.bf16.mxu1 %v1093_v29  ;;  %v30_v28 = vld [vmem:[%s1408_s0 + $0x78] sm:$0xff] }
  0x1f   :  { %v879_v29 = vcombine.high %v26_v26, %v30_v28 }
  0x20   :  { %967 = vmatpush3.bf16.msra.mxu0 %v1094_v30  ;;  %v876_v30 = vcombine.low %v25_v24, %v29_v25 }
  0x21   :  { %995 = vmatpush3.bf16.msra.mxu1 %v1095_v31  ;;  %1008 = vmatprep.subr.bf16.mxu0 %v1096_v40  ;;  %v878_v31 = vcombine.low %v26_v26, %v30_v28 }
  0x22   :  { %1036 = vmatprep.subr.bf16.mxu1 %v1097_v41 }
  0x23   :  { %663 = vmatmul.mubr.bf16.vlgmr.msra.gmra.mrb[0].mxu0 %v864_v35 }
  0x24   :  { %712 = vmatmul.mubr.bf16.vlgmr.msra.gmra.mrb[0].mxu1 %v866_v38  ;;  %1009 = vmatpush3.bf16.msra.mxu0 %v1098_v42 }
  0x25   :  { %1037 = vmatpush3.bf16.msra.mxu1 %v1099_v43  ;;  %1010 = vmatprep.subr.bf16.mxu0 %v1100_v44 }
  0x26   :  { %1038 = vmatprep.subr.bf16.mxu1 %v1101_v45  ;;  %670 = vmatprep.mubr.bf16.mxu0 %v873_v62 }
  0x27   :  { %719 = vmatprep.mubr.bf16.mxu1 %v875_v6 }
  0x28   :  { %1011 = vmatpush3.bf16.msra.mxu0 %v1102_v46 }
  0x29   :  { %1039 = vmatpush3.bf16.msra.mxu1 %v1103_v47  ;;  %1012 = vmatprep.subr.bf16.mxu0 %v1104_v48 }
  0x2a   :  { %1040 = vmatprep.subr.bf16.mxu1 %v1105_v49 }
  0x2b   :  { %671 = vmatmul.mubr.bf16.gmra.mrb[4].mxu0 %v872_v0 }
  0x2c   :  { %1013 = vmatpush3.bf16.msra.mxu0 %v1106_v50  ;;  %720 = vmatmul.mubr.bf16.gmra.mrb[4].mxu1 %v874_v7 }
  0x2d   :  { %1041 = vmatpush3.bf16.msra.mxu1 %v1107_v51  ;;  %1014 = vmatprep.subr.bf16.mxu0 %v1108_v52 }
  0x2e   :  { %1042 = vmatprep.subr.bf16.mxu1 %v1109_v53  ;;  %760 = vmatprep.mubr.bf16.mxu0 %v869_v21 }
  0x2f   :  { %809 = vmatprep.mubr.bf16.mxu1 %v871_v23 }
  0x30   :  { %1015 = vmatpush3.bf16.msra.mxu0 %v1110_v54 }
  0x31   :  { %1043 = vmatpush3.bf16.msra.mxu1 %v1111_v55  ;;  %1016 = vmatprep.subr.bf16.mxu0 %v1112_v56 }
  0x32   :  { %1044 = vmatprep.subr.bf16.mxu1 %v1113_v57 }
  0x34   :  { %1017 = vmatpush3.bf16.msra.mxu0 %v1114_v58 }
  0x35   :  { %1045 = vmatpush3.bf16.msra.mxu1 %v1115_v59  ;;  %1018 = vmatprep.subr.bf16.mxu0 %v1116_v63 }
  0x36   :  { %1046 = vmatprep.subr.bf16.mxu1 %v1117_v1 }
  0x38   :  { %1019 = vmatpush3.bf16.msra.mxu0 %v1118_v2 }
  0x39   :  { %1047 = vmatpush3.bf16.msra.mxu1 %v1119_v3  ;;  %1020 = vmatprep.subr.bf16.mxu0 %v1120_v8 }
  0x3a   :  { %1048 = vmatprep.subr.bf16.mxu1 %v1121_v9 }
  0x3c   :  { %1021 = vmatpush3.bf16.msra.mxu0 %v1122_v10 }
  0x3d   :  { %1049 = vmatpush3.bf16.msra.mxu1 %v1123_v11  ;;  %1022 = vmatprep.subr.bf16.mxu0 %v1124_v12 }
  0x3e   :  { %1050 = vmatprep.subr.bf16.mxu1 %v1125_v13 }
  0x40   :  { %1023 = vmatpush3.bf16.msra.mxu0 %v1126_v14 }
  0x41   :  { %1051 = vmatpush3.bf16.msra.mxu1 %v1127_v15 }
  0x43   :  { %761 = vmatmul.mubr.bf16.vlgmr.msra.gmra.mrb[8].mxu0 %v868_v20 }
  0x44   :  { %810 = vmatmul.mubr.bf16.vlgmr.msra.gmra.mrb[8].mxu1 %v870_v22  ;;  %768 = vmatprep.mubr.bf16.mxu0 %v877_v27 }
  0x45   :  { %817 = vmatprep.mubr.bf16.mxu1 %v879_v29 }
  0x4b   :  { %769 = vmatmul.mubr.bf16.gmra.mrb[12].mxu0 %v876_v30 }
  0x4c   :  { %818 = vmatmul.mubr.bf16.gmra.mrb[12].mxu1 %v878_v31 }
  0xf6   :  { %v968_v32 = vpop.f32.mrb[0].mxu0 }
  0xf7   :  { %v996_v33 = vpop.f32.mrb[0].mxu1  ;;  %v969_v35 = vpop.f32.mrb[1].mxu0 }
  0xf8   :  { %v970_v36 = vadd.f32 %v969_v35, %v968_v32  ;;  %v997_v37 = vpop.f32.mrb[1].mxu1  ;;  %v971_v38 = vpop.f32.mrb[2].mxu0 }
  0xf9   :  { %v998_v39 = vadd.f32 %v997_v37, %v996_v33  ;;  %v999_v40 = vpop.f32.mrb[2].mxu1  ;;  %v972_v41 = vpop.f32.mrb[3].mxu0 }
  0xfa   :  { %v665_v42 = vadd.f32 %v970_v36, %v863_v34  ;;  %v973_v43 = vadd.f32 %v972_v41, %v971_v38  ;;  %v1000_v44 = vpop.f32.mrb[3].mxu1 }
  0xfb   :  { %v1001_v45 = vadd.f32 %v1000_v44, %v999_v40 }
  0xfc   :  { %v714_v46 = vadd.f32 %v998_v39, %v665_v42  ;;  %v668_v47 = vadd.f32 %v973_v43, %v863_v34 }
  0xfe   :  { %v717_v48 = vadd.f32 %v1001_v45, %v668_v47  ;;  %v974_v49 = vpop.f32.mrb[4].mxu0 }
  0xff   :  { %v975_v50 = vpop.f32.mrb[5].mxu0  ;;  %v1002_v56 = vpop.f32.mrb[4].mxu1 }
 0x100   :  { %v976_v51 = vadd.f32 %v975_v50, %v974_v49  ;;  %v977_v52 = vpop.f32.mrb[6].mxu0  ;;  %v1003_v57 = vpop.f32.mrb[5].mxu1 }
 0x101   :  { %v978_v53 = vpop.f32.mrb[7].mxu0  ;;  %v1004_v59 = vadd.f32 %v1003_v57, %v1002_v56  ;;  %v1005_v60 = vpop.f32.mrb[6].mxu1 }
 0x102   :  { %v979_v54 = vadd.f32 %v978_v53, %v977_v52  ;;  %v673_v55 = vadd.f32 %v976_v51, %v863_v34  ;;  %v1006_v61 = vpop.f32.mrb[7].mxu1 }
 0x103   :  { %v1007_v63 = vadd.f32 %v1006_v61, %v1005_v60 }
 0x104   :  { %v676_v58 = vadd.f32 %v979_v54, %v863_v34  ;;  %v722_v62 = vadd.f32 %v1004_v59, %v673_v55 }
 0x106   :  { %v725_v0 = vadd.f32 %v1007_v63, %v676_v58 }
 0x116   :  { %v1024_v1 = vpop.f32.mrb[8].mxu0 }
 0x117   :  { %v1052_v2 = vpop.f32.mrb[8].mxu1  ;;  %v1025_v3 = vpop.f32.mrb[9].mxu0 }
 0x118   :  { %v1053_v4 = vpop.f32.mrb[9].mxu1  ;;  %v1026_v5 = vadd.f32 %v1025_v3, %v1024_v1  ;;  %v1027_v7 = vpop.f32.mrb[10].mxu0 }
 0x119   :  { %v1054_v6 = vadd.f32 %v1053_v4, %v1052_v2  ;;  %v1055_v8 = vpop.f32.mrb[10].mxu1  ;;  %v1028_v9 = vpop.f32.mrb[11].mxu0 }
 0x11a   :  { %v1056_v10 = vpop.f32.mrb[11].mxu1  ;;  %v763_v11 = vadd.f32 %v1026_v5, %v714_v46  ;;  %v1029_v12 = vadd.f32 %v1028_v9, %v1027_v7 }
 0x11b   :  { %v1057_v13 = vadd.f32 %v1056_v10, %v1055_v8 }
 0x11c   :  { %v812_v14 = vadd.f32 %v1054_v6, %v763_v11  ;;  %v766_v15 = vadd.f32 %v1029_v12, %v717_v48 }
 0x11e   :  { %vm826_vm0 = vcmp.ge.f32.partialorder %v812_v14, 0.0  ;;  %v830_v16 = vmul.f32 0.01, %v812_v14  ;;  %v815_v17 = vadd.f32 %v1057_v13, %v766_v15  ;;  %v1030_v18 = vpop.f32.mrb[12].mxu0 }
 0x11f   :  { %v1058_v19 = vpop.f32.mrb[12].mxu1  ;;  %v1031_v20 = vpop.f32.mrb[13].mxu0 }
 0x120   :  { %v1059_v21 = vpop.f32.mrb[13].mxu1  ;;  %v834_v22 = vsel %vm826_vm0, %v812_v14, %v830_v16  ;;  %vm827_vm2 = vcmp.ge.f32.partialorder %v815_v17, 0.0  ;;  %v831_v23 = vmul.f32 0.01, %v815_v17  ;;  %v1032_v24 = vadd.f32 %v1031_v20, %v1030_v18  ;;  %v1033_v25 = vpop.f32.mrb[14].mxu0 }
 0x121   :  { %v1061_v26 = vpop.f32.mrb[14].mxu1  ;;  %v948_v27 = vpack.c.bf16 %v834_v22, %v834_v22  ;;  %v1060_v28 = vadd.f32 %v1059_v21, %v1058_v19  ;;  %v1034_v29 = vpop.f32.mrb[15].mxu0 }
 0x122   :  { %v1062_v30 = vpop.f32.mrb[15].mxu1  ;;  %v835_v31 = vsel %vm827_vm2, %v815_v17, %v831_v23  ;;  %v771_v32 = vadd.f32 %v1032_v24, %v722_v62  ;;  %v1035_v33 = vadd.f32 %v1034_v29, %v1033_v25 }
 0x123   :  { %v1063_v34 = vadd.f32 %v1062_v30, %v1061_v26  ;;  %855 = vst.msk [vmem:[%s1410_s3] sm:$0xf] %vm854_vm1, %v948_v27  ;;  %v949_v35 = vpack.c.bf16 %v835_v31, %v835_v31 }
 0x124   :  { %v820_v36 = vadd.f32 %v1060_v28, %v771_v32  ;;  %v774_v37 = vadd.f32 %v1035_v33, %v725_v0 }
 0x125   :  { %856 = vst.msk [vmem:[%s1410_s3 + $0x4] sm:$0xf] %vm854_vm1, %v949_v35 }
 0x126   :  { %vm828_vm3 = vcmp.ge.f32.partialorder %v820_v36, 0.0  ;;  %v832_v38 = vmul.f32 0.01, %v820_v36  ;;  %v823_v39 = vadd.f32 %v1063_v34, %v774_v37 }
 0x128   :  { %v836_v40 = vsel %vm828_vm3, %v820_v36, %v832_v38  ;;  %vm829_vm4 = vcmp.ge.f32.partialorder %v823_v39, 0.0  ;;  %v833_v41 = vmul.f32 0.01, %v823_v39 }
 0x129   :  { %v950_v42 = vpack.c.bf16 %v836_v40, %v836_v40 }
 0x12a   :  { %v837_v43 = vsel %vm829_vm4, %v823_v39, %v833_v41 }
 0x12b   :  { %857 = vst.msk [vmem:[%s1410_s3 + $0x8] sm:$0xf] %vm854_vm1, %v950_v42  ;;  %v951_v44 = vpack.c.bf16 %v837_v43, %v837_v43 }
 0x12d   :  { %858 = vst.msk [vmem:[%s1410_s3 + $0xc] sm:$0xf] %vm854_vm1, %v951_v44 }

// kernel: cnn_forward.12
= control target key start
LH: loop header
LB: loop body
LE: loop exit
PB: predicated region body
PF: predicated region fallthrough
CT: control target
= control target key end

     0   :  { %vm760_vm1 = vcmask 519168   ;;  %s1241_s1 = inlined_call_operand.vmem [shape: bf16[1024,64], index: 1, kind: input, shape index: {}]   ;;  %s1242_s0 = inlined_call_operand.vmem [shape: bf16[16,1024], index: 0, kind: input, shape index: {}]   ;;  %s1243_s2 = inlined_call_operand.vmem [shape: f32[1,64], index: 2, kind: input, shape index: {}]   ;;  %s1244_s3 = inlined_call_operand.vmem [shape: bf16[16,64], index: 3, kind: output, shape index: {}]  }
   0x1   :  { %v932_v0 = vld [vmem:[%s1241_s1 + $0x40] sm:$0xff]   ;;  %v936_v4 = vld [vmem:[%s1241_s1 + $0x48] sm:$0xff]   ;;  %v940_v8 = vld [vmem:[%s1241_s1 + $0x50] sm:$0xff]  }
   0x2   :  { %v933_v1 = vld [vmem:[%s1241_s1 + $0xc0] sm:$0xff]   ;;  %844 = vmatprep.subr.bf16.mxu0 %v932_v0  ;;  %v937_v5 = vld [vmem:[%s1241_s1 + $0xc8] sm:$0xff]   ;;  %v941_v9 = vld [vmem:[%s1241_s1 + $0xd0] sm:$0xff]  }
   0x3   :  { %v934_v2 = vld [vmem:[%s1241_s1] sm:$0xff]   ;;  %866 = vmatprep.subr.bf16.mxu1 %v933_v1  ;;  %v938_v6 = vld [vmem:[%s1241_s1 + $0x8] sm:$0xff]   ;;  %v942_v10 = vld [vmem:[%s1241_s1 + $0x10] sm:$0xff]  }
   0x4   :  { %v935_v3 = vld [vmem:[%s1241_s1 + $0x80] sm:$0xff]   ;;  %845 = vmatpush3.bf16.msra.mxu0 %v934_v2  ;;  %v939_v7 = vld [vmem:[%s1241_s1 + $0x88] sm:$0xff]   ;;  %v943_v11 = vld [vmem:[%s1241_s1 + $0x90] sm:$0xff]  }
   0x5   :  { %867 = vmatpush3.bf16.msra.mxu1 %v935_v3  ;;  %846 = vmatprep.subr.bf16.mxu0 %v936_v4  ;;  %v944_v12 = vld [vmem:[%s1241_s1 + $0x58] sm:$0xff]   ;;  %v948_v16 = vld [vmem:[%s1241_s1 + $0x60] sm:$0xff]   ;;  %v952_v20 = vld [vmem:[%s1241_s1 + $0x68] sm:$0xff]  }
   0x6   :  { %868 = vmatprep.subr.bf16.mxu1 %v937_v5  ;;  %v945_v13 = vld [vmem:[%s1241_s1 + $0xd8] sm:$0xff]   ;;  %v949_v17 = vld [vmem:[%s1241_s1 + $0xe0] sm:$0xff]   ;;  %v953_v21 = vld [vmem:[%s1241_s1 + $0xe8] sm:$0xff]  }
   0x7   :  { %v946_v14 = vld [vmem:[%s1241_s1 + $0x18] sm:$0xff]   ;;  %v950_v18 = vld [vmem:[%s1241_s1 + $0x20] sm:$0xff]   ;;  %v954_v22 = vld [vmem:[%s1241_s1 + $0x28] sm:$0xff]  }
   0x8   :  { %847 = vmatpush3.bf16.msra.mxu0 %v938_v6  ;;  %v947_v15 = vld [vmem:[%s1241_s1 + $0x98] sm:$0xff]   ;;  %v951_v19 = vld [vmem:[%s1241_s1 + $0xa0] sm:$0xff]   ;;  %v955_v23 = vld [vmem:[%s1241_s1 + $0xa8] sm:$0xff]  }
   0x9   :  { %869 = vmatpush3.bf16.msra.mxu1 %v939_v7  ;;  %848 = vmatprep.subr.bf16.mxu0 %v940_v8  ;;  %v956_v24 = vld [vmem:[%s1241_s1 + $0x70] sm:$0xff]   ;;  %v960_v28 = vld [vmem:[%s1241_s1 + $0x78] sm:$0xff]   ;;  %v15_v32 = vld [vmem:[%s1242_s0] sm:$0xff] }
   0xa   :  { %870 = vmatprep.subr.bf16.mxu1 %v941_v9  ;;  %v957_v25 = vld [vmem:[%s1241_s1 + $0xf0] sm:$0xff]   ;;  %v961_v29 = vld [vmem:[%s1241_s1 + $0xf8] sm:$0xff]   ;;  %v19_v33 = vld [vmem:[%s1242_s0 + $0x20] sm:$0xff] }
   0xb   :  { %v958_v26 = vld [vmem:[%s1241_s1 + $0x30] sm:$0xff]   ;;  %v962_v30 = vld [vmem:[%s1241_s1 + $0x38] sm:$0xff]   ;;  %v16_v34 = vld [vmem:[%s1242_s0 + $0x8] sm:$0xff]  ;;  %v768_v35 = vcombine.low %v15_v32, %v19_v33  ;;  %v769_v36 = vcombine.high %v15_v32, %v19_v33 }
   0xc   :  { %849 = vmatpush3.bf16.msra.mxu0 %v942_v10  ;;  %v959_v27 = vld [vmem:[%s1241_s1 + $0xb0] sm:$0xff]   ;;  %v963_v31 = vld [vmem:[%s1241_s1 + $0xb8] sm:$0xff]   ;;  %v20_v37 = vld [vmem:[%s1242_s0 + $0x28] sm:$0xff] }
   0xd   :  { %871 = vmatpush3.bf16.msra.mxu1 %v943_v11  ;;  %850 = vmatprep.subr.bf16.mxu0 %v944_v12  ;;  %v770_v38 = vcombine.low %v16_v34, %v20_v37  ;;  %v771_v39 = vcombine.high %v16_v34, %v20_v37  ;;  %v964_v40 = vld [vmem:[%s1241_s1 + $0x140] sm:$0xff]   ;;  %v968_v44 = vld [vmem:[%s1241_s1 + $0x148] sm:$0xff]   ;;  %v972_v48 = vld [vmem:[%s1241_s1 + $0x150] sm:$0xff]  }
   0xe   :  { %872 = vmatprep.subr.bf16.mxu1 %v945_v13  ;;  %614 = vmatprep.mubr.bf16.mxu0 %v769_v36  ;;  %v965_v41 = vld [vmem:[%s1241_s1 + $0x1c0] sm:$0xff]   ;;  %v969_v45 = vld [vmem:[%s1241_s1 + $0x1c8] sm:$0xff]   ;;  %v973_v49 = vld [vmem:[%s1241_s1 + $0x1d0] sm:$0xff]  }
   0xf   :  { %655 = vmatprep.mubr.bf16.mxu1 %v771_v39  ;;  %v966_v42 = vld [vmem:[%s1241_s1 + $0x100] sm:$0xff]   ;;  %v970_v46 = vld [vmem:[%s1241_s1 + $0x108] sm:$0xff]   ;;  %v974_v50 = vld [vmem:[%s1241_s1 + $0x110] sm:$0xff]  }
  0x10   :  { %851 = vmatpush3.bf16.msra.mxu0 %v946_v14  ;;  %v967_v43 = vld [vmem:[%s1241_s1 + $0x180] sm:$0xff]   ;;  %v971_v47 = vld [vmem:[%s1241_s1 + $0x188] sm:$0xff]   ;;  %v975_v51 = vld [vmem:[%s1241_s1 + $0x190] sm:$0xff]  }
  0x11   :  { %873 = vmatpush3.bf16.msra.mxu1 %v947_v15  ;;  %852 = vmatprep.subr.bf16.mxu0 %v948_v16  ;;  %v976_v52 = vld [vmem:[%s1241_s1 + $0x158] sm:$0xff]   ;;  %v980_v56 = vld [vmem:[%s1241_s1 + $0x160] sm:$0xff]   ;;  %v984_v60 = vld [vmem:[%s1241_s1 + $0x168] sm:$0xff]  }
  0x12   :  { %874 = vmatprep.subr.bf16.mxu1 %v949_v17  ;;  %v977_v53 = vld [vmem:[%s1241_s1 + $0x1d8] sm:$0xff]   ;;  %v981_v57 = vld [vmem:[%s1241_s1 + $0x1e0] sm:$0xff]   ;;  %v985_v61 = vld [vmem:[%s1241_s1 + $0x1e8] sm:$0xff]  }
  0x13   :  { %v978_v54 = vld [vmem:[%s1241_s1 + $0x118] sm:$0xff]   ;;  %v982_v58 = vld [vmem:[%s1241_s1 + $0x120] sm:$0xff]   ;;  %v986_v62 = vld [vmem:[%s1241_s1 + $0x128] sm:$0xff]  }
  0x14   :  { %853 = vmatpush3.bf16.msra.mxu0 %v950_v18  ;;  %v979_v55 = vld [vmem:[%s1241_s1 + $0x198] sm:$0xff]   ;;  %v983_v59 = vld [vmem:[%s1241_s1 + $0x1a0] sm:$0xff]   ;;  %v987_v63 = vld [vmem:[%s1241_s1 + $0x1a8] sm:$0xff]  }
  0x15   :  { %875 = vmatpush3.bf16.msra.mxu1 %v951_v19  ;;  %854 = vmatprep.subr.bf16.mxu0 %v952_v20  ;;  %v988_v0 = vld [vmem:[%s1241_s1 + $0x170] sm:$0xff]   ;;  %v992_v4 = vld [vmem:[%s1241_s1 + $0x178] sm:$0xff]   ;;  %v767_v18 = vld [vmem:[%s1243_s2] ss:$0 sm:$0xff] }
  0x16   :  { %876 = vmatprep.subr.bf16.mxu1 %v953_v21  ;;  %v989_v1 = vld [vmem:[%s1241_s1 + $0x1f0] sm:$0xff]   ;;  %v993_v5 = vld [vmem:[%s1241_s1 + $0x1f8] sm:$0xff]  }
  0x17   :  { %v990_v2 = vld [vmem:[%s1241_s1 + $0x130] sm:$0xff]   ;;  %v994_v6 = vld [vmem:[%s1241_s1 + $0x138] sm:$0xff]  }
  0x18   :  { %855 = vmatpush3.bf16.msra.mxu0 %v954_v22  ;;  %v991_v3 = vld [vmem:[%s1241_s1 + $0x1b0] sm:$0xff]   ;;  %v995_v7 = vld [vmem:[%s1241_s1 + $0x1b8] sm:$0xff]  }
  0x19   :  { %877 = vmatpush3.bf16.msra.mxu1 %v955_v23  ;;  %856 = vmatprep.subr.bf16.mxu0 %v956_v24  ;;  %v17_v8 = vld [vmem:[%s1242_s0 + $0x10] sm:$0xff]  ;;  %v18_v12 = vld [vmem:[%s1242_s0 + $0x18] sm:$0xff] }
  0x1a   :  { %878 = vmatprep.subr.bf16.mxu1 %v957_v25  ;;  %v21_v9 = vld [vmem:[%s1242_s0 + $0x30] sm:$0xff]  ;;  %v22_v13 = vld [vmem:[%s1242_s0 + $0x38] sm:$0xff] }
  0x1b   :  { %v772_v10 = vcombine.low %v17_v8, %v21_v9  ;;  %v773_v11 = vcombine.high %v17_v8, %v21_v9  ;;  %v774_v14 = vcombine.low %v18_v12, %v22_v13  ;;  %v775_v15 = vcombine.high %v18_v12, %v22_v13 }
  0x1c   :  { %857 = vmatpush3.bf16.msra.mxu0 %v958_v26 }
  0x1d   :  { %879 = vmatpush3.bf16.msra.mxu1 %v959_v27  ;;  %858 = vmatprep.subr.bf16.mxu0 %v960_v28 }
  0x1e   :  { %880 = vmatprep.subr.bf16.mxu1 %v961_v29 }
  0x20   :  { %859 = vmatpush3.bf16.msra.mxu0 %v962_v30 }
  0x21   :  { %881 = vmatpush3.bf16.msra.mxu1 %v963_v31  ;;  %888 = vmatprep.subr.bf16.mxu0 %v964_v40 }
  0x22   :  { %910 = vmatprep.subr.bf16.mxu1 %v965_v41 }
  0x23   :  { %615 = vmatmul.mubr.bf16.vlgmr.msra.gmra.mrb[0].mxu0 %v768_v35 }
  0x24   :  { %656 = vmatmul.mubr.bf16.vlgmr.msra.gmra.mrb[0].mxu1 %v770_v38  ;;  %889 = vmatpush3.bf16.msra.mxu0 %v966_v42 }
  0x25   :  { %911 = vmatpush3.bf16.msra.mxu1 %v967_v43  ;;  %890 = vmatprep.subr.bf16.mxu0 %v968_v44 }
  0x26   :  { %912 = vmatprep.subr.bf16.mxu1 %v969_v45  ;;  %696 = vmatprep.mubr.bf16.mxu0 %v773_v11 }
  0x27   :  { %737 = vmatprep.mubr.bf16.mxu1 %v775_v15 }
  0x28   :  { %891 = vmatpush3.bf16.msra.mxu0 %v970_v46 }
  0x29   :  { %913 = vmatpush3.bf16.msra.mxu1 %v971_v47  ;;  %892 = vmatprep.subr.bf16.mxu0 %v972_v48 }
  0x2a   :  { %914 = vmatprep.subr.bf16.mxu1 %v973_v49 }
  0x2c   :  { %893 = vmatpush3.bf16.msra.mxu0 %v974_v50 }
  0x2d   :  { %915 = vmatpush3.bf16.msra.mxu1 %v975_v51  ;;  %894 = vmatprep.subr.bf16.mxu0 %v976_v52 }
  0x2e   :  { %916 = vmatprep.subr.bf16.mxu1 %v977_v53 }
  0x30   :  { %895 = vmatpush3.bf16.msra.mxu0 %v978_v54 }
  0x31   :  { %917 = vmatpush3.bf16.msra.mxu1 %v979_v55  ;;  %896 = vmatprep.subr.bf16.mxu0 %v980_v56 }
  0x32   :  { %918 = vmatprep.subr.bf16.mxu1 %v981_v57 }
  0x34   :  { %897 = vmatpush3.bf16.msra.mxu0 %v982_v58 }
  0x35   :  { %919 = vmatpush3.bf16.msra.mxu1 %v983_v59  ;;  %898 = vmatprep.subr.bf16.mxu0 %v984_v60 }
  0x36   :  { %920 = vmatprep.subr.bf16.mxu1 %v985_v61 }
  0x38   :  { %899 = vmatpush3.bf16.msra.mxu0 %v986_v62 }
  0x39   :  { %921 = vmatpush3.bf16.msra.mxu1 %v987_v63  ;;  %900 = vmatprep.subr.bf16.mxu0 %v988_v0 }
  0x3a   :  { %922 = vmatprep.subr.bf16.mxu1 %v989_v1 }
  0x3c   :  { %901 = vmatpush3.bf16.msra.mxu0 %v990_v2 }
  0x3d   :  { %923 = vmatpush3.bf16.msra.mxu1 %v991_v3  ;;  %902 = vmatprep.subr.bf16.mxu0 %v992_v4 }
  0x3e   :  { %924 = vmatprep.subr.bf16.mxu1 %v993_v5 }
  0x40   :  { %903 = vmatpush3.bf16.msra.mxu0 %v994_v6 }
  0x41   :  { %925 = vmatpush3.bf16.msra.mxu1 %v995_v7 }
  0x43   :  { %697 = vmatmul.mubr.bf16.vlgmr.msra.gmra.mrb[4].mxu0 %v772_v10 }
  0x44   :  { %738 = vmatmul.mubr.bf16.vlgmr.msra.gmra.mrb[4].mxu1 %v774_v14 }
  0xf6   :  { %v860_v16 = vpop.f32.mrb[0].mxu0 }
  0xf7   :  { %v882_v17 = vpop.f32.mrb[0].mxu1  ;;  %v861_v19 = vpop.f32.mrb[1].mxu0 }
  0xf8   :  { %v862_v20 = vadd.f32 %v861_v19, %v860_v16  ;;  %v883_v21 = vpop.f32.mrb[1].mxu1  ;;  %v863_v22 = vpop.f32.mrb[2].mxu0 }
  0xf9   :  { %v884_v23 = vadd.f32 %v883_v21, %v882_v17  ;;  %v885_v24 = vpop.f32.mrb[2].mxu1  ;;  %v864_v25 = vpop.f32.mrb[3].mxu0 }
  0xfa   :  { %v617_v26 = vadd.f32 %v862_v20, %v767_v18  ;;  %v865_v27 = vadd.f32 %v864_v25, %v863_v22  ;;  %v886_v28 = vpop.f32.mrb[3].mxu1 }
  0xfb   :  { %v887_v29 = vadd.f32 %v886_v28, %v885_v24 }
  0xfc   :  { %v658_v30 = vadd.f32 %v884_v23, %v617_v26  ;;  %v620_v31 = vadd.f32 %v865_v27, %v767_v18 }
  0xfe   :  { %v661_v32 = vadd.f32 %v887_v29, %v620_v31 }
 0x116   :  { %v904_v33 = vpop.f32.mrb[4].mxu0 }
 0x117   :  { %v926_v34 = vpop.f32.mrb[4].mxu1  ;;  %v905_v35 = vpop.f32.mrb[5].mxu0 }
 0x118   :  { %v906_v36 = vadd.f32 %v905_v35, %v904_v33  ;;  %v927_v37 = vpop.f32.mrb[5].mxu1  ;;  %v907_v38 = vpop.f32.mrb[6].mxu0 }
 0x119   :  { %v928_v39 = vadd.f32 %v927_v37, %v926_v34  ;;  %v929_v40 = vpop.f32.mrb[6].mxu1  ;;  %v908_v41 = vpop.f32.mrb[7].mxu0 }
 0x11a   :  { %v699_v42 = vadd.f32 %v906_v36, %v658_v30  ;;  %v909_v43 = vadd.f32 %v908_v41, %v907_v38  ;;  %v930_v44 = vpop.f32.mrb[7].mxu1 }
 0x11b   :  { %v931_v45 = vadd.f32 %v930_v44, %v929_v40 }
 0x11c   :  { %v740_v46 = vadd.f32 %v928_v39, %v699_v42  ;;  %v702_v47 = vadd.f32 %v909_v43, %v661_v32 }
 0x11e   :  { %vm746_vm0 = vcmp.ge.f32.partialorder %v740_v46, 0.0  ;;  %v748_v48 = vmul.f32 0.01, %v740_v46  ;;  %v743_v49 = vadd.f32 %v931_v45, %v702_v47 }
 0x120   :  { %v750_v50 = vsel %vm746_vm0, %v740_v46, %v748_v48  ;;  %vm747_vm2 = vcmp.ge.f32.partialorder %v743_v49, 0.0  ;;  %v749_v51 = vmul.f32 0.01, %v743_v49 }
 0x121   :  { %v842_v52 = vpack.c.bf16 %v750_v50, %v750_v50 }
 0x122   :  { %v751_v53 = vsel %vm747_vm2, %v743_v49, %v749_v51 }
 0x123   :  { %761 = vst.msk [vmem:[%s1244_s3] sm:$0xf] %vm760_vm1, %v842_v52  ;;  %v843_v54 = vpack.c.bf16 %v751_v53, %v751_v53 }
 0x125   :  { %762 = vst.msk [vmem:[%s1244_s3 + $0x4] sm:$0xf] %vm760_vm1, %v843_v54 }

// kernel: cnn_forward.13
= control target key start
LH: loop header
LB: loop body
LE: loop exit
PB: predicated region body
PF: predicated region fallthrough
CT: control target
= control target key end

     0   :  { %vm758_vm0 = vcmask 826368   ;;  %s1243_s1 = inlined_call_operand.vmem [shape: bf16[1024,101], index: 1, kind: input, shape index: {}]   ;;  %s1244_s0 = inlined_call_operand.vmem [shape: bf16[16,1024], index: 0, kind: input, shape index: {}]   ;;  %s1245_s2 = inlined_call_operand.vmem [shape: f32[1,101], index: 2, kind: input, shape index: {}]   ;;  %s1246_s3 = inlined_call_operand.vmem [shape: f32[16,101], index: 3, kind: output, shape index: {}]  }
   0x1   :  { %v926_v0 = vld [vmem:[%s1243_s1 + $0x40] sm:$0xff]   ;;  %v930_v4 = vld [vmem:[%s1243_s1 + $0x48] sm:$0xff]   ;;  %v934_v8 = vld [vmem:[%s1243_s1 + $0x50] sm:$0xff]  }
   0x2   :  { %v927_v1 = vld [vmem:[%s1243_s1 + $0xc0] sm:$0xff]   ;;  %838 = vmatprep.subr.bf16.mxu0 %v926_v0  ;;  %v931_v5 = vld [vmem:[%s1243_s1 + $0xc8] sm:$0xff]   ;;  %v935_v9 = vld [vmem:[%s1243_s1 + $0xd0] sm:$0xff]  }
   0x3   :  { %v928_v2 = vld [vmem:[%s1243_s1] sm:$0xff]   ;;  %860 = vmatprep.subr.bf16.mxu1 %v927_v1  ;;  %v932_v6 = vld [vmem:[%s1243_s1 + $0x8] sm:$0xff]   ;;  %v936_v10 = vld [vmem:[%s1243_s1 + $0x10] sm:$0xff]  }
   0x4   :  { %v929_v3 = vld [vmem:[%s1243_s1 + $0x80] sm:$0xff]   ;;  %839 = vmatpush3.bf16.msra.mxu0 %v928_v2  ;;  %v933_v7 = vld [vmem:[%s1243_s1 + $0x88] sm:$0xff]   ;;  %v937_v11 = vld [vmem:[%s1243_s1 + $0x90] sm:$0xff]  }
   0x5   :  { %861 = vmatpush3.bf16.msra.mxu1 %v929_v3  ;;  %840 = vmatprep.subr.bf16.mxu0 %v930_v4  ;;  %v938_v12 = vld [vmem:[%s1243_s1 + $0x58] sm:$0xff]   ;;  %v942_v16 = vld [vmem:[%s1243_s1 + $0x60] sm:$0xff]   ;;  %v946_v20 = vld [vmem:[%s1243_s1 + $0x68] sm:$0xff]  }
   0x6   :  { %862 = vmatprep.subr.bf16.mxu1 %v931_v5  ;;  %v939_v13 = vld [vmem:[%s1243_s1 + $0xd8] sm:$0xff]   ;;  %v943_v17 = vld [vmem:[%s1243_s1 + $0xe0] sm:$0xff]   ;;  %v947_v21 = vld [vmem:[%s1243_s1 + $0xe8] sm:$0xff]  }
   0x7   :  { %v940_v14 = vld [vmem:[%s1243_s1 + $0x18] sm:$0xff]   ;;  %v944_v18 = vld [vmem:[%s1243_s1 + $0x20] sm:$0xff]   ;;  %v948_v22 = vld [vmem:[%s1243_s1 + $0x28] sm:$0xff]  }
   0x8   :  { %841 = vmatpush3.bf16.msra.mxu0 %v932_v6  ;;  %v941_v15 = vld [vmem:[%s1243_s1 + $0x98] sm:$0xff]   ;;  %v945_v19 = vld [vmem:[%s1243_s1 + $0xa0] sm:$0xff]   ;;  %v949_v23 = vld [vmem:[%s1243_s1 + $0xa8] sm:$0xff]  }
   0x9   :  { %863 = vmatpush3.bf16.msra.mxu1 %v933_v7  ;;  %842 = vmatprep.subr.bf16.mxu0 %v934_v8  ;;  %v950_v24 = vld [vmem:[%s1243_s1 + $0x70] sm:$0xff]   ;;  %v954_v28 = vld [vmem:[%s1243_s1 + $0x78] sm:$0xff]   ;;  %v15_v32 = vld [vmem:[%s1244_s0] sm:$0xff] }
   0xa   :  { %864 = vmatprep.subr.bf16.mxu1 %v935_v9  ;;  %v951_v25 = vld [vmem:[%s1243_s1 + $0xf0] sm:$0xff]   ;;  %v955_v29 = vld [vmem:[%s1243_s1 + $0xf8] sm:$0xff]   ;;  %v19_v33 = vld [vmem:[%s1244_s0 + $0x20] sm:$0xff] }
   0xb   :  { %v952_v26 = vld [vmem:[%s1243_s1 + $0x30] sm:$0xff]   ;;  %v956_v30 = vld [vmem:[%s1243_s1 + $0x38] sm:$0xff]   ;;  %v16_v34 = vld [vmem:[%s1244_s0 + $0x8] sm:$0xff]  ;;  %v766_v35 = vcombine.low %v15_v32, %v19_v33  ;;  %v767_v36 = vcombine.high %v15_v32, %v19_v33 }
   0xc   :  { %843 = vmatpush3.bf16.msra.mxu0 %v936_v10  ;;  %v953_v27 = vld [vmem:[%s1243_s1 + $0xb0] sm:$0xff]   ;;  %v957_v31 = vld [vmem:[%s1243_s1 + $0xb8] sm:$0xff]   ;;  %v20_v37 = vld [vmem:[%s1244_s0 + $0x28] sm:$0xff] }
   0xd   :  { %865 = vmatpush3.bf16.msra.mxu1 %v937_v11  ;;  %844 = vmatprep.subr.bf16.mxu0 %v938_v12  ;;  %v768_v38 = vcombine.low %v16_v34, %v20_v37  ;;  %v769_v39 = vcombine.high %v16_v34, %v20_v37  ;;  %v958_v40 = vld [vmem:[%s1243_s1 + $0x140] sm:$0xff]   ;;  %v962_v44 = vld [vmem:[%s1243_s1 + $0x148] sm:$0xff]   ;;  %v966_v48 = vld [vmem:[%s1243_s1 + $0x150] sm:$0xff]  }
   0xe   :  { %866 = vmatprep.subr.bf16.mxu1 %v939_v13  ;;  %614 = vmatprep.mubr.bf16.mxu0 %v767_v36  ;;  %v959_v41 = vld [vmem:[%s1243_s1 + $0x1c0] sm:$0xff]   ;;  %v963_v45 = vld [vmem:[%s1243_s1 + $0x1c8] sm:$0xff]   ;;  %v967_v49 = vld [vmem:[%s1243_s1 + $0x1d0] sm:$0xff]  }
   0xf   :  { %655 = vmatprep.mubr.bf16.mxu1 %v769_v39  ;;  %v960_v42 = vld [vmem:[%s1243_s1 + $0x100] sm:$0xff]   ;;  %v964_v46 = vld [vmem:[%s1243_s1 + $0x108] sm:$0xff]   ;;  %v968_v50 = vld [vmem:[%s1243_s1 + $0x110] sm:$0xff]  }
  0x10   :  { %845 = vmatpush3.bf16.msra.mxu0 %v940_v14  ;;  %v961_v43 = vld [vmem:[%s1243_s1 + $0x180] sm:$0xff]   ;;  %v965_v47 = vld [vmem:[%s1243_s1 + $0x188] sm:$0xff]   ;;  %v969_v51 = vld [vmem:[%s1243_s1 + $0x190] sm:$0xff]  }
  0x11   :  { %867 = vmatpush3.bf16.msra.mxu1 %v941_v15  ;;  %846 = vmatprep.subr.bf16.mxu0 %v942_v16  ;;  %v970_v52 = vld [vmem:[%s1243_s1 + $0x158] sm:$0xff]   ;;  %v974_v56 = vld [vmem:[%s1243_s1 + $0x160] sm:$0xff]   ;;  %v978_v60 = vld [vmem:[%s1243_s1 + $0x168] sm:$0xff]  }
  0x12   :  { %868 = vmatprep.subr.bf16.mxu1 %v943_v17  ;;  %v971_v53 = vld [vmem:[%s1243_s1 + $0x1d8] sm:$0xff]   ;;  %v975_v57 = vld [vmem:[%s1243_s1 + $0x1e0] sm:$0xff]   ;;  %v979_v61 = vld [vmem:[%s1243_s1 + $0x1e8] sm:$0xff]  }
  0x13   :  { %v972_v54 = vld [vmem:[%s1243_s1 + $0x118] sm:$0xff]   ;;  %v976_v58 = vld [vmem:[%s1243_s1 + $0x120] sm:$0xff]   ;;  %v980_v62 = vld [vmem:[%s1243_s1 + $0x128] sm:$0xff]  }
  0x14   :  { %847 = vmatpush3.bf16.msra.mxu0 %v944_v18  ;;  %v973_v55 = vld [vmem:[%s1243_s1 + $0x198] sm:$0xff]   ;;  %v977_v59 = vld [vmem:[%s1243_s1 + $0x1a0] sm:$0xff]   ;;  %v981_v63 = vld [vmem:[%s1243_s1 + $0x1a8] sm:$0xff]  }
  0x15   :  { %869 = vmatpush3.bf16.msra.mxu1 %v945_v19  ;;  %848 = vmatprep.subr.bf16.mxu0 %v946_v20  ;;  %v982_v0 = vld [vmem:[%s1243_s1 + $0x170] sm:$0xff]   ;;  %v986_v4 = vld [vmem:[%s1243_s1 + $0x178] sm:$0xff]   ;;  %v765_v18 = vld [vmem:[%s1245_s2] ss:$0 sm:$0xff] }
  0x16   :  { %870 = vmatprep.subr.bf16.mxu1 %v947_v21  ;;  %v983_v1 = vld [vmem:[%s1243_s1 + $0x1f0] sm:$0xff]   ;;  %v987_v5 = vld [vmem:[%s1243_s1 + $0x1f8] sm:$0xff]  }
  0x17   :  { %v984_v2 = vld [vmem:[%s1243_s1 + $0x130] sm:$0xff]   ;;  %v988_v6 = vld [vmem:[%s1243_s1 + $0x138] sm:$0xff]  }
  0x18   :  { %849 = vmatpush3.bf16.msra.mxu0 %v948_v22  ;;  %v985_v3 = vld [vmem:[%s1243_s1 + $0x1b0] sm:$0xff]   ;;  %v989_v7 = vld [vmem:[%s1243_s1 + $0x1b8] sm:$0xff]  }
  0x19   :  { %871 = vmatpush3.bf16.msra.mxu1 %v949_v23  ;;  %850 = vmatprep.subr.bf16.mxu0 %v950_v24  ;;  %v17_v8 = vld [vmem:[%s1244_s0 + $0x10] sm:$0xff]  ;;  %v18_v12 = vld [vmem:[%s1244_s0 + $0x18] sm:$0xff] }
  0x1a   :  { %872 = vmatprep.subr.bf16.mxu1 %v951_v25  ;;  %v21_v9 = vld [vmem:[%s1244_s0 + $0x30] sm:$0xff]  ;;  %v22_v13 = vld [vmem:[%s1244_s0 + $0x38] sm:$0xff] }
  0x1b   :  { %v770_v10 = vcombine.low %v17_v8, %v21_v9  ;;  %v771_v11 = vcombine.high %v17_v8, %v21_v9  ;;  %v772_v14 = vcombine.low %v18_v12, %v22_v13  ;;  %v773_v15 = vcombine.high %v18_v12, %v22_v13 }
  0x1c   :  { %851 = vmatpush3.bf16.msra.mxu0 %v952_v26 }
  0x1d   :  { %873 = vmatpush3.bf16.msra.mxu1 %v953_v27  ;;  %852 = vmatprep.subr.bf16.mxu0 %v954_v28 }
  0x1e   :  { %874 = vmatprep.subr.bf16.mxu1 %v955_v29 }
  0x20   :  { %853 = vmatpush3.bf16.msra.mxu0 %v956_v30 }
  0x21   :  { %875 = vmatpush3.bf16.msra.mxu1 %v957_v31  ;;  %882 = vmatprep.subr.bf16.mxu0 %v958_v40 }
  0x22   :  { %904 = vmatprep.subr.bf16.mxu1 %v959_v41 }
  0x23   :  { %615 = vmatmul.mubr.bf16.vlgmr.msra.gmra.mrb[0].mxu0 %v766_v35 }
  0x24   :  { %656 = vmatmul.mubr.bf16.vlgmr.msra.gmra.mrb[0].mxu1 %v768_v38  ;;  %883 = vmatpush3.bf16.msra.mxu0 %v960_v42 }
  0x25   :  { %905 = vmatpush3.bf16.msra.mxu1 %v961_v43  ;;  %884 = vmatprep.subr.bf16.mxu0 %v962_v44 }
  0x26   :  { %906 = vmatprep.subr.bf16.mxu1 %v963_v45  ;;  %696 = vmatprep.mubr.bf16.mxu0 %v771_v11 }
  0x27   :  { %737 = vmatprep.mubr.bf16.mxu1 %v773_v15 }
  0x28   :  { %885 = vmatpush3.bf16.msra.mxu0 %v964_v46 }
  0x29   :  { %907 = vmatpush3.bf16.msra.mxu1 %v965_v47  ;;  %886 = vmatprep.subr.bf16.mxu0 %v966_v48 }
  0x2a   :  { %908 = vmatprep.subr.bf16.mxu1 %v967_v49 }
  0x2c   :  { %887 = vmatpush3.bf16.msra.mxu0 %v968_v50 }
  0x2d   :  { %909 = vmatpush3.bf16.msra.mxu1 %v969_v51  ;;  %888 = vmatprep.subr.bf16.mxu0 %v970_v52 }
  0x2e   :  { %910 = vmatprep.subr.bf16.mxu1 %v971_v53 }
  0x30   :  { %889 = vmatpush3.bf16.msra.mxu0 %v972_v54 }
  0x31   :  { %911 = vmatpush3.bf16.msra.mxu1 %v973_v55  ;;  %890 = vmatprep.subr.bf16.mxu0 %v974_v56 }
  0x32   :  { %912 = vmatprep.subr.bf16.mxu1 %v975_v57 }
  0x34   :  { %891 = vmatpush3.bf16.msra.mxu0 %v976_v58 }
  0x35   :  { %913 = vmatpush3.bf16.msra.mxu1 %v977_v59  ;;  %892 = vmatprep.subr.bf16.mxu0 %v978_v60 }
  0x36   :  { %914 = vmatprep.subr.bf16.mxu1 %v979_v61 }
  0x38   :  { %893 = vmatpush3.bf16.msra.mxu0 %v980_v62 }
  0x39   :  { %915 = vmatpush3.bf16.msra.mxu1 %v981_v63  ;;  %894 = vmatprep.subr.bf16.mxu0 %v982_v0 }
  0x3a   :  { %916 = vmatprep.subr.bf16.mxu1 %v983_v1 }
  0x3c   :  { %895 = vmatpush3.bf16.msra.mxu0 %v984_v2 }
  0x3d   :  { %917 = vmatpush3.bf16.msra.mxu1 %v985_v3  ;;  %896 = vmatprep.subr.bf16.mxu0 %v986_v4 }
  0x3e   :  { %918 = vmatprep.subr.bf16.mxu1 %v987_v5 }
  0x40   :  { %897 = vmatpush3.bf16.msra.mxu0 %v988_v6 }
  0x41   :  { %919 = vmatpush3.bf16.msra.mxu1 %v989_v7 }
  0x43   :  { %697 = vmatmul.mubr.bf16.vlgmr.msra.gmra.mrb[4].mxu0 %v770_v10 }
  0x44   :  { %738 = vmatmul.mubr.bf16.vlgmr.msra.gmra.mrb[4].mxu1 %v772_v14 }
  0xf6   :  { %v854_v16 = vpop.f32.mrb[0].mxu0 }
  0xf7   :  { %v876_v17 = vpop.f32.mrb[0].mxu1  ;;  %v855_v19 = vpop.f32.mrb[1].mxu0 }
  0xf8   :  { %v856_v20 = vadd.f32 %v855_v19, %v854_v16  ;;  %v877_v21 = vpop.f32.mrb[1].mxu1  ;;  %v857_v22 = vpop.f32.mrb[2].mxu0 }
  0xf9   :  { %v878_v23 = vadd.f32 %v877_v21, %v876_v17  ;;  %v879_v24 = vpop.f32.mrb[2].mxu1  ;;  %v858_v25 = vpop.f32.mrb[3].mxu0 }
  0xfa   :  { %v617_v26 = vadd.f32 %v856_v20, %v765_v18  ;;  %v859_v27 = vadd.f32 %v858_v25, %v857_v22  ;;  %v880_v28 = vpop.f32.mrb[3].mxu1 }
  0xfb   :  { %v881_v29 = vadd.f32 %v880_v28, %v879_v24 }
  0xfc   :  { %v658_v30 = vadd.f32 %v878_v23, %v617_v26  ;;  %v620_v31 = vadd.f32 %v859_v27, %v765_v18 }
  0xfe   :  { %v661_v32 = vadd.f32 %v881_v29, %v620_v31 }
 0x116   :  { %v898_v33 = vpop.f32.mrb[4].mxu0 }
 0x117   :  { %v920_v34 = vpop.f32.mrb[4].mxu1  ;;  %v899_v35 = vpop.f32.mrb[5].mxu0 }
 0x118   :  { %v900_v36 = vadd.f32 %v899_v35, %v898_v33  ;;  %v921_v37 = vpop.f32.mrb[5].mxu1  ;;  %v901_v38 = vpop.f32.mrb[6].mxu0 }
 0x119   :  { %v922_v39 = vadd.f32 %v921_v37, %v920_v34  ;;  %v923_v40 = vpop.f32.mrb[6].mxu1  ;;  %v902_v41 = vpop.f32.mrb[7].mxu0 }
 0x11a   :  { %v699_v42 = vadd.f32 %v900_v36, %v658_v30  ;;  %v903_v43 = vadd.f32 %v902_v41, %v901_v38  ;;  %v924_v44 = vpop.f32.mrb[7].mxu1 }
 0x11b   :  { %v925_v45 = vadd.f32 %v924_v44, %v923_v40 }
 0x11c   :  { %v740_v46 = vadd.f32 %v922_v39, %v699_v42  ;;  %v702_v47 = vadd.f32 %v903_v43, %v661_v32 }
 0x11e   :  { %v746_v48 = vsub.f32 0.0, %v740_v46  ;;  %v743_v49 = vadd.f32 %v925_v45, %v702_v47 }
 0x120   :  { %v748_v50 = vmul.f32 1.442695, %v746_v48  ;;  %v747_v51 = vsub.f32 0.0, %v743_v49 }
 0x122   :  { %990 = vpow2.f32 %v748_v50  ;;  %v750_v52 = vmul.f32 1.442695, %v747_v51 }
 0x124   :  { %992 = vpow2.f32 %v750_v52 }
 0x12c   :  { %v991_v53 = vpop.eup %990 }
 0x12d   :  { %v752_v54 = vadd.f32 1.0, %v991_v53 }
 0x12e   :  { %v993_v55 = vpop.eup %992 }
 0x12f   :  { %994 = vrcp.f32 %v752_v54  ;;  %v753_v56 = vadd.f32 1.0, %v993_v55 }
 0x131   :  { %996 = vrcp.f32 %v753_v56 }
 0x139   :  { %v995_v57 = vpop.eup %994 }
 0x13a   :  { %759 = vst.msk [vmem:[%s1246_s3] sm:$0xff] %vm758_vm0, %v995_v57 }
 0x13b   :  { %v997_v58 = vpop.eup %996 }
 0x13c   :  { %760 = vst.msk [vmem:[%s1246_s3 + $0x8] sm:$0xff] %vm758_vm0, %v997_v58 }

</bundles_post_ra>
